<compile_context>
chip_gen: v5e
topology: v5e:2x2
jax: 0.10.0
libtpu: 0.0.40
codegen_flags: <defaults>
</compile_context>

<pallas_src>
import functools
import math

import jax
import jax.numpy as jnp
from jax import lax
from jax.experimental import pallas as pl
from jax.experimental.pallas import tpu as pltpu

# ----------------------- hyper parameters ("lib") -----------------------
VOCAB = 50
EMBED = 100
HIDDEN = 32
NUM_LAYER = 2          # structure below hardcodes 2 layers
MAX_LEN = 8
BATCH = 2

# ----------------------- padded / derived sizes -------------------------
H = HIDDEN
T = MAX_LEN
BP = 8                 # batch padded to a full sublane tile
TB = T * BP            # 64: time stacked along sublanes for batched projections
VOCAB_P = 64           # one-hot contraction dim padded
EMB_P = 128            # embedding / fc1-block / fc2-out width padded to lane width
G = 4 * H              # 128: per-direction gate width
G2 = 2 * G             # 256: packed fw|bw gate width
CLS_P = 128            # padded logit width
NEG_BIG = -1e30

assert NUM_LAYER == 2

VMEM_SPEC = pl.BlockSpec(memory_space=pltpu.MemorySpace.VMEM)


# ------------------------------ fused kernel ------------------------------
def _imdb_fused_kernel(ids_ref, emb_ref,
                       wih_fb0_ref, whh_fb0_ref, b_fb0_ref,
                       wih_fb1_ref, whh_fb1_ref, b_fb1_ref,
                       fc1_w_ref, fc1_b_ref,
                       wih_u0_ref, whh_u0_ref, b_u0_ref,
                       wih_u1_ref, whh_u1_ref, b_u1_ref,
                       fc2_w_ref, fc2_b_ref,
                       fc3_w_ref, fc3_b_ref,
                       out_ref,
                       gx_bi_scr, gx_uni_scr, hs_bi_scr, hs_uni_scr, ycat_scr):
    f32 = jnp.float32
    dot = functools.partial(jnp.dot, preferred_element_type=f32)

    # ---- static lane masks / activation constants ----
    # packed gate column order: [i_fw|i_bw|f_fw|f_bw|g_fw|g_bw|o_fw|o_bw], each H wide
    lane_g2 = lax.broadcasted_iota(jnp.int32, (BP, G2), 1)
    tanh_mask_g2 = (lane_g2 >= 2 * (2 * H)) & (lane_g2 < 3 * (2 * H))   # g-gate lanes
    fw_mask_g2 = jnp.bitwise_and(lane_g2, 2 * H - 1) < H                # fw columns
    lane_g = lax.broadcasted_iota(jnp.int32, (BP, G), 1)
    tanh_mask_g = (lane_g >= 2 * H) & (lane_g < 3 * H)                  # uni g-gate lanes
    lane_h2 = lax.broadcasted_iota(jnp.int32, (BP, 2 * H), 1)
    fw_mask_h2 = lane_h2 < H

    # single-tanh activation:  sigmoid(x) = 0.5*tanh(0.5*x) + 0.5
    #   pre = gates*scl ; t = tanh(pre) ; act = t*scl + off
    scl_g2 = jnp.where(tanh_mask_g2, 1.0, 0.5).astype(f32)
    off_g2 = jnp.where(tanh_mask_g2, 0.0, 0.5).astype(f32)
    scl_g = jnp.where(tanh_mask_g, 1.0, 0.5).astype(f32)
    off_g = jnp.where(tanh_mask_g, 0.0, 0.5).astype(f32)

    ids = ids_ref[...]                                   # [BP, T] int32
    vocab_iota = lax.broadcasted_iota(jnp.int32, (BP, VOCAB_P), 1)

    # =============== prologue: batched embedding gather + layer-0 projection ===============
    # stacked one-hot: row block t = one-hot(ids[:, t])            -> [TB, VOCAB_P]
    onehot_stack = jnp.concatenate(
        [(ids[:, t:t + 1] == vocab_iota).astype(f32) for t in range(T)], axis=0)
    x_stack = dot(onehot_stack, emb_ref[...])                       # [TB, EMB_P]
    gx_all0 = (dot(x_stack, wih_fb0_ref[...])
               + jnp.broadcast_to(b_fb0_ref[...], (TB, G2)))        # [TB, G2]
    # fold fw/bw time pairing now (fw uses x(s), bw uses x(T-1-s)); stage in scratch
    for s in range(T):
        gx_bi_scr[s * BP:(s + 1) * BP, :] = jnp.where(
            fw_mask_g2,
            gx_all0[s * BP:(s + 1) * BP, :],
            gx_all0[(T - 1 - s) * BP:(T - s) * BP, :])

    # =============== bidirectional LSTM recurrence (packed fw|bw, 256-wide) ===============
    def bilstm_layer(whh_bd, hs_out_ref):
        """Per-step gate inputs read from gx_bi_scr; returns final packed h = [h_fw|h_bw]."""
        h = jnp.zeros((BP, 2 * H), f32)
        c = jnp.zeros((BP, 2 * H), f32)
        for s in range(T):                               # fully unrolled (static)
            gates = gx_bi_scr[s * BP:(s + 1) * BP, :] + dot(h, whh_bd)   # one MXU pass
            t_act = jnp.tanh(gates * scl_g2)             # single EUP pass over all gates
            act = t_act * scl_g2 + off_g2                # tanh lanes / sigmoid lanes
            i_g = act[:, 0 * 2 * H:1 * 2 * H]            # [BP, 2H], fw|bw aligned with h/c
            f_g = act[:, 1 * 2 * H:2 * 2 * H]
            g_g = act[:, 2 * 2 * H:3 * 2 * H]
            o_g = act[:, 3 * 2 * H:4 * 2 * H]
            c = f_g * c + i_g * g_g
            h = o_g * jnp.tanh(c)
            if hs_out_ref is not None:
                hs_out_ref[s * BP:(s + 1) * BP, :] = h
        return h

    # layer 0: hidden states of all steps needed as layer-1 input
    bilstm_layer(whh_fb0_ref[...], hs_bi_scr)

    # ---- layer 1: batched projection of layer-0 outputs ----
    hs0 = hs_bi_scr[...]                                 # [TB, 2H]; block s = [h_fw(s)|h_bw(T-1-s)]
    # layer-0 output at time t = [h_fw(t) | h_bw(t)]  (one lane select per block, prologue only)
    in_stack = jnp.concatenate(
        [jnp.where(fw_mask_h2,
                   hs0[t * BP:(t + 1) * BP, :],
                   hs0[(T - 1 - t) * BP:(T - t) * BP, :]) for t in range(T)], axis=0)
    gx_all1 = (dot(in_stack, wih_fb1_ref[...])
               + jnp.broadcast_to(b_fb1_ref[...], (TB, G2)))
    for s in range(T):
        gx_bi_scr[s * BP:(s + 1) * BP, :] = jnp.where(
            fw_mask_g2,
            gx_all1[s * BP:(s + 1) * BP, :],
            gx_all1[(T - 1 - s) * BP:(T - s) * BP, :])

    # final packed hidden = [h_n[-2] | h_n[-1]] = cat(fw final, bw final)
    bi_out = bilstm_layer(whh_fb1_ref[...], None)        # [BP, 2H]

    # =============== fc1 + relu (columns pre-grouped into 128-wide t-blocks) ===============
    x1 = dot(bi_out, fc1_w_ref[...]) + jnp.broadcast_to(fc1_b_ref[...], (BP, T * EMB_P))
    x1 = jnp.maximum(x1, 0.0)                            # [BP, T*128]
    # regroup to [TB, EMB_P]: 128-lane whole-vreg slices stacked along sublanes (layout-only)
    x1_stack = jnp.concatenate(
        [x1[:, t * EMB_P:(t + 1) * EMB_P] for t in range(T)], axis=0)

    # =============== unidirectional LSTM (2 layers) ===============
    def uni_layer(whh, hs_out_ref=None, ycat_out_ref=None):
        h = jnp.zeros((BP, H), f32)
        c = jnp.zeros((BP, H), f32)
        for t in range(T):                               # fully unrolled (static)
            gates = gx_uni_scr[t * BP:(t + 1) * BP, :] + dot(h, whh)     # [BP, G]
            t_act = jnp.tanh(gates * scl_g)
            act = t_act * scl_g + off_g
            i_g = act[:, 0 * H:1 * H]
            f_g = act[:, 1 * H:2 * H]
            g_g = act[:, 2 * H:3 * H]
            o_g = act[:, 3 * H:4 * H]
            c = f_g * c + i_g * g_g
            h = o_g * jnp.tanh(c)
            if hs_out_ref is not None:
                hs_out_ref[t * BP:(t + 1) * BP, :] = h
            if ycat_out_ref is not None:                 # view(-1, max_len*hidden) slab
                ycat_out_ref[:, t * H:(t + 1) * H] = h
        return h

    # layer 0: one batched [64,128]x[128,128] input projection
    gx_uni_scr[...] = dot(x1_stack, wih_u0_ref[...]) + jnp.broadcast_to(b_u0_ref[...], (TB, G))
    uni_layer(whh_u0_ref[...], hs_out_ref=hs_uni_scr)

    # layer 1: one batched [64,32]x[32,128] input projection of layer-0 hiddens
    gx_uni_scr[...] = dot(hs_uni_scr[...], wih_u1_ref[...]) + jnp.broadcast_to(b_u1_ref[...], (TB, G))
    uni_layer(whh_u1_ref[...], ycat_out_ref=ycat_scr)

    # =============== fc2 + relu, fc3 + log_softmax ===============
    y2 = dot(ycat_scr[...], fc2_w_ref[...]) + jnp.broadcast_to(fc2_b_ref[...], (BP, EMB_P))
    y2 = jnp.maximum(y2, 0.0)                            # padded lanes stay exactly 0

    logits = dot(y2, fc3_w_ref[...]) + jnp.broadcast_to(fc3_b_ref[...], (BP, CLS_P))
    # padded logit lanes carry a -1e30 bias -> exp underflows to 0 -> softmax is over
    # the 2 real classes only; lanes 0..1 hold the correct log-probs.
    m = jnp.max(logits, axis=-1, keepdims=True)
    z = logits - m
    lse = jnp.log(jnp.sum(jnp.exp(z), axis=-1, keepdims=True))
    out_ref[...] = z - lse


# ------------------------------ host wrapper ------------------------------
@jax.jit
def imdb_forward(ids, params):
    """ids: int32 [B, MAX_LEN] -> log-probs float32 [B, 2] (one fused pallas_call)."""
    B = ids.shape[0]
    ids_pad = jnp.zeros((BP, T), jnp.int32).at[:B, :].set(ids.astype(jnp.int32))
    out = pl.pallas_call(
        _imdb_fused_kernel,
        out_shape=jax.ShapeDtypeStruct((BP, CLS_P), jnp.float32),
        in_specs=[VMEM_SPEC] * 20,
        out_specs=VMEM_SPEC,
        scratch_shapes=[
            pltpu.VMEM((TB, G2), jnp.float32),      # gx_bi_scr  (reused: bidir layer 0 then 1)
            pltpu.VMEM((TB, G), jnp.float32),       # gx_uni_scr (reused: uni layer 0 then 1)
            pltpu.VMEM((TB, 2 * H), jnp.float32),   # hs_bi_scr  (bidir layer-0 hidden sequence)
            pltpu.VMEM((TB, H), jnp.float32),       # hs_uni_scr (uni layer-0 hidden sequence)
            pltpu.VMEM((BP, T * H), jnp.float32),   # ycat_scr   (view(-1, T*H) slab)
        ],
        cost_estimate=pl.CostEstimate(flops=18_000_000, transcendentals=70_000,
                                      bytes_accessed=1_000_000),
    )(ids_pad, params["emb"],
      params["wih_fb0"], params["whh_fb0"], params["b_fb0"],
      params["wih_fb1"], params["whh_fb1"], params["b_fb1"],
      params["fc1_w"], params["fc1_b"],
      params["wih_u0"], params["whh_u0"], params["b_u0"],
      params["wih_u1"], params["whh_u1"], params["b_u1"],
      params["fc2_w"], params["fc2_b"],
      params["fc3_w"], params["fc3_b"])
    return out[:B, :2]


# ------------------------------ parameters -------------------------------
def _uniform(key, shape, scale):
    return jax.random.uniform(key, shape, jnp.float32, -scale, scale)


def _pack_bidir(fw, bw, d_in_pad):
    """Pack (w_ih [d_in,4H], w_hh [H,4H], b [1,4H]) of both directions into
    256-wide MXU operands. Packed gate-column order is
    [i_fw|i_bw|f_fw|f_bw|g_fw|g_bw|o_fw|o_bw] (each H wide) so gate slices of
    the packed gates are 64-lane aligned and line up with the packed [h_fw|h_bw]
    state. W_hh is block-structured (zeros off-block) so directions stay independent."""
    w_ih_fw, w_hh_fw, b_fw = fw
    w_ih_bw, w_hh_bw, b_bw = bw
    d_in = w_ih_fw.shape[0]
    wih = jnp.zeros((d_in_pad, G2), jnp.float32)
    whh = jnp.zeros((2 * H, G2), jnp.float32)
    b = jnp.zeros((1, G2), jnp.float32)
    for k in range(4):                                   # i, f, g, o
        src = slice(k * H, (k + 1) * H)
        dst_fw = slice(k * 2 * H, k * 2 * H + H)
        dst_bw = slice(k * 2 * H + H, (k + 1) * 2 * H)
        wih = wih.at[:d_in, dst_fw].set(w_ih_fw[:, src]).at[:d_in, dst_bw].set(w_ih_bw[:, src])
        whh = whh.at[0:H, dst_fw].set(w_hh_fw[:, src]).at[H:2 * H, dst_bw].set(w_hh_bw[:, src])
        b = b.at[:, dst_fw].set(b_fw[:, src]).at[:, dst_bw].set(b_bw[:, src])
    return wih, whh, b


def init_params(key):
    ks = iter(jax.random.split(key, 32))
    s_h = 1.0 / math.sqrt(HIDDEN)

    def lstm_dir(d_in):
        return (_uniform(next(ks), (d_in, 4 * H), s_h),
                _uniform(next(ks), (H, 4 * H), s_h),
                _uniform(next(ks), (1, 4 * H), s_h))     # b_ih + b_hh combined

    p = {}

    # embedding table, zero-padded to [VOCAB_P, EMB_P]
    emb = jax.random.normal(next(ks), (VOCAB, EMBED), jnp.float32)
    p["emb"] = jnp.zeros((VOCAB_P, EMB_P), jnp.float32).at[:VOCAB, :EMBED].set(emb)

    # bidirectional LSTM (2 layers): layer 0 input=EMBED, layer 1 input=2H
    p["wih_fb0"], p["whh_fb0"], p["b_fb0"] = _pack_bidir(lstm_dir(EMBED), lstm_dir(EMBED), EMB_P)
    p["wih_fb1"], p["whh_fb1"], p["b_fb1"] = _pack_bidir(lstm_dir(2 * H), lstm_dir(2 * H), 2 * H)

    # fc1 [2H -> MAX_LEN*100], columns regrouped per time step into 128-wide blocks
    s1 = 1.0 / math.sqrt(2 * H)
    w1 = _uniform(next(ks), (2 * H, MAX_LEN * EMBED), s1)
    b1 = _uniform(next(ks), (1, MAX_LEN * EMBED), s1)
    w1p = jnp.zeros((2 * H, T * EMB_P), jnp.float32)
    b1p = jnp.zeros((1, T * EMB_P), jnp.float32)
    for t in range(T):
        w1p = w1p.at[:, t * EMB_P:t * EMB_P + EMBED].set(w1[:, t * EMBED:(t + 1) * EMBED])
        b1p = b1p.at[:, t * EMB_P:t * EMB_P + EMBED].set(b1[:, t * EMBED:(t + 1) * EMBED])
    p["fc1_w"], p["fc1_b"] = w1p, b1p

    # unidirectional LSTM (2 layers): layer 0 input=EMBED (row-padded to 128), layer 1 input=H
    wih_u0, whh_u0, b_u0 = lstm_dir(EMBED)
    p["wih_u0"] = jnp.zeros((EMB_P, 4 * H), jnp.float32).at[:EMBED, :].set(wih_u0)
    p["whh_u0"], p["b_u0"] = whh_u0, b_u0
    p["wih_u1"], p["whh_u1"], p["b_u1"] = lstm_dir(H)

    # fc2 [T*H -> 100], output padded to 128 lanes (pad weights/bias are zero)
    s2 = 1.0 / math.sqrt(T * H)
    w2 = _uniform(next(ks), (T * H, EMBED), s2)
    b2 = _uniform(next(ks), (1, EMBED), s2)
    p["fc2_w"] = jnp.zeros((T * H, EMB_P), jnp.float32).at[:, :EMBED].set(w2)
    p["fc2_b"] = jnp.zeros((1, EMB_P), jnp.float32).at[:, :EMBED].set(b2)

    # fc3 [100 -> 2], padded to 128x128; padded logit lanes get a -1e30 bias
    s3 = 1.0 / math.sqrt(EMBED)
    w3 = _uniform(next(ks), (EMBED, 2), s3)
    b3 = _uniform(next(ks), (1, 2), s3)
    p["fc3_w"] = jnp.zeros((EMB_P, CLS_P), jnp.float32).at[:EMBED, :2].set(w3)
    p["fc3_b"] = jnp.full((1, CLS_P), NEG_BIG, jnp.float32).at[:, :2].set(b3)

    return p


# ---------------------------------- main ----------------------------------
if __name__ == "__main__":
    key = jax.random.PRNGKey(0)
    k_param, k_ids = jax.random.split(key)
    params = init_params(k_param)
    ids = jax.random.randint(k_ids, (BATCH, MAX_LEN), 0, VOCAB, dtype=jnp.int32)

    out = imdb_forward(ids, params)
    out = jax.block_until_ready(out)

    assert out.shape == (BATCH, 2)
    assert out.dtype == jnp.float32
    assert bool(jnp.all(jnp.isfinite(out)))
    # log_softmax rows should exponentiate-sum to ~1
    assert bool(jnp.all(jnp.abs(jnp.sum(jnp.exp(out), axis=-1) - 1.0) < 1e-4))
    print("KERNEL_OK")
</pallas_src>

<mosaic_0001>
module attributes {stable_mosaic.version = 11 : i64} {
  func.func @_imdb_fused_kernel(%arg0: memref<8x8xi32, #tpu.memory_space<vmem>>, %arg1: memref<64x128xf32, #tpu.memory_space<vmem>>, %arg2: memref<128x256xf32, #tpu.memory_space<vmem>>, %arg3: memref<64x256xf32, #tpu.memory_space<vmem>>, %arg4: memref<1x256xf32, #tpu.memory_space<vmem>>, %arg5: memref<64x256xf32, #tpu.memory_space<vmem>>, %arg6: memref<64x256xf32, #tpu.memory_space<vmem>>, %arg7: memref<1x256xf32, #tpu.memory_space<vmem>>, %arg8: memref<64x1024xf32, #tpu.memory_space<vmem>>, %arg9: memref<1x1024xf32, #tpu.memory_space<vmem>>, %arg10: memref<128x128xf32, #tpu.memory_space<vmem>>, %arg11: memref<32x128xf32, #tpu.memory_space<vmem>>, %arg12: memref<1x128xf32, #tpu.memory_space<vmem>>, %arg13: memref<32x128xf32, #tpu.memory_space<vmem>>, %arg14: memref<32x128xf32, #tpu.memory_space<vmem>>, %arg15: memref<1x128xf32, #tpu.memory_space<vmem>>, %arg16: memref<256x128xf32, #tpu.memory_space<vmem>>, %arg17: memref<1x128xf32, #tpu.memory_space<vmem>>, %arg18: memref<128x128xf32, #tpu.memory_space<vmem>>, %arg19: memref<1x128xf32, #tpu.memory_space<vmem>>, %arg20: memref<8x128xf32, #tpu.memory_space<vmem>>, %arg21: memref<64x256xf32, #tpu.memory_space<vmem>>, %arg22: memref<64x128xf32, #tpu.memory_space<vmem>>, %arg23: memref<64x64xf32, #tpu.memory_space<vmem>>, %arg24: memref<64x32xf32, #tpu.memory_space<vmem>>, %arg25: memref<8x256xf32, #tpu.memory_space<vmem>>) attributes {dimension_semantics = [], scalar_prefetch = 0 : i64, scratch_operands = 5 : i64, tpu.core_type = #tpu.core_type<tc>} {
    %0 = tpu.iota {dimensions = array<i32: 1>} : vector<8x256xi32>
    %c128_i32 = arith.constant 128 : i32
    %1 = vector.broadcast %c128_i32 : i32 to vector<8x256xi32>
    %2 = arith.cmpi sge, %0, %1 : vector<8x256xi32>
    %c192_i32 = arith.constant 192 : i32
    %3 = vector.broadcast %c192_i32 : i32 to vector<8x256xi32>
    %4 = arith.cmpi slt, %0, %3 : vector<8x256xi32>
    %5 = arith.andi %2, %4 : vector<8x256xi1>
    %c63_i32 = arith.constant 63 : i32
    %6 = vector.broadcast %c63_i32 : i32 to vector<8x256xi32>
    %7 = arith.andi %0, %6 : vector<8x256xi32>
    %c32_i32 = arith.constant 32 : i32
    %8 = vector.broadcast %c32_i32 : i32 to vector<8x256xi32>
    %9 = arith.cmpi slt, %7, %8 : vector<8x256xi32>
    %10 = tpu.iota {dimensions = array<i32: 1>} : vector<8x128xi32>
    %c64_i32 = arith.constant 64 : i32
    %11 = vector.broadcast %c64_i32 : i32 to vector<8x128xi32>
    %12 = arith.cmpi sge, %10, %11 : vector<8x128xi32>
    %c96_i32 = arith.constant 96 : i32
    %13 = vector.broadcast %c96_i32 : i32 to vector<8x128xi32>
    %14 = arith.cmpi slt, %10, %13 : vector<8x128xi32>
    %15 = arith.andi %12, %14 : vector<8x128xi1>
    %16 = tpu.iota {dimensions = array<i32: 1>} : vector<8x64xi32>
    %c32_i32_0 = arith.constant 32 : i32
    %17 = vector.broadcast %c32_i32_0 : i32 to vector<8x64xi32>
    %18 = arith.cmpi slt, %16, %17 : vector<8x64xi32>
    %cst = arith.constant 1.000000e+00 : f32
    %cst_1 = arith.constant 5.000000e-01 : f32
    %19 = vector.broadcast %cst : f32 to vector<8x256xf32>
    %20 = vector.broadcast %cst_1 : f32 to vector<8x256xf32>
    %21 = arith.select %5, %19, %20 : vector<8x256xi1>, vector<8x256xf32>
    %cst_2 = arith.constant 0.000000e+00 : f32
    %cst_3 = arith.constant 5.000000e-01 : f32
    %22 = vector.broadcast %cst_2 : f32 to vector<8x256xf32>
    %23 = vector.broadcast %cst_3 : f32 to vector<8x256xf32>
    %24 = arith.select %5, %22, %23 : vector<8x256xi1>, vector<8x256xf32>
    %cst_4 = arith.constant 1.000000e+00 : f32
    %cst_5 = arith.constant 5.000000e-01 : f32
    %25 = vector.broadcast %cst_4 : f32 to vector<8x128xf32>
    %26 = vector.broadcast %cst_5 : f32 to vector<8x128xf32>
    %27 = arith.select %15, %25, %26 : vector<8x128xi1>, vector<8x128xf32>
    %cst_6 = arith.constant 0.000000e+00 : f32
    %cst_7 = arith.constant 5.000000e-01 : f32
    %28 = vector.broadcast %cst_6 : f32 to vector<8x128xf32>
    %29 = vector.broadcast %cst_7 : f32 to vector<8x128xf32>
    %30 = arith.select %15, %28, %29 : vector<8x128xi1>, vector<8x128xf32>
    %c0 = arith.constant 0 : index
    %c0_8 = arith.constant 0 : index
    %31 = vector.load %arg0[%c0, %c0_8] : memref<8x8xi32, #tpu.memory_space<vmem>>, vector<8x8xi32>
    %32 = tpu.iota {dimensions = array<i32: 1>} : vector<8x64xi32>
    %33 = vector.extract_strided_slice %31 {offsets = [0, 0], sizes = [8, 1], strides = [1, 1]} : vector<8x8xi32> to vector<8x1xi32>
    %34 = vector.broadcast %33 : vector<8x1xi32> to vector<8x64xi32>
    %35 = arith.cmpi eq, %34, %32 : vector<8x64xi32>
    %36 = arith.extui %35 : vector<8x64xi1> to vector<8x64xi32>
    %37 = arith.sitofp %36 : vector<8x64xi32> to vector<8x64xf32>
    %38 = vector.extract_strided_slice %31 {offsets = [0, 1], sizes = [8, 1], strides = [1, 1]} : vector<8x8xi32> to vector<8x1xi32>
    %39 = vector.broadcast %38 : vector<8x1xi32> to vector<8x64xi32>
    %40 = arith.cmpi eq, %39, %32 : vector<8x64xi32>
    %41 = arith.extui %40 : vector<8x64xi1> to vector<8x64xi32>
    %42 = arith.sitofp %41 : vector<8x64xi32> to vector<8x64xf32>
    %43 = vector.extract_strided_slice %31 {offsets = [0, 2], sizes = [8, 1], strides = [1, 1]} : vector<8x8xi32> to vector<8x1xi32>
    %44 = vector.broadcast %43 : vector<8x1xi32> to vector<8x64xi32>
    %45 = arith.cmpi eq, %44, %32 : vector<8x64xi32>
    %46 = arith.extui %45 : vector<8x64xi1> to vector<8x64xi32>
    %47 = arith.sitofp %46 : vector<8x64xi32> to vector<8x64xf32>
    %48 = vector.extract_strided_slice %31 {offsets = [0, 3], sizes = [8, 1], strides = [1, 1]} : vector<8x8xi32> to vector<8x1xi32>
    %49 = vector.broadcast %48 : vector<8x1xi32> to vector<8x64xi32>
    %50 = arith.cmpi eq, %49, %32 : vector<8x64xi32>
    %51 = arith.extui %50 : vector<8x64xi1> to vector<8x64xi32>
    %52 = arith.sitofp %51 : vector<8x64xi32> to vector<8x64xf32>
    %53 = vector.extract_strided_slice %31 {offsets = [0, 4], sizes = [8, 1], strides = [1, 1]} : vector<8x8xi32> to vector<8x1xi32>
    %54 = vector.broadcast %53 : vector<8x1xi32> to vector<8x64xi32>
    %55 = arith.cmpi eq, %54, %32 : vector<8x64xi32>
    %56 = arith.extui %55 : vector<8x64xi1> to vector<8x64xi32>
    %57 = arith.sitofp %56 : vector<8x64xi32> to vector<8x64xf32>
    %58 = vector.extract_strided_slice %31 {offsets = [0, 5], sizes = [8, 1], strides = [1, 1]} : vector<8x8xi32> to vector<8x1xi32>
    %59 = vector.broadcast %58 : vector<8x1xi32> to vector<8x64xi32>
    %60 = arith.cmpi eq, %59, %32 : vector<8x64xi32>
    %61 = arith.extui %60 : vector<8x64xi1> to vector<8x64xi32>
    %62 = arith.sitofp %61 : vector<8x64xi32> to vector<8x64xf32>
    %63 = vector.extract_strided_slice %31 {offsets = [0, 6], sizes = [8, 1], strides = [1, 1]} : vector<8x8xi32> to vector<8x1xi32>
    %64 = vector.broadcast %63 : vector<8x1xi32> to vector<8x64xi32>
    %65 = arith.cmpi eq, %64, %32 : vector<8x64xi32>
    %66 = arith.extui %65 : vector<8x64xi1> to vector<8x64xi32>
    %67 = arith.sitofp %66 : vector<8x64xi32> to vector<8x64xf32>
    %68 = vector.extract_strided_slice %31 {offsets = [0, 7], sizes = [8, 1], strides = [1, 1]} : vector<8x8xi32> to vector<8x1xi32>
    %69 = vector.broadcast %68 : vector<8x1xi32> to vector<8x64xi32>
    %70 = arith.cmpi eq, %69, %32 : vector<8x64xi32>
    %71 = arith.extui %70 : vector<8x64xi1> to vector<8x64xi32>
    %72 = arith.sitofp %71 : vector<8x64xi32> to vector<8x64xf32>
    %73 = tpu.concatenate %37, %42, %47, %52, %57, %62, %67, %72 in 0 : vector<8x64xf32>, vector<8x64xf32>, vector<8x64xf32>, vector<8x64xf32>, vector<8x64xf32>, vector<8x64xf32>, vector<8x64xf32>, vector<8x64xf32> -> vector<64x64xf32>
    %c0_9 = arith.constant 0 : index
    %c0_10 = arith.constant 0 : index
    %74 = vector.load %arg1[%c0_9, %c0_10] : memref<64x128xf32, #tpu.memory_space<vmem>>, vector<64x128xf32>
    %cst_11 = arith.constant dense<0.000000e+00> : vector<64x128xf32>
    %75 = tpu.matmul %73, %74, %cst_11 {dimension_numbers = #tpu.dot_dimension_numbers<[1], [0], [0], [1], [0, 0, 1, 1], [], []>} : vector<64x64xf32>, vector<64x128xf32>, vector<64x128xf32> -> vector<64x128xf32>
    %c0_12 = arith.constant 0 : index
    %c0_13 = arith.constant 0 : index
    %76 = vector.load %arg2[%c0_12, %c0_13] : memref<128x256xf32, #tpu.memory_space<vmem>>, vector<128x256xf32>
    %cst_14 = arith.constant dense<0.000000e+00> : vector<64x256xf32>
    %77 = tpu.matmul %75, %76, %cst_14 {dimension_numbers = #tpu.dot_dimension_numbers<[1], [0], [0], [1], [0, 0, 1, 1], [], []>} : vector<64x128xf32>, vector<128x256xf32>, vector<64x256xf32> -> vector<64x256xf32>
    %c0_15 = arith.constant 0 : index
    %c0_16 = arith.constant 0 : index
    %78 = vector.load %arg4[%c0_15, %c0_16] : memref<1x256xf32, #tpu.memory_space<vmem>>, vector<1x256xf32>
    %79 = vector.shape_cast %78 : vector<1x256xf32> to vector<1x256xf32>
    %80 = vector.broadcast %79 : vector<1x256xf32> to vector<64x256xf32>
    %81 = arith.addf %77, %80 : vector<64x256xf32>
    %82 = vector.extract_strided_slice %81 {offsets = [0, 0], sizes = [8, 256], strides = [1, 1]} : vector<64x256xf32> to vector<8x256xf32>
    %83 = vector.extract_strided_slice %81 {offsets = [56, 0], sizes = [8, 256], strides = [1, 1]} : vector<64x256xf32> to vector<8x256xf32>
    %84 = arith.select %9, %82, %83 : vector<8x256xi1>, vector<8x256xf32>
    %c0_17 = arith.constant 0 : index
    %c0_18 = arith.constant 0 : index
    %85 = vector.load %arg21[%c0_17, %c0_18] : memref<64x256xf32, #tpu.memory_space<vmem>>, vector<8x256xf32>
    tpu.vector_store %arg21[%c0_17, %c0_18], %84 {strides = array<i32>} : memref<64x256xf32, #tpu.memory_space<vmem>>, vector<8x256xf32>,
    %86 = vector.extract_strided_slice %81 {offsets = [8, 0], sizes = [8, 256], strides = [1, 1]} : vector<64x256xf32> to vector<8x256xf32>
    %87 = vector.extract_strided_slice %81 {offsets = [48, 0], sizes = [8, 256], strides = [1, 1]} : vector<64x256xf32> to vector<8x256xf32>
    %88 = arith.select %9, %86, %87 : vector<8x256xi1>, vector<8x256xf32>
    %c8 = arith.constant 8 : index
    %c0_19 = arith.constant 0 : index
    %89 = vector.load %arg21[%c8, %c0_19] : memref<64x256xf32, #tpu.memory_space<vmem>>, vector<8x256xf32>
    tpu.vector_store %arg21[%c8, %c0_19], %88 {strides = array<i32>} : memref<64x256xf32, #tpu.memory_space<vmem>>, vector<8x256xf32>,
    %90 = vector.extract_strided_slice %81 {offsets = [16, 0], sizes = [8, 256], strides = [1, 1]} : vector<64x256xf32> to vector<8x256xf32>
    %91 = vector.extract_strided_slice %81 {offsets = [40, 0], sizes = [8, 256], strides = [1, 1]} : vector<64x256xf32> to vector<8x256xf32>
    %92 = arith.select %9, %90, %91 : vector<8x256xi1>, vector<8x256xf32>
    %c16 = arith.constant 16 : index
    %c0_20 = arith.constant 0 : index
    %93 = vector.load %arg21[%c16, %c0_20] : memref<64x256xf32, #tpu.memory_space<vmem>>, vector<8x256xf32>
    tpu.vector_store %arg21[%c16, %c0_20], %92 {strides = array<i32>} : memref<64x256xf32, #tpu.memory_space<vmem>>, vector<8x256xf32>,
    %94 = vector.extract_strided_slice %81 {offsets = [24, 0], sizes = [8, 256], strides = [1, 1]} : vector<64x256xf32> to vector<8x256xf32>
    %95 = vector.extract_strided_slice %81 {offsets = [32, 0], sizes = [8, 256], strides = [1, 1]} : vector<64x256xf32> to vector<8x256xf32>
    %96 = arith.select %9, %94, %95 : vector<8x256xi1>, vector<8x256xf32>
    %c24 = arith.constant 24 : index
    %c0_21 = arith.constant 0 : index
    %97 = vector.load %arg21[%c24, %c0_21] : memref<64x256xf32, #tpu.memory_space<vmem>>, vector<8x256xf32>
    tpu.vector_store %arg21[%c24, %c0_21], %96 {strides = array<i32>} : memref<64x256xf32, #tpu.memory_space<vmem>>, vector<8x256xf32>,
    %98 = vector.extract_strided_slice %81 {offsets = [32, 0], sizes = [8, 256], strides = [1, 1]} : vector<64x256xf32> to vector<8x256xf32>
    %99 = vector.extract_strided_slice %81 {offsets = [24, 0], sizes = [8, 256], strides = [1, 1]} : vector<64x256xf32> to vector<8x256xf32>
    %100 = arith.select %9, %98, %99 : vector<8x256xi1>, vector<8x256xf32>
    %c32 = arith.constant 32 : index
    %c0_22 = arith.constant 0 : index
    %101 = vector.load %arg21[%c32, %c0_22] : memref<64x256xf32, #tpu.memory_space<vmem>>, vector<8x256xf32>
    tpu.vector_store %arg21[%c32, %c0_22], %100 {strides = array<i32>} : memref<64x256xf32, #tpu.memory_space<vmem>>, vector<8x256xf32>,
    %102 = vector.extract_strided_slice %81 {offsets = [40, 0], sizes = [8, 256], strides = [1, 1]} : vector<64x256xf32> to vector<8x256xf32>
    %103 = vector.extract_strided_slice %81 {offsets = [16, 0], sizes = [8, 256], strides = [1, 1]} : vector<64x256xf32> to vector<8x256xf32>
    %104 = arith.select %9, %102, %103 : vector<8x256xi1>, vector<8x256xf32>
    %c40 = arith.constant 40 : index
    %c0_23 = arith.constant 0 : index
    %105 = vector.load %arg21[%c40, %c0_23] : memref<64x256xf32, #tpu.memory_space<vmem>>, vector<8x256xf32>
    tpu.vector_store %arg21[%c40, %c0_23], %104 {strides = array<i32>} : memref<64x256xf32, #tpu.memory_space<vmem>>, vector<8x256xf32>,
    %106 = vector.extract_strided_slice %81 {offsets = [48, 0], sizes = [8, 256], strides = [1, 1]} : vector<64x256xf32> to vector<8x256xf32>
    %107 = vector.extract_strided_slice %81 {offsets = [8, 0], sizes = [8, 256], strides = [1, 1]} : vector<64x256xf32> to vector<8x256xf32>
    %108 = arith.select %9, %106, %107 : vector<8x256xi1>, vector<8x256xf32>
    %c48 = arith.constant 48 : index
    %c0_24 = arith.constant 0 : index
    %109 = vector.load %arg21[%c48, %c0_24] : memref<64x256xf32, #tpu.memory_space<vmem>>, vector<8x256xf32>
    tpu.vector_store %arg21[%c48, %c0_24], %108 {strides = array<i32>} : memref<64x256xf32, #tpu.memory_space<vmem>>, vector<8x256xf32>,
    %110 = vector.extract_strided_slice %81 {offsets = [56, 0], sizes = [8, 256], strides = [1, 1]} : vector<64x256xf32> to vector<8x256xf32>
    %111 = vector.extract_strided_slice %81 {offsets = [0, 0], sizes = [8, 256], strides = [1, 1]} : vector<64x256xf32> to vector<8x256xf32>
    %112 = arith.select %9, %110, %111 : vector<8x256xi1>, vector<8x256xf32>
    %c56 = arith.constant 56 : index
    %c0_25 = arith.constant 0 : index
    %113 = vector.load %arg21[%c56, %c0_25] : memref<64x256xf32, #tpu.memory_space<vmem>>, vector<8x256xf32>
    tpu.vector_store %arg21[%c56, %c0_25], %112 {strides = array<i32>} : memref<64x256xf32, #tpu.memory_space<vmem>>, vector<8x256xf32>,
    %c0_26 = arith.constant 0 : index
    %c0_27 = arith.constant 0 : index
    %114 = vector.load %arg3[%c0_26, %c0_27] : memref<64x256xf32, #tpu.memory_space<vmem>>, vector<64x256xf32>
    %cst_28 = arith.constant 0.000000e+00 : f32
    %115 = vector.broadcast %cst_28 : f32 to vector<8x64xf32>
    %cst_29 = arith.constant 0.000000e+00 : f32
    %116 = vector.broadcast %cst_29 : f32 to vector<8x64xf32>
    %c0_30 = arith.constant 0 : index
    %c0_31 = arith.constant 0 : index
    %117 = vector.load %arg21[%c0_30, %c0_31] : memref<64x256xf32, #tpu.memory_space<vmem>>, vector<8x256xf32>
    %cst_32 = arith.constant dense<0.000000e+00> : vector<8x256xf32>
    %118 = tpu.matmul %115, %114, %cst_32 {dimension_numbers = #tpu.dot_dimension_numbers<[1], [0], [0], [1], [0, 0, 1, 1], [], []>} : vector<8x64xf32>, vector<64x256xf32>, vector<8x256xf32> -> vector<8x256xf32>
    %119 = arith.addf %117, %118 : vector<8x256xf32>
    %120 = arith.mulf %119, %21 : vector<8x256xf32>
    %121 = math.tanh %120 : vector<8x256xf32>
    %122 = arith.mulf %121, %21 : vector<8x256xf32>
    %123 = arith.addf %122, %24 : vector<8x256xf32>
    %124 = vector.extract_strided_slice %123 {offsets = [0, 0], sizes = [8, 64], strides = [1, 1]} : vector<8x256xf32> to vector<8x64xf32>
    %125 = vector.extract_strided_slice %123 {offsets = [0, 64], sizes = [8, 64], strides = [1, 1]} : vector<8x256xf32> to vector<8x64xf32>
    %126 = vector.extract_strided_slice %123 {offsets = [0, 128], sizes = [8, 64], strides = [1, 1]} : vector<8x256xf32> to vector<8x64xf32>
    %127 = vector.extract_strided_slice %123 {offsets = [0, 192], sizes = [8, 64], strides = [1, 1]} : vector<8x256xf32> to vector<8x64xf32>
    %128 = arith.mulf %125, %116 : vector<8x64xf32>
    %129 = arith.mulf %124, %126 : vector<8x64xf32>
    %130 = arith.addf %128, %129 : vector<8x64xf32>
    %131 = math.tanh %130 : vector<8x64xf32>
    %132 = arith.mulf %127, %131 : vector<8x64xf32>
    %c0_33 = arith.constant 0 : index
    %c0_34 = arith.constant 0 : index
    %133 = vector.load %arg23[%c0_33, %c0_34] : memref<64x64xf32, #tpu.memory_space<vmem>>, vector<8x64xf32>
    tpu.vector_store %arg23[%c0_33, %c0_34], %132 {strides = array<i32>} : memref<64x64xf32, #tpu.memory_space<vmem>>, vector<8x64xf32>,
    %c8_35 = arith.constant 8 : index
    %c0_36 = arith.constant 0 : index
    %134 = vector.load %arg21[%c8_35, %c0_36] : memref<64x256xf32, #tpu.memory_space<vmem>>, vector<8x256xf32>
    %cst_37 = arith.constant dense<0.000000e+00> : vector<8x256xf32>
    %135 = tpu.matmul %132, %114, %cst_37 {dimension_numbers = #tpu.dot_dimension_numbers<[1], [0], [0], [1], [0, 0, 1, 1], [], []>} : vector<8x64xf32>, vector<64x256xf32>, vector<8x256xf32> -> vector<8x256xf32>
    %136 = arith.addf %134, %135 : vector<8x256xf32>
    %137 = arith.mulf %136, %21 : vector<8x256xf32>
    %138 = math.tanh %137 : vector<8x256xf32>
    %139 = arith.mulf %138, %21 : vector<8x256xf32>
    %140 = arith.addf %139, %24 : vector<8x256xf32>
    %141 = vector.extract_strided_slice %140 {offsets = [0, 0], sizes = [8, 64], strides = [1, 1]} : vector<8x256xf32> to vector<8x64xf32>
    %142 = vector.extract_strided_slice %140 {offsets = [0, 64], sizes = [8, 64], strides = [1, 1]} : vector<8x256xf32> to vector<8x64xf32>
    %143 = vector.extract_strided_slice %140 {offsets = [0, 128], sizes = [8, 64], strides = [1, 1]} : vector<8x256xf32> to vector<8x64xf32>
    %144 = vector.extract_strided_slice %140 {offsets = [0, 192], sizes = [8, 64], strides = [1, 1]} : vector<8x256xf32> to vector<8x64xf32>
    %145 = arith.mulf %142, %130 : vector<8x64xf32>
    %146 = arith.mulf %141, %143 : vector<8x64xf32>
    %147 = arith.addf %145, %146 : vector<8x64xf32>
    %148 = math.tanh %147 : vector<8x64xf32>
    %149 = arith.mulf %144, %148 : vector<8x64xf32>
    %c8_38 = arith.constant 8 : index
    %c0_39 = arith.constant 0 : index
    %150 = vector.load %arg23[%c8_38, %c0_39] : memref<64x64xf32, #tpu.memory_space<vmem>>, vector<8x64xf32>
    tpu.vector_store %arg23[%c8_38, %c0_39], %149 {strides = array<i32>} : memref<64x64xf32, #tpu.memory_space<vmem>>, vector<8x64xf32>,
    %c16_40 = arith.constant 16 : index
    %c0_41 = arith.constant 0 : index
    %151 = vector.load %arg21[%c16_40, %c0_41] : memref<64x256xf32, #tpu.memory_space<vmem>>, vector<8x256xf32>
    %cst_42 = arith.constant dense<0.000000e+00> : vector<8x256xf32>
    %152 = tpu.matmul %149, %114, %cst_42 {dimension_numbers = #tpu.dot_dimension_numbers<[1], [0], [0], [1], [0, 0, 1, 1], [], []>} : vector<8x64xf32>, vector<64x256xf32>, vector<8x256xf32> -> vector<8x256xf32>
    %153 = arith.addf %151, %152 : vector<8x256xf32>
    %154 = arith.mulf %153, %21 : vector<8x256xf32>
    %155 = math.tanh %154 : vector<8x256xf32>
    %156 = arith.mulf %155, %21 : vector<8x256xf32>
    %157 = arith.addf %156, %24 : vector<8x256xf32>
    %158 = vector.extract_strided_slice %157 {offsets = [0, 0], sizes = [8, 64], strides = [1, 1]} : vector<8x256xf32> to vector<8x64xf32>
    %159 = vector.extract_strided_slice %157 {offsets = [0, 64], sizes = [8, 64], strides = [1, 1]} : vector<8x256xf32> to vector<8x64xf32>
    %160 = vector.extract_strided_slice %157 {offsets = [0, 128], sizes = [8, 64], strides = [1, 1]} : vector<8x256xf32> to vector<8x64xf32>
    %161 = vector.extract_strided_slice %157 {offsets = [0, 192], sizes = [8, 64], strides = [1, 1]} : vector<8x256xf32> to vector<8x64xf32>
    %162 = arith.mulf %159, %147 : vector<8x64xf32>
    %163 = arith.mulf %158, %160 : vector<8x64xf32>
    %164 = arith.addf %162, %163 : vector<8x64xf32>
    %165 = math.tanh %164 : vector<8x64xf32>
    %166 = arith.mulf %161, %165 : vector<8x64xf32>
    %c16_43 = arith.constant 16 : index
    %c0_44 = arith.constant 0 : index
    %167 = vector.load %arg23[%c16_43, %c0_44] : memref<64x64xf32, #tpu.memory_space<vmem>>, vector<8x64xf32>
    tpu.vector_store %arg23[%c16_43, %c0_44], %166 {strides = array<i32>} : memref<64x64xf32, #tpu.memory_space<vmem>>, vector<8x64xf32>,
    %c24_45 = arith.constant 24 : index
    %c0_46 = arith.constant 0 : index
    %168 = vector.load %arg21[%c24_45, %c0_46] : memref<64x256xf32, #tpu.memory_space<vmem>>, vector<8x256xf32>
    %cst_47 = arith.constant dense<0.000000e+00> : vector<8x256xf32>
    %169 = tpu.matmul %166, %114, %cst_47 {dimension_numbers = #tpu.dot_dimension_numbers<[1], [0], [0], [1], [0, 0, 1, 1], [], []>} : vector<8x64xf32>, vector<64x256xf32>, vector<8x256xf32> -> vector<8x256xf32>
    %170 = arith.addf %168, %169 : vector<8x256xf32>
    %171 = arith.mulf %170, %21 : vector<8x256xf32>
    %172 = math.tanh %171 : vector<8x256xf32>
    %173 = arith.mulf %172, %21 : vector<8x256xf32>
    %174 = arith.addf %173, %24 : vector<8x256xf32>
    %175 = vector.extract_strided_slice %174 {offsets = [0, 0], sizes = [8, 64], strides = [1, 1]} : vector<8x256xf32> to vector<8x64xf32>
    %176 = vector.extract_strided_slice %174 {offsets = [0, 64], sizes = [8, 64], strides = [1, 1]} : vector<8x256xf32> to vector<8x64xf32>
    %177 = vector.extract_strided_slice %174 {offsets = [0, 128], sizes = [8, 64], strides = [1, 1]} : vector<8x256xf32> to vector<8x64xf32>
    %178 = vector.extract_strided_slice %174 {offsets = [0, 192], sizes = [8, 64], strides = [1, 1]} : vector<8x256xf32> to vector<8x64xf32>
    %179 = arith.mulf %176, %164 : vector<8x64xf32>
    %180 = arith.mulf %175, %177 : vector<8x64xf32>
    %181 = arith.addf %179, %180 : vector<8x64xf32>
    %182 = math.tanh %181 : vector<8x64xf32>
    %183 = arith.mulf %178, %182 : vector<8x64xf32>
    %c24_48 = arith.constant 24 : index
    %c0_49 = arith.constant 0 : index
    %184 = vector.load %arg23[%c24_48, %c0_49] : memref<64x64xf32, #tpu.memory_space<vmem>>, vector<8x64xf32>
    tpu.vector_store %arg23[%c24_48, %c0_49], %183 {strides = array<i32>} : memref<64x64xf32, #tpu.memory_space<vmem>>, vector<8x64xf32>,
    %c32_50 = arith.constant 32 : index
    %c0_51 = arith.constant 0 : index
    %185 = vector.load %arg21[%c32_50, %c0_51] : memref<64x256xf32, #tpu.memory_space<vmem>>, vector<8x256xf32>
    %cst_52 = arith.constant dense<0.000000e+00> : vector<8x256xf32>
    %186 = tpu.matmul %183, %114, %cst_52 {dimension_numbers = #tpu.dot_dimension_numbers<[1], [0], [0], [1], [0, 0, 1, 1], [], []>} : vector<8x64xf32>, vector<64x256xf32>, vector<8x256xf32> -> vector<8x256xf32>
    %187 = arith.addf %185, %186 : vector<8x256xf32>
    %188 = arith.mulf %187, %21 : vector<8x256xf32>
    %189 = math.tanh %188 : vector<8x256xf32>
    %190 = arith.mulf %189, %21 : vector<8x256xf32>
    %191 = arith.addf %190, %24 : vector<8x256xf32>
    %192 = vector.extract_strided_slice %191 {offsets = [0, 0], sizes = [8, 64], strides = [1, 1]} : vector<8x256xf32> to vector<8x64xf32>
    %193 = vector.extract_strided_slice %191 {offsets = [0, 64], sizes = [8, 64], strides = [1, 1]} : vector<8x256xf32> to vector<8x64xf32>
    %194 = vector.extract_strided_slice %191 {offsets = [0, 128], sizes = [8, 64], strides = [1, 1]} : vector<8x256xf32> to vector<8x64xf32>
    %195 = vector.extract_strided_slice %191 {offsets = [0, 192], sizes = [8, 64], strides = [1, 1]} : vector<8x256xf32> to vector<8x64xf32>
    %196 = arith.mulf %193, %181 : vector<8x64xf32>
    %197 = arith.mulf %192, %194 : vector<8x64xf32>
    %198 = arith.addf %196, %197 : vector<8x64xf32>
    %199 = math.tanh %198 : vector<8x64xf32>
    %200 = arith.mulf %195, %199 : vector<8x64xf32>
    %c32_53 = arith.constant 32 : index
    %c0_54 = arith.constant 0 : index
    %201 = vector.load %arg23[%c32_53, %c0_54] : memref<64x64xf32, #tpu.memory_space<vmem>>, vector<8x64xf32>
    tpu.vector_store %arg23[%c32_53, %c0_54], %200 {strides = array<i32>} : memref<64x64xf32, #tpu.memory_space<vmem>>, vector<8x64xf32>,
    %c40_55 = arith.constant 40 : index
    %c0_56 = arith.constant 0 : index
    %202 = vector.load %arg21[%c40_55, %c0_56] : memref<64x256xf32, #tpu.memory_space<vmem>>, vector<8x256xf32>
    %cst_57 = arith.constant dense<0.000000e+00> : vector<8x256xf32>
    %203 = tpu.matmul %200, %114, %cst_57 {dimension_numbers = #tpu.dot_dimension_numbers<[1], [0], [0], [1], [0, 0, 1, 1], [], []>} : vector<8x64xf32>, vector<64x256xf32>, vector<8x256xf32> -> vector<8x256xf32>
    %204 = arith.addf %202, %203 : vector<8x256xf32>
    %205 = arith.mulf %204, %21 : vector<8x256xf32>
    %206 = math.tanh %205 : vector<8x256xf32>
    %207 = arith.mulf %206, %21 : vector<8x256xf32>
    %208 = arith.addf %207, %24 : vector<8x256xf32>
    %209 = vector.extract_strided_slice %208 {offsets = [0, 0], sizes = [8, 64], strides = [1, 1]} : vector<8x256xf32> to vector<8x64xf32>
    %210 = vector.extract_strided_slice %208 {offsets = [0, 64], sizes = [8, 64], strides = [1, 1]} : vector<8x256xf32> to vector<8x64xf32>
    %211 = vector.extract_strided_slice %208 {offsets = [0, 128], sizes = [8, 64], strides = [1, 1]} : vector<8x256xf32> to vector<8x64xf32>
    %212 = vector.extract_strided_slice %208 {offsets = [0, 192], sizes = [8, 64], strides = [1, 1]} : vector<8x256xf32> to vector<8x64xf32>
    %213 = arith.mulf %210, %198 : vector<8x64xf32>
    %214 = arith.mulf %209, %211 : vector<8x64xf32>
    %215 = arith.addf %213, %214 : vector<8x64xf32>
    %216 = math.tanh %215 : vector<8x64xf32>
    %217 = arith.mulf %212, %216 : vector<8x64xf32>
    %c40_58 = arith.constant 40 : index
    %c0_59 = arith.constant 0 : index
    %218 = vector.load %arg23[%c40_58, %c0_59] : memref<64x64xf32, #tpu.memory_space<vmem>>, vector<8x64xf32>
    tpu.vector_store %arg23[%c40_58, %c0_59], %217 {strides = array<i32>} : memref<64x64xf32, #tpu.memory_space<vmem>>, vector<8x64xf32>,
    %c48_60 = arith.constant 48 : index
    %c0_61 = arith.constant 0 : index
    %219 = vector.load %arg21[%c48_60, %c0_61] : memref<64x256xf32, #tpu.memory_space<vmem>>, vector<8x256xf32>
    %cst_62 = arith.constant dense<0.000000e+00> : vector<8x256xf32>
    %220 = tpu.matmul %217, %114, %cst_62 {dimension_numbers = #tpu.dot_dimension_numbers<[1], [0], [0], [1], [0, 0, 1, 1], [], []>} : vector<8x64xf32>, vector<64x256xf32>, vector<8x256xf32> -> vector<8x256xf32>
    %221 = arith.addf %219, %220 : vector<8x256xf32>
    %222 = arith.mulf %221, %21 : vector<8x256xf32>
    %223 = math.tanh %222 : vector<8x256xf32>
    %224 = arith.mulf %223, %21 : vector<8x256xf32>
    %225 = arith.addf %224, %24 : vector<8x256xf32>
    %226 = vector.extract_strided_slice %225 {offsets = [0, 0], sizes = [8, 64], strides = [1, 1]} : vector<8x256xf32> to vector<8x64xf32>
    %227 = vector.extract_strided_slice %225 {offsets = [0, 64], sizes = [8, 64], strides = [1, 1]} : vector<8x256xf32> to vector<8x64xf32>
    %228 = vector.extract_strided_slice %225 {offsets = [0, 128], sizes = [8, 64], strides = [1, 1]} : vector<8x256xf32> to vector<8x64xf32>
    %229 = vector.extract_strided_slice %225 {offsets = [0, 192], sizes = [8, 64], strides = [1, 1]} : vector<8x256xf32> to vector<8x64xf32>
    %230 = arith.mulf %227, %215 : vector<8x64xf32>
    %231 = arith.mulf %226, %228 : vector<8x64xf32>
    %232 = arith.addf %230, %231 : vector<8x64xf32>
    %233 = math.tanh %232 : vector<8x64xf32>
    %234 = arith.mulf %229, %233 : vector<8x64xf32>
    %c48_63 = arith.constant 48 : index
    %c0_64 = arith.constant 0 : index
    %235 = vector.load %arg23[%c48_63, %c0_64] : memref<64x64xf32, #tpu.memory_space<vmem>>, vector<8x64xf32>
    tpu.vector_store %arg23[%c48_63, %c0_64], %234 {strides = array<i32>} : memref<64x64xf32, #tpu.memory_space<vmem>>, vector<8x64xf32>,
    %c56_65 = arith.constant 56 : index
    %c0_66 = arith.constant 0 : index
    %236 = vector.load %arg21[%c56_65, %c0_66] : memref<64x256xf32, #tpu.memory_space<vmem>>, vector<8x256xf32>
    %cst_67 = arith.constant dense<0.000000e+00> : vector<8x256xf32>
    %237 = tpu.matmul %234, %114, %cst_67 {dimension_numbers = #tpu.dot_dimension_numbers<[1], [0], [0], [1], [0, 0, 1, 1], [], []>} : vector<8x64xf32>, vector<64x256xf32>, vector<8x256xf32> -> vector<8x256xf32>
    %238 = arith.addf %236, %237 : vector<8x256xf32>
    %239 = arith.mulf %238, %21 : vector<8x256xf32>
    %240 = math.tanh %239 : vector<8x256xf32>
    %241 = arith.mulf %240, %21 : vector<8x256xf32>
    %242 = arith.addf %241, %24 : vector<8x256xf32>
    %243 = vector.extract_strided_slice %242 {offsets = [0, 0], sizes = [8, 64], strides = [1, 1]} : vector<8x256xf32> to vector<8x64xf32>
    %244 = vector.extract_strided_slice %242 {offsets = [0, 64], sizes = [8, 64], strides = [1, 1]} : vector<8x256xf32> to vector<8x64xf32>
    %245 = vector.extract_strided_slice %242 {offsets = [0, 128], sizes = [8, 64], strides = [1, 1]} : vector<8x256xf32> to vector<8x64xf32>
    %246 = vector.extract_strided_slice %242 {offsets = [0, 192], sizes = [8, 64], strides = [1, 1]} : vector<8x256xf32> to vector<8x64xf32>
    %247 = arith.mulf %244, %232 : vector<8x64xf32>
    %248 = arith.mulf %243, %245 : vector<8x64xf32>
    %249 = arith.addf %247, %248 : vector<8x64xf32>
    %250 = math.tanh %249 : vector<8x64xf32>
    %251 = arith.mulf %246, %250 : vector<8x64xf32>
    %c56_68 = arith.constant 56 : index
    %c0_69 = arith.constant 0 : index
    %252 = vector.load %arg23[%c56_68, %c0_69] : memref<64x64xf32, #tpu.memory_space<vmem>>, vector<8x64xf32>
    tpu.vector_store %arg23[%c56_68, %c0_69], %251 {strides = array<i32>} : memref<64x64xf32, #tpu.memory_space<vmem>>, vector<8x64xf32>,
    %c0_70 = arith.constant 0 : index
    %c0_71 = arith.constant 0 : index
    %253 = vector.load %arg23[%c0_70, %c0_71] : memref<64x64xf32, #tpu.memory_space<vmem>>, vector<64x64xf32>
    %254 = vector.extract_strided_slice %253 {offsets = [0, 0], sizes = [8, 64], strides = [1, 1]} : vector<64x64xf32> to vector<8x64xf32>
    %255 = vector.extract_strided_slice %253 {offsets = [56, 0], sizes = [8, 64], strides = [1, 1]} : vector<64x64xf32> to vector<8x64xf32>
    %256 = arith.select %18, %254, %255 : vector<8x64xi1>, vector<8x64xf32>
    %257 = vector.extract_strided_slice %253 {offsets = [8, 0], sizes = [8, 64], strides = [1, 1]} : vector<64x64xf32> to vector<8x64xf32>
    %258 = vector.extract_strided_slice %253 {offsets = [48, 0], sizes = [8, 64], strides = [1, 1]} : vector<64x64xf32> to vector<8x64xf32>
    %259 = arith.select %18, %257, %258 : vector<8x64xi1>, vector<8x64xf32>
    %260 = vector.extract_strided_slice %253 {offsets = [16, 0], sizes = [8, 64], strides = [1, 1]} : vector<64x64xf32> to vector<8x64xf32>
    %261 = vector.extract_strided_slice %253 {offsets = [40, 0], sizes = [8, 64], strides = [1, 1]} : vector<64x64xf32> to vector<8x64xf32>
    %262 = arith.select %18, %260, %261 : vector<8x64xi1>, vector<8x64xf32>
    %263 = vector.extract_strided_slice %253 {offsets = [24, 0], sizes = [8, 64], strides = [1, 1]} : vector<64x64xf32> to vector<8x64xf32>
    %264 = vector.extract_strided_slice %253 {offsets = [32, 0], sizes = [8, 64], strides = [1, 1]} : vector<64x64xf32> to vector<8x64xf32>
    %265 = arith.select %18, %263, %264 : vector<8x64xi1>, vector<8x64xf32>
    %266 = vector.extract_strided_slice %253 {offsets = [32, 0], sizes = [8, 64], strides = [1, 1]} : vector<64x64xf32> to vector<8x64xf32>
    %267 = vector.extract_strided_slice %253 {offsets = [24, 0], sizes = [8, 64], strides = [1, 1]} : vector<64x64xf32> to vector<8x64xf32>
    %268 = arith.select %18, %266, %267 : vector<8x64xi1>, vector<8x64xf32>
    %269 = vector.extract_strided_slice %253 {offsets = [40, 0], sizes = [8, 64], strides = [1, 1]} : vector<64x64xf32> to vector<8x64xf32>
    %270 = vector.extract_strided_slice %253 {offsets = [16, 0], sizes = [8, 64], strides = [1, 1]} : vector<64x64xf32> to vector<8x64xf32>
    %271 = arith.select %18, %269, %270 : vector<8x64xi1>, vector<8x64xf32>
    %272 = vector.extract_strided_slice %253 {offsets = [48, 0], sizes = [8, 64], strides = [1, 1]} : vector<64x64xf32> to vector<8x64xf32>
    %273 = vector.extract_strided_slice %253 {offsets = [8, 0], sizes = [8, 64], strides = [1, 1]} : vector<64x64xf32> to vector<8x64xf32>
    %274 = arith.select %18, %272, %273 : vector<8x64xi1>, vector<8x64xf32>
    %275 = vector.extract_strided_slice %253 {offsets = [56, 0], sizes = [8, 64], strides = [1, 1]} : vector<64x64xf32> to vector<8x64xf32>
    %276 = vector.extract_strided_slice %253 {offsets = [0, 0], sizes = [8, 64], strides = [1, 1]} : vector<64x64xf32> to vector<8x64xf32>
    %277 = arith.select %18, %275, %276 : vector<8x64xi1>, vector<8x64xf32>
    %278 = tpu.concatenate %256, %259, %262, %265, %268, %271, %274, %277 in 0 : vector<8x64xf32>, vector<8x64xf32>, vector<8x64xf32>, vector<8x64xf32>, vector<8x64xf32>, vector<8x64xf32>, vector<8x64xf32>, vector<8x64xf32> -> vector<64x64xf32>
    %c0_72 = arith.constant 0 : index
    %c0_73 = arith.constant 0 : index
    %279 = vector.load %arg5[%c0_72, %c0_73] : memref<64x256xf32, #tpu.memory_space<vmem>>, vector<64x256xf32>
    %cst_74 = arith.constant dense<0.000000e+00> : vector<64x256xf32>
    %280 = tpu.matmul %278, %279, %cst_74 {dimension_numbers = #tpu.dot_dimension_numbers<[1], [0], [0], [1], [0, 0, 1, 1], [], []>} : vector<64x64xf32>, vector<64x256xf32>, vector<64x256xf32> -> vector<64x256xf32>
    %c0_75 = arith.constant 0 : index
    %c0_76 = arith.constant 0 : index
    %281 = vector.load %arg7[%c0_75, %c0_76] : memref<1x256xf32, #tpu.memory_space<vmem>>, vector<1x256xf32>
    %282 = vector.shape_cast %281 : vector<1x256xf32> to vector<1x256xf32>
    %283 = vector.broadcast %282 : vector<1x256xf32> to vector<64x256xf32>
    %284 = arith.addf %280, %283 : vector<64x256xf32>
    %285 = vector.extract_strided_slice %284 {offsets = [0, 0], sizes = [8, 256], strides = [1, 1]} : vector<64x256xf32> to vector<8x256xf32>
    %286 = vector.extract_strided_slice %284 {offsets = [56, 0], sizes = [8, 256], strides = [1, 1]} : vector<64x256xf32> to vector<8x256xf32>
    %287 = arith.select %9, %285, %286 : vector<8x256xi1>, vector<8x256xf32>
    %c0_77 = arith.constant 0 : index
    %c0_78 = arith.constant 0 : index
    %288 = vector.load %arg21[%c0_77, %c0_78] : memref<64x256xf32, #tpu.memory_space<vmem>>, vector<8x256xf32>
    tpu.vector_store %arg21[%c0_77, %c0_78], %287 {strides = array<i32>} : memref<64x256xf32, #tpu.memory_space<vmem>>, vector<8x256xf32>,
    %289 = vector.extract_strided_slice %284 {offsets = [8, 0], sizes = [8, 256], strides = [1, 1]} : vector<64x256xf32> to vector<8x256xf32>
    %290 = vector.extract_strided_slice %284 {offsets = [48, 0], sizes = [8, 256], strides = [1, 1]} : vector<64x256xf32> to vector<8x256xf32>
    %291 = arith.select %9, %289, %290 : vector<8x256xi1>, vector<8x256xf32>
    %c8_79 = arith.constant 8 : index
    %c0_80 = arith.constant 0 : index
    %292 = vector.load %arg21[%c8_79, %c0_80] : memref<64x256xf32, #tpu.memory_space<vmem>>, vector<8x256xf32>
    tpu.vector_store %arg21[%c8_79, %c0_80], %291 {strides = array<i32>} : memref<64x256xf32, #tpu.memory_space<vmem>>, vector<8x256xf32>,
    %293 = vector.extract_strided_slice %284 {offsets = [16, 0], sizes = [8, 256], strides = [1, 1]} : vector<64x256xf32> to vector<8x256xf32>
    %294 = vector.extract_strided_slice %284 {offsets = [40, 0], sizes = [8, 256], strides = [1, 1]} : vector<64x256xf32> to vector<8x256xf32>
    %295 = arith.select %9, %293, %294 : vector<8x256xi1>, vector<8x256xf32>
    %c16_81 = arith.constant 16 : index
    %c0_82 = arith.constant 0 : index
    %296 = vector.load %arg21[%c16_81, %c0_82] : memref<64x256xf32, #tpu.memory_space<vmem>>, vector<8x256xf32>
    tpu.vector_store %arg21[%c16_81, %c0_82], %295 {strides = array<i32>} : memref<64x256xf32, #tpu.memory_space<vmem>>, vector<8x256xf32>,
    %297 = vector.extract_strided_slice %284 {offsets = [24, 0], sizes = [8, 256], strides = [1, 1]} : vector<64x256xf32> to vector<8x256xf32>
    %298 = vector.extract_strided_slice %284 {offsets = [32, 0], sizes = [8, 256], strides = [1, 1]} : vector<64x256xf32> to vector<8x256xf32>
    %299 = arith.select %9, %297, %298 : vector<8x256xi1>, vector<8x256xf32>
    %c24_83 = arith.constant 24 : index
    %c0_84 = arith.constant 0 : index
    %300 = vector.load %arg21[%c24_83, %c0_84] : memref<64x256xf32, #tpu.memory_space<vmem>>, vector<8x256xf32>
    tpu.vector_store %arg21[%c24_83, %c0_84], %299 {strides = array<i32>} : memref<64x256xf32, #tpu.memory_space<vmem>>, vector<8x256xf32>,
    %301 = vector.extract_strided_slice %284 {offsets = [32, 0], sizes = [8, 256], strides = [1, 1]} : vector<64x256xf32> to vector<8x256xf32>
    %302 = vector.extract_strided_slice %284 {offsets = [24, 0], sizes = [8, 256], strides = [1, 1]} : vector<64x256xf32> to vector<8x256xf32>
    %303 = arith.select %9, %301, %302 : vector<8x256xi1>, vector<8x256xf32>
    %c32_85 = arith.constant 32 : index
    %c0_86 = arith.constant 0 : index
    %304 = vector.load %arg21[%c32_85, %c0_86] : memref<64x256xf32, #tpu.memory_space<vmem>>, vector<8x256xf32>
    tpu.vector_store %arg21[%c32_85, %c0_86], %303 {strides = array<i32>} : memref<64x256xf32, #tpu.memory_space<vmem>>, vector<8x256xf32>,
    %305 = vector.extract_strided_slice %284 {offsets = [40, 0], sizes = [8, 256], strides = [1, 1]} : vector<64x256xf32> to vector<8x256xf32>
    %306 = vector.extract_strided_slice %284 {offsets = [16, 0], sizes = [8, 256], strides = [1, 1]} : vector<64x256xf32> to vector<8x256xf32>
    %307 = arith.select %9, %305, %306 : vector<8x256xi1>, vector<8x256xf32>
    %c40_87 = arith.constant 40 : index
    %c0_88 = arith.constant 0 : index
    %308 = vector.load %arg21[%c40_87, %c0_88] : memref<64x256xf32, #tpu.memory_space<vmem>>, vector<8x256xf32>
    tpu.vector_store %arg21[%c40_87, %c0_88], %307 {strides = array<i32>} : memref<64x256xf32, #tpu.memory_space<vmem>>, vector<8x256xf32>,
    %309 = vector.extract_strided_slice %284 {offsets = [48, 0], sizes = [8, 256], strides = [1, 1]} : vector<64x256xf32> to vector<8x256xf32>
    %310 = vector.extract_strided_slice %284 {offsets = [8, 0], sizes = [8, 256], strides = [1, 1]} : vector<64x256xf32> to vector<8x256xf32>
    %311 = arith.select %9, %309, %310 : vector<8x256xi1>, vector<8x256xf32>
    %c48_89 = arith.constant 48 : index
    %c0_90 = arith.constant 0 : index
    %312 = vector.load %arg21[%c48_89, %c0_90] : memref<64x256xf32, #tpu.memory_space<vmem>>, vector<8x256xf32>
    tpu.vector_store %arg21[%c48_89, %c0_90], %311 {strides = array<i32>} : memref<64x256xf32, #tpu.memory_space<vmem>>, vector<8x256xf32>,
    %313 = vector.extract_strided_slice %284 {offsets = [56, 0], sizes = [8, 256], strides = [1, 1]} : vector<64x256xf32> to vector<8x256xf32>
    %314 = vector.extract_strided_slice %284 {offsets = [0, 0], sizes = [8, 256], strides = [1, 1]} : vector<64x256xf32> to vector<8x256xf32>
    %315 = arith.select %9, %313, %314 : vector<8x256xi1>, vector<8x256xf32>
    %c56_91 = arith.constant 56 : index
    %c0_92 = arith.constant 0 : index
    %316 = vector.load %arg21[%c56_91, %c0_92] : memref<64x256xf32, #tpu.memory_space<vmem>>, vector<8x256xf32>
    tpu.vector_store %arg21[%c56_91, %c0_92], %315 {strides = array<i32>} : memref<64x256xf32, #tpu.memory_space<vmem>>, vector<8x256xf32>,
    %c0_93 = arith.constant 0 : index
    %c0_94 = arith.constant 0 : index
    %317 = vector.load %arg6[%c0_93, %c0_94] : memref<64x256xf32, #tpu.memory_space<vmem>>, vector<64x256xf32>
    %cst_95 = arith.constant 0.000000e+00 : f32
    %318 = vector.broadcast %cst_95 : f32 to vector<8x64xf32>
    %cst_96 = arith.constant 0.000000e+00 : f32
    %319 = vector.broadcast %cst_96 : f32 to vector<8x64xf32>
    %c0_97 = arith.constant 0 : index
    %c0_98 = arith.constant 0 : index
    %320 = vector.load %arg21[%c0_97, %c0_98] : memref<64x256xf32, #tpu.memory_space<vmem>>, vector<8x256xf32>
    %cst_99 = arith.constant dense<0.000000e+00> : vector<8x256xf32>
    %321 = tpu.matmul %318, %317, %cst_99 {dimension_numbers = #tpu.dot_dimension_numbers<[1], [0], [0], [1], [0, 0, 1, 1], [], []>} : vector<8x64xf32>, vector<64x256xf32>, vector<8x256xf32> -> vector<8x256xf32>
    %322 = arith.addf %320, %321 : vector<8x256xf32>
    %323 = arith.mulf %322, %21 : vector<8x256xf32>
    %324 = math.tanh %323 : vector<8x256xf32>
    %325 = arith.mulf %324, %21 : vector<8x256xf32>
    %326 = arith.addf %325, %24 : vector<8x256xf32>
    %327 = vector.extract_strided_slice %326 {offsets = [0, 0], sizes = [8, 64], strides = [1, 1]} : vector<8x256xf32> to vector<8x64xf32>
    %328 = vector.extract_strided_slice %326 {offsets = [0, 64], sizes = [8, 64], strides = [1, 1]} : vector<8x256xf32> to vector<8x64xf32>
    %329 = vector.extract_strided_slice %326 {offsets = [0, 128], sizes = [8, 64], strides = [1, 1]} : vector<8x256xf32> to vector<8x64xf32>
    %330 = vector.extract_strided_slice %326 {offsets = [0, 192], sizes = [8, 64], strides = [1, 1]} : vector<8x256xf32> to vector<8x64xf32>
    %331 = arith.mulf %328, %319 : vector<8x64xf32>
    %332 = arith.mulf %327, %329 : vector<8x64xf32>
    %333 = arith.addf %331, %332 : vector<8x64xf32>
    %334 = math.tanh %333 : vector<8x64xf32>
    %335 = arith.mulf %330, %334 : vector<8x64xf32>
    %c8_100 = arith.constant 8 : index
    %c0_101 = arith.constant 0 : index
    %336 = vector.load %arg21[%c8_100, %c0_101] : memref<64x256xf32, #tpu.memory_space<vmem>>, vector<8x256xf32>
    %cst_102 = arith.constant dense<0.000000e+00> : vector<8x256xf32>
    %337 = tpu.matmul %335, %317, %cst_102 {dimension_numbers = #tpu.dot_dimension_numbers<[1], [0], [0], [1], [0, 0, 1, 1], [], []>} : vector<8x64xf32>, vector<64x256xf32>, vector<8x256xf32> -> vector<8x256xf32>
    %338 = arith.addf %336, %337 : vector<8x256xf32>
    %339 = arith.mulf %338, %21 : vector<8x256xf32>
    %340 = math.tanh %339 : vector<8x256xf32>
    %341 = arith.mulf %340, %21 : vector<8x256xf32>
    %342 = arith.addf %341, %24 : vector<8x256xf32>
    %343 = vector.extract_strided_slice %342 {offsets = [0, 0], sizes = [8, 64], strides = [1, 1]} : vector<8x256xf32> to vector<8x64xf32>
    %344 = vector.extract_strided_slice %342 {offsets = [0, 64], sizes = [8, 64], strides = [1, 1]} : vector<8x256xf32> to vector<8x64xf32>
    %345 = vector.extract_strided_slice %342 {offsets = [0, 128], sizes = [8, 64], strides = [1, 1]} : vector<8x256xf32> to vector<8x64xf32>
    %346 = vector.extract_strided_slice %342 {offsets = [0, 192], sizes = [8, 64], strides = [1, 1]} : vector<8x256xf32> to vector<8x64xf32>
    %347 = arith.mulf %344, %333 : vector<8x64xf32>
    %348 = arith.mulf %343, %345 : vector<8x64xf32>
    %349 = arith.addf %347, %348 : vector<8x64xf32>
    %350 = math.tanh %349 : vector<8x64xf32>
    %351 = arith.mulf %346, %350 : vector<8x64xf32>
    %c16_103 = arith.constant 16 : index
    %c0_104 = arith.constant 0 : index
    %352 = vector.load %arg21[%c16_103, %c0_104] : memref<64x256xf32, #tpu.memory_space<vmem>>, vector<8x256xf32>
    %cst_105 = arith.constant dense<0.000000e+00> : vector<8x256xf32>
    %353 = tpu.matmul %351, %317, %cst_105 {dimension_numbers = #tpu.dot_dimension_numbers<[1], [0], [0], [1], [0, 0, 1, 1], [], []>} : vector<8x64xf32>, vector<64x256xf32>, vector<8x256xf32> -> vector<8x256xf32>
    %354 = arith.addf %352, %353 : vector<8x256xf32>
    %355 = arith.mulf %354, %21 : vector<8x256xf32>
    %356 = math.tanh %355 : vector<8x256xf32>
    %357 = arith.mulf %356, %21 : vector<8x256xf32>
    %358 = arith.addf %357, %24 : vector<8x256xf32>
    %359 = vector.extract_strided_slice %358 {offsets = [0, 0], sizes = [8, 64], strides = [1, 1]} : vector<8x256xf32> to vector<8x64xf32>
    %360 = vector.extract_strided_slice %358 {offsets = [0, 64], sizes = [8, 64], strides = [1, 1]} : vector<8x256xf32> to vector<8x64xf32>
    %361 = vector.extract_strided_slice %358 {offsets = [0, 128], sizes = [8, 64], strides = [1, 1]} : vector<8x256xf32> to vector<8x64xf32>
    %362 = vector.extract_strided_slice %358 {offsets = [0, 192], sizes = [8, 64], strides = [1, 1]} : vector<8x256xf32> to vector<8x64xf32>
    %363 = arith.mulf %360, %349 : vector<8x64xf32>
    %364 = arith.mulf %359, %361 : vector<8x64xf32>
    %365 = arith.addf %363, %364 : vector<8x64xf32>
    %366 = math.tanh %365 : vector<8x64xf32>
    %367 = arith.mulf %362, %366 : vector<8x64xf32>
    %c24_106 = arith.constant 24 : index
    %c0_107 = arith.constant 0 : index
    %368 = vector.load %arg21[%c24_106, %c0_107] : memref<64x256xf32, #tpu.memory_space<vmem>>, vector<8x256xf32>
    %cst_108 = arith.constant dense<0.000000e+00> : vector<8x256xf32>
    %369 = tpu.matmul %367, %317, %cst_108 {dimension_numbers = #tpu.dot_dimension_numbers<[1], [0], [0], [1], [0, 0, 1, 1], [], []>} : vector<8x64xf32>, vector<64x256xf32>, vector<8x256xf32> -> vector<8x256xf32>
    %370 = arith.addf %368, %369 : vector<8x256xf32>
    %371 = arith.mulf %370, %21 : vector<8x256xf32>
    %372 = math.tanh %371 : vector<8x256xf32>
    %373 = arith.mulf %372, %21 : vector<8x256xf32>
    %374 = arith.addf %373, %24 : vector<8x256xf32>
    %375 = vector.extract_strided_slice %374 {offsets = [0, 0], sizes = [8, 64], strides = [1, 1]} : vector<8x256xf32> to vector<8x64xf32>
    %376 = vector.extract_strided_slice %374 {offsets = [0, 64], sizes = [8, 64], strides = [1, 1]} : vector<8x256xf32> to vector<8x64xf32>
    %377 = vector.extract_strided_slice %374 {offsets = [0, 128], sizes = [8, 64], strides = [1, 1]} : vector<8x256xf32> to vector<8x64xf32>
    %378 = vector.extract_strided_slice %374 {offsets = [0, 192], sizes = [8, 64], strides = [1, 1]} : vector<8x256xf32> to vector<8x64xf32>
    %379 = arith.mulf %376, %365 : vector<8x64xf32>
    %380 = arith.mulf %375, %377 : vector<8x64xf32>
    %381 = arith.addf %379, %380 : vector<8x64xf32>
    %382 = math.tanh %381 : vector<8x64xf32>
    %383 = arith.mulf %378, %382 : vector<8x64xf32>
    %c32_109 = arith.constant 32 : index
    %c0_110 = arith.constant 0 : index
    %384 = vector.load %arg21[%c32_109, %c0_110] : memref<64x256xf32, #tpu.memory_space<vmem>>, vector<8x256xf32>
    %cst_111 = arith.constant dense<0.000000e+00> : vector<8x256xf32>
    %385 = tpu.matmul %383, %317, %cst_111 {dimension_numbers = #tpu.dot_dimension_numbers<[1], [0], [0], [1], [0, 0, 1, 1], [], []>} : vector<8x64xf32>, vector<64x256xf32>, vector<8x256xf32> -> vector<8x256xf32>
    %386 = arith.addf %384, %385 : vector<8x256xf32>
    %387 = arith.mulf %386, %21 : vector<8x256xf32>
    %388 = math.tanh %387 : vector<8x256xf32>
    %389 = arith.mulf %388, %21 : vector<8x256xf32>
    %390 = arith.addf %389, %24 : vector<8x256xf32>
    %391 = vector.extract_strided_slice %390 {offsets = [0, 0], sizes = [8, 64], strides = [1, 1]} : vector<8x256xf32> to vector<8x64xf32>
    %392 = vector.extract_strided_slice %390 {offsets = [0, 64], sizes = [8, 64], strides = [1, 1]} : vector<8x256xf32> to vector<8x64xf32>
    %393 = vector.extract_strided_slice %390 {offsets = [0, 128], sizes = [8, 64], strides = [1, 1]} : vector<8x256xf32> to vector<8x64xf32>
    %394 = vector.extract_strided_slice %390 {offsets = [0, 192], sizes = [8, 64], strides = [1, 1]} : vector<8x256xf32> to vector<8x64xf32>
    %395 = arith.mulf %392, %381 : vector<8x64xf32>
    %396 = arith.mulf %391, %393 : vector<8x64xf32>
    %397 = arith.addf %395, %396 : vector<8x64xf32>
    %398 = math.tanh %397 : vector<8x64xf32>
    %399 = arith.mulf %394, %398 : vector<8x64xf32>
    %c40_112 = arith.constant 40 : index
    %c0_113 = arith.constant 0 : index
    %400 = vector.load %arg21[%c40_112, %c0_113] : memref<64x256xf32, #tpu.memory_space<vmem>>, vector<8x256xf32>
    %cst_114 = arith.constant dense<0.000000e+00> : vector<8x256xf32>
    %401 = tpu.matmul %399, %317, %cst_114 {dimension_numbers = #tpu.dot_dimension_numbers<[1], [0], [0], [1], [0, 0, 1, 1], [], []>} : vector<8x64xf32>, vector<64x256xf32>, vector<8x256xf32> -> vector<8x256xf32>
    %402 = arith.addf %400, %401 : vector<8x256xf32>
    %403 = arith.mulf %402, %21 : vector<8x256xf32>
    %404 = math.tanh %403 : vector<8x256xf32>
    %405 = arith.mulf %404, %21 : vector<8x256xf32>
    %406 = arith.addf %405, %24 : vector<8x256xf32>
    %407 = vector.extract_strided_slice %406 {offsets = [0, 0], sizes = [8, 64], strides = [1, 1]} : vector<8x256xf32> to vector<8x64xf32>
    %408 = vector.extract_strided_slice %406 {offsets = [0, 64], sizes = [8, 64], strides = [1, 1]} : vector<8x256xf32> to vector<8x64xf32>
    %409 = vector.extract_strided_slice %406 {offsets = [0, 128], sizes = [8, 64], strides = [1, 1]} : vector<8x256xf32> to vector<8x64xf32>
    %410 = vector.extract_strided_slice %406 {offsets = [0, 192], sizes = [8, 64], strides = [1, 1]} : vector<8x256xf32> to vector<8x64xf32>
    %411 = arith.mulf %408, %397 : vector<8x64xf32>
    %412 = arith.mulf %407, %409 : vector<8x64xf32>
    %413 = arith.addf %411, %412 : vector<8x64xf32>
    %414 = math.tanh %413 : vector<8x64xf32>
    %415 = arith.mulf %410, %414 : vector<8x64xf32>
    %c48_115 = arith.constant 48 : index
    %c0_116 = arith.constant 0 : index
    %416 = vector.load %arg21[%c48_115, %c0_116] : memref<64x256xf32, #tpu.memory_space<vmem>>, vector<8x256xf32>
    %cst_117 = arith.constant dense<0.000000e+00> : vector<8x256xf32>
    %417 = tpu.matmul %415, %317, %cst_117 {dimension_numbers = #tpu.dot_dimension_numbers<[1], [0], [0], [1], [0, 0, 1, 1], [], []>} : vector<8x64xf32>, vector<64x256xf32>, vector<8x256xf32> -> vector<8x256xf32>
    %418 = arith.addf %416, %417 : vector<8x256xf32>
    %419 = arith.mulf %418, %21 : vector<8x256xf32>
    %420 = math.tanh %419 : vector<8x256xf32>
    %421 = arith.mulf %420, %21 : vector<8x256xf32>
    %422 = arith.addf %421, %24 : vector<8x256xf32>
    %423 = vector.extract_strided_slice %422 {offsets = [0, 0], sizes = [8, 64], strides = [1, 1]} : vector<8x256xf32> to vector<8x64xf32>
    %424 = vector.extract_strided_slice %422 {offsets = [0, 64], sizes = [8, 64], strides = [1, 1]} : vector<8x256xf32> to vector<8x64xf32>
    %425 = vector.extract_strided_slice %422 {offsets = [0, 128], sizes = [8, 64], strides = [1, 1]} : vector<8x256xf32> to vector<8x64xf32>
    %426 = vector.extract_strided_slice %422 {offsets = [0, 192], sizes = [8, 64], strides = [1, 1]} : vector<8x256xf32> to vector<8x64xf32>
    %427 = arith.mulf %424, %413 : vector<8x64xf32>
    %428 = arith.mulf %423, %425 : vector<8x64xf32>
    %429 = arith.addf %427, %428 : vector<8x64xf32>
    %430 = math.tanh %429 : vector<8x64xf32>
    %431 = arith.mulf %426, %430 : vector<8x64xf32>
    %c56_118 = arith.constant 56 : index
    %c0_119 = arith.constant 0 : index
    %432 = vector.load %arg21[%c56_118, %c0_119] : memref<64x256xf32, #tpu.memory_space<vmem>>, vector<8x256xf32>
    %cst_120 = arith.constant dense<0.000000e+00> : vector<8x256xf32>
    %433 = tpu.matmul %431, %317, %cst_120 {dimension_numbers = #tpu.dot_dimension_numbers<[1], [0], [0], [1], [0, 0, 1, 1], [], []>} : vector<8x64xf32>, vector<64x256xf32>, vector<8x256xf32> -> vector<8x256xf32>
    %434 = arith.addf %432, %433 : vector<8x256xf32>
    %435 = arith.mulf %434, %21 : vector<8x256xf32>
    %436 = math.tanh %435 : vector<8x256xf32>
    %437 = arith.mulf %436, %21 : vector<8x256xf32>
    %438 = arith.addf %437, %24 : vector<8x256xf32>
    %439 = vector.extract_strided_slice %438 {offsets = [0, 0], sizes = [8, 64], strides = [1, 1]} : vector<8x256xf32> to vector<8x64xf32>
    %440 = vector.extract_strided_slice %438 {offsets = [0, 64], sizes = [8, 64], strides = [1, 1]} : vector<8x256xf32> to vector<8x64xf32>
    %441 = vector.extract_strided_slice %438 {offsets = [0, 128], sizes = [8, 64], strides = [1, 1]} : vector<8x256xf32> to vector<8x64xf32>
    %442 = vector.extract_strided_slice %438 {offsets = [0, 192], sizes = [8, 64], strides = [1, 1]} : vector<8x256xf32> to vector<8x64xf32>
    %443 = arith.mulf %440, %429 : vector<8x64xf32>
    %444 = arith.mulf %439, %441 : vector<8x64xf32>
    %445 = arith.addf %443, %444 : vector<8x64xf32>
    %446 = math.tanh %445 : vector<8x64xf32>
    %447 = arith.mulf %442, %446 : vector<8x64xf32>
    %c0_121 = arith.constant 0 : index
    %c0_122 = arith.constant 0 : index
    %448 = vector.load %arg8[%c0_121, %c0_122] : memref<64x1024xf32, #tpu.memory_space<vmem>>, vector<64x1024xf32>
    %cst_123 = arith.constant dense<0.000000e+00> : vector<8x1024xf32>
    %449 = tpu.matmul %447, %448, %cst_123 {dimension_numbers = #tpu.dot_dimension_numbers<[1], [0], [0], [1], [0, 0, 1, 1], [], []>} : vector<8x64xf32>, vector<64x1024xf32>, vector<8x1024xf32> -> vector<8x1024xf32>
    %c0_124 = arith.constant 0 : index
    %c0_125 = arith.constant 0 : index
    %450 = vector.load %arg9[%c0_124, %c0_125] : memref<1x1024xf32, #tpu.memory_space<vmem>>, vector<1x1024xf32>
    %451 = vector.shape_cast %450 : vector<1x1024xf32> to vector<1x1024xf32>
    %452 = vector.broadcast %451 : vector<1x1024xf32> to vector<8x1024xf32>
    %453 = arith.addf %449, %452 : vector<8x1024xf32>
    %cst_126 = arith.constant 0.000000e+00 : f32
    %454 = vector.broadcast %cst_126 : f32 to vector<8x1024xf32>
    %455 = arith.maximumf %453, %454 : vector<8x1024xf32>
    %456 = vector.extract_strided_slice %455 {offsets = [0, 0], sizes = [8, 128], strides = [1, 1]} : vector<8x1024xf32> to vector<8x128xf32>
    %457 = vector.extract_strided_slice %455 {offsets = [0, 128], sizes = [8, 128], strides = [1, 1]} : vector<8x1024xf32> to vector<8x128xf32>
    %458 = vector.extract_strided_slice %455 {offsets = [0, 256], sizes = [8, 128], strides = [1, 1]} : vector<8x1024xf32> to vector<8x128xf32>
    %459 = vector.extract_strided_slice %455 {offsets = [0, 384], sizes = [8, 128], strides = [1, 1]} : vector<8x1024xf32> to vector<8x128xf32>
    %460 = vector.extract_strided_slice %455 {offsets = [0, 512], sizes = [8, 128], strides = [1, 1]} : vector<8x1024xf32> to vector<8x128xf32>
    %461 = vector.extract_strided_slice %455 {offsets = [0, 640], sizes = [8, 128], strides = [1, 1]} : vector<8x1024xf32> to vector<8x128xf32>
    %462 = vector.extract_strided_slice %455 {offsets = [0, 768], sizes = [8, 128], strides = [1, 1]} : vector<8x1024xf32> to vector<8x128xf32>
    %463 = vector.extract_strided_slice %455 {offsets = [0, 896], sizes = [8, 128], strides = [1, 1]} : vector<8x1024xf32> to vector<8x128xf32>
    %464 = tpu.concatenate %456, %457, %458, %459, %460, %461, %462, %463 in 0 : vector<8x128xf32>, vector<8x128xf32>, vector<8x128xf32>, vector<8x128xf32>, vector<8x128xf32>, vector<8x128xf32>, vector<8x128xf32>, vector<8x128xf32> -> vector<64x128xf32>
    %c0_127 = arith.constant 0 : index
    %c0_128 = arith.constant 0 : index
    %465 = vector.load %arg10[%c0_127, %c0_128] : memref<128x128xf32, #tpu.memory_space<vmem>>, vector<128x128xf32>
    %cst_129 = arith.constant dense<0.000000e+00> : vector<64x128xf32>
    %466 = tpu.matmul %464, %465, %cst_129 {dimension_numbers = #tpu.dot_dimension_numbers<[1], [0], [0], [1], [0, 0, 1, 1], [], []>} : vector<64x128xf32>, vector<128x128xf32>, vector<64x128xf32> -> vector<64x128xf32>
    %c0_130 = arith.constant 0 : index
    %c0_131 = arith.constant 0 : index
    %467 = vector.load %arg12[%c0_130, %c0_131] : memref<1x128xf32, #tpu.memory_space<vmem>>, vector<1x128xf32>
    %468 = vector.shape_cast %467 : vector<1x128xf32> to vector<1x128xf32>
    %469 = vector.broadcast %468 : vector<1x128xf32> to vector<64x128xf32>
    %470 = arith.addf %466, %469 : vector<64x128xf32>
    %c0_132 = arith.constant 0 : index
    %c0_133 = arith.constant 0 : index
    %471 = vector.load %arg22[%c0_132, %c0_133] : memref<64x128xf32, #tpu.memory_space<vmem>>, vector<64x128xf32>
    tpu.vector_store %arg22[%c0_132, %c0_133], %470 {strides = array<i32>} : memref<64x128xf32, #tpu.memory_space<vmem>>, vector<64x128xf32>,
    %c0_134 = arith.constant 0 : index
    %c0_135 = arith.constant 0 : index
    %472 = vector.load %arg11[%c0_134, %c0_135] : memref<32x128xf32, #tpu.memory_space<vmem>>, vector<32x128xf32>
    %cst_136 = arith.constant 0.000000e+00 : f32
    %473 = vector.broadcast %cst_136 : f32 to vector<8x32xf32>
    %cst_137 = arith.constant 0.000000e+00 : f32
    %474 = vector.broadcast %cst_137 : f32 to vector<8x32xf32>
    %c0_138 = arith.constant 0 : index
    %c0_139 = arith.constant 0 : index
    %475 = vector.load %arg22[%c0_138, %c0_139] : memref<64x128xf32, #tpu.memory_space<vmem>>, vector<8x128xf32>
    %cst_140 = arith.constant dense<0.000000e+00> : vector<8x128xf32>
    %476 = tpu.matmul %473, %472, %cst_140 {dimension_numbers = #tpu.dot_dimension_numbers<[1], [0], [0], [1], [0, 0, 1, 1], [], []>} : vector<8x32xf32>, vector<32x128xf32>, vector<8x128xf32> -> vector<8x128xf32>
    %477 = arith.addf %475, %476 : vector<8x128xf32>
    %478 = arith.mulf %477, %27 : vector<8x128xf32>
    %479 = math.tanh %478 : vector<8x128xf32>
    %480 = arith.mulf %479, %27 : vector<8x128xf32>
    %481 = arith.addf %480, %30 : vector<8x128xf32>
    %482 = vector.extract_strided_slice %481 {offsets = [0, 0], sizes = [8, 32], strides = [1, 1]} : vector<8x128xf32> to vector<8x32xf32>
    %483 = vector.extract_strided_slice %481 {offsets = [0, 32], sizes = [8, 32], strides = [1, 1]} : vector<8x128xf32> to vector<8x32xf32>
    %484 = vector.extract_strided_slice %481 {offsets = [0, 64], sizes = [8, 32], strides = [1, 1]} : vector<8x128xf32> to vector<8x32xf32>
    %485 = vector.extract_strided_slice %481 {offsets = [0, 96], sizes = [8, 32], strides = [1, 1]} : vector<8x128xf32> to vector<8x32xf32>
    %486 = arith.mulf %483, %474 : vector<8x32xf32>
    %487 = arith.mulf %482, %484 : vector<8x32xf32>
    %488 = arith.addf %486, %487 : vector<8x32xf32>
    %489 = math.tanh %488 : vector<8x32xf32>
    %490 = arith.mulf %485, %489 : vector<8x32xf32>
    %c0_141 = arith.constant 0 : index
    %c0_142 = arith.constant 0 : index
    %491 = vector.load %arg24[%c0_141, %c0_142] : memref<64x32xf32, #tpu.memory_space<vmem>>, vector<8x32xf32>
    tpu.vector_store %arg24[%c0_141, %c0_142], %490 {strides = array<i32>} : memref<64x32xf32, #tpu.memory_space<vmem>>, vector<8x32xf32>,
    %c8_143 = arith.constant 8 : index
    %c0_144 = arith.constant 0 : index
    %492 = vector.load %arg22[%c8_143, %c0_144] : memref<64x128xf32, #tpu.memory_space<vmem>>, vector<8x128xf32>
    %cst_145 = arith.constant dense<0.000000e+00> : vector<8x128xf32>
    %493 = tpu.matmul %490, %472, %cst_145 {dimension_numbers = #tpu.dot_dimension_numbers<[1], [0], [0], [1], [0, 0, 1, 1], [], []>} : vector<8x32xf32>, vector<32x128xf32>, vector<8x128xf32> -> vector<8x128xf32>
    %494 = arith.addf %492, %493 : vector<8x128xf32>
    %495 = arith.mulf %494, %27 : vector<8x128xf32>
    %496 = math.tanh %495 : vector<8x128xf32>
    %497 = arith.mulf %496, %27 : vector<8x128xf32>
    %498 = arith.addf %497, %30 : vector<8x128xf32>
    %499 = vector.extract_strided_slice %498 {offsets = [0, 0], sizes = [8, 32], strides = [1, 1]} : vector<8x128xf32> to vector<8x32xf32>
    %500 = vector.extract_strided_slice %498 {offsets = [0, 32], sizes = [8, 32], strides = [1, 1]} : vector<8x128xf32> to vector<8x32xf32>
    %501 = vector.extract_strided_slice %498 {offsets = [0, 64], sizes = [8, 32], strides = [1, 1]} : vector<8x128xf32> to vector<8x32xf32>
    %502 = vector.extract_strided_slice %498 {offsets = [0, 96], sizes = [8, 32], strides = [1, 1]} : vector<8x128xf32> to vector<8x32xf32>
    %503 = arith.mulf %500, %488 : vector<8x32xf32>
    %504 = arith.mulf %499, %501 : vector<8x32xf32>
    %505 = arith.addf %503, %504 : vector<8x32xf32>
    %506 = math.tanh %505 : vector<8x32xf32>
    %507 = arith.mulf %502, %506 : vector<8x32xf32>
    %c8_146 = arith.constant 8 : index
    %c0_147 = arith.constant 0 : index
    %508 = vector.load %arg24[%c8_146, %c0_147] : memref<64x32xf32, #tpu.memory_space<vmem>>, vector<8x32xf32>
    tpu.vector_store %arg24[%c8_146, %c0_147], %507 {strides = array<i32>} : memref<64x32xf32, #tpu.memory_space<vmem>>, vector<8x32xf32>,
    %c16_148 = arith.constant 16 : index
    %c0_149 = arith.constant 0 : index
    %509 = vector.load %arg22[%c16_148, %c0_149] : memref<64x128xf32, #tpu.memory_space<vmem>>, vector<8x128xf32>
    %cst_150 = arith.constant dense<0.000000e+00> : vector<8x128xf32>
    %510 = tpu.matmul %507, %472, %cst_150 {dimension_numbers = #tpu.dot_dimension_numbers<[1], [0], [0], [1], [0, 0, 1, 1], [], []>} : vector<8x32xf32>, vector<32x128xf32>, vector<8x128xf32> -> vector<8x128xf32>
    %511 = arith.addf %509, %510 : vector<8x128xf32>
    %512 = arith.mulf %511, %27 : vector<8x128xf32>
    %513 = math.tanh %512 : vector<8x128xf32>
    %514 = arith.mulf %513, %27 : vector<8x128xf32>
    %515 = arith.addf %514, %30 : vector<8x128xf32>
    %516 = vector.extract_strided_slice %515 {offsets = [0, 0], sizes = [8, 32], strides = [1, 1]} : vector<8x128xf32> to vector<8x32xf32>
    %517 = vector.extract_strided_slice %515 {offsets = [0, 32], sizes = [8, 32], strides = [1, 1]} : vector<8x128xf32> to vector<8x32xf32>
    %518 = vector.extract_strided_slice %515 {offsets = [0, 64], sizes = [8, 32], strides = [1, 1]} : vector<8x128xf32> to vector<8x32xf32>
    %519 = vector.extract_strided_slice %515 {offsets = [0, 96], sizes = [8, 32], strides = [1, 1]} : vector<8x128xf32> to vector<8x32xf32>
    %520 = arith.mulf %517, %505 : vector<8x32xf32>
    %521 = arith.mulf %516, %518 : vector<8x32xf32>
    %522 = arith.addf %520, %521 : vector<8x32xf32>
    %523 = math.tanh %522 : vector<8x32xf32>
    %524 = arith.mulf %519, %523 : vector<8x32xf32>
    %c16_151 = arith.constant 16 : index
    %c0_152 = arith.constant 0 : index
    %525 = vector.load %arg24[%c16_151, %c0_152] : memref<64x32xf32, #tpu.memory_space<vmem>>, vector<8x32xf32>
    tpu.vector_store %arg24[%c16_151, %c0_152], %524 {strides = array<i32>} : memref<64x32xf32, #tpu.memory_space<vmem>>, vector<8x32xf32>,
    %c24_153 = arith.constant 24 : index
    %c0_154 = arith.constant 0 : index
    %526 = vector.load %arg22[%c24_153, %c0_154] : memref<64x128xf32, #tpu.memory_space<vmem>>, vector<8x128xf32>
    %cst_155 = arith.constant dense<0.000000e+00> : vector<8x128xf32>
    %527 = tpu.matmul %524, %472, %cst_155 {dimension_numbers = #tpu.dot_dimension_numbers<[1], [0], [0], [1], [0, 0, 1, 1], [], []>} : vector<8x32xf32>, vector<32x128xf32>, vector<8x128xf32> -> vector<8x128xf32>
    %528 = arith.addf %526, %527 : vector<8x128xf32>
    %529 = arith.mulf %528, %27 : vector<8x128xf32>
    %530 = math.tanh %529 : vector<8x128xf32>
    %531 = arith.mulf %530, %27 : vector<8x128xf32>
    %532 = arith.addf %531, %30 : vector<8x128xf32>
    %533 = vector.extract_strided_slice %532 {offsets = [0, 0], sizes = [8, 32], strides = [1, 1]} : vector<8x128xf32> to vector<8x32xf32>
    %534 = vector.extract_strided_slice %532 {offsets = [0, 32], sizes = [8, 32], strides = [1, 1]} : vector<8x128xf32> to vector<8x32xf32>
    %535 = vector.extract_strided_slice %532 {offsets = [0, 64], sizes = [8, 32], strides = [1, 1]} : vector<8x128xf32> to vector<8x32xf32>
    %536 = vector.extract_strided_slice %532 {offsets = [0, 96], sizes = [8, 32], strides = [1, 1]} : vector<8x128xf32> to vector<8x32xf32>
    %537 = arith.mulf %534, %522 : vector<8x32xf32>
    %538 = arith.mulf %533, %535 : vector<8x32xf32>
    %539 = arith.addf %537, %538 : vector<8x32xf32>
    %540 = math.tanh %539 : vector<8x32xf32>
    %541 = arith.mulf %536, %540 : vector<8x32xf32>
    %c24_156 = arith.constant 24 : index
    %c0_157 = arith.constant 0 : index
    %542 = vector.load %arg24[%c24_156, %c0_157] : memref<64x32xf32, #tpu.memory_space<vmem>>, vector<8x32xf32>
    tpu.vector_store %arg24[%c24_156, %c0_157], %541 {strides = array<i32>} : memref<64x32xf32, #tpu.memory_space<vmem>>, vector<8x32xf32>,
    %c32_158 = arith.constant 32 : index
    %c0_159 = arith.constant 0 : index
    %543 = vector.load %arg22[%c32_158, %c0_159] : memref<64x128xf32, #tpu.memory_space<vmem>>, vector<8x128xf32>
    %cst_160 = arith.constant dense<0.000000e+00> : vector<8x128xf32>
    %544 = tpu.matmul %541, %472, %cst_160 {dimension_numbers = #tpu.dot_dimension_numbers<[1], [0], [0], [1], [0, 0, 1, 1], [], []>} : vector<8x32xf32>, vector<32x128xf32>, vector<8x128xf32> -> vector<8x128xf32>
    %545 = arith.addf %543, %544 : vector<8x128xf32>
    %546 = arith.mulf %545, %27 : vector<8x128xf32>
    %547 = math.tanh %546 : vector<8x128xf32>
    %548 = arith.mulf %547, %27 : vector<8x128xf32>
    %549 = arith.addf %548, %30 : vector<8x128xf32>
    %550 = vector.extract_strided_slice %549 {offsets = [0, 0], sizes = [8, 32], strides = [1, 1]} : vector<8x128xf32> to vector<8x32xf32>
    %551 = vector.extract_strided_slice %549 {offsets = [0, 32], sizes = [8, 32], strides = [1, 1]} : vector<8x128xf32> to vector<8x32xf32>
    %552 = vector.extract_strided_slice %549 {offsets = [0, 64], sizes = [8, 32], strides = [1, 1]} : vector<8x128xf32> to vector<8x32xf32>
    %553 = vector.extract_strided_slice %549 {offsets = [0, 96], sizes = [8, 32], strides = [1, 1]} : vector<8x128xf32> to vector<8x32xf32>
    %554 = arith.mulf %551, %539 : vector<8x32xf32>
    %555 = arith.mulf %550, %552 : vector<8x32xf32>
    %556 = arith.addf %554, %555 : vector<8x32xf32>
    %557 = math.tanh %556 : vector<8x32xf32>
    %558 = arith.mulf %553, %557 : vector<8x32xf32>
    %c32_161 = arith.constant 32 : index
    %c0_162 = arith.constant 0 : index
    %559 = vector.load %arg24[%c32_161, %c0_162] : memref<64x32xf32, #tpu.memory_space<vmem>>, vector<8x32xf32>
    tpu.vector_store %arg24[%c32_161, %c0_162], %558 {strides = array<i32>} : memref<64x32xf32, #tpu.memory_space<vmem>>, vector<8x32xf32>,
    %c40_163 = arith.constant 40 : index
    %c0_164 = arith.constant 0 : index
    %560 = vector.load %arg22[%c40_163, %c0_164] : memref<64x128xf32, #tpu.memory_space<vmem>>, vector<8x128xf32>
    %cst_165 = arith.constant dense<0.000000e+00> : vector<8x128xf32>
    %561 = tpu.matmul %558, %472, %cst_165 {dimension_numbers = #tpu.dot_dimension_numbers<[1], [0], [0], [1], [0, 0, 1, 1], [], []>} : vector<8x32xf32>, vector<32x128xf32>, vector<8x128xf32> -> vector<8x128xf32>
    %562 = arith.addf %560, %561 : vector<8x128xf32>
    %563 = arith.mulf %562, %27 : vector<8x128xf32>
    %564 = math.tanh %563 : vector<8x128xf32>
    %565 = arith.mulf %564, %27 : vector<8x128xf32>
    %566 = arith.addf %565, %30 : vector<8x128xf32>
    %567 = vector.extract_strided_slice %566 {offsets = [0, 0], sizes = [8, 32], strides = [1, 1]} : vector<8x128xf32> to vector<8x32xf32>
    %568 = vector.extract_strided_slice %566 {offsets = [0, 32], sizes = [8, 32], strides = [1, 1]} : vector<8x128xf32> to vector<8x32xf32>
    %569 = vector.extract_strided_slice %566 {offsets = [0, 64], sizes = [8, 32], strides = [1, 1]} : vector<8x128xf32> to vector<8x32xf32>
    %570 = vector.extract_strided_slice %566 {offsets = [0, 96], sizes = [8, 32], strides = [1, 1]} : vector<8x128xf32> to vector<8x32xf32>
    %571 = arith.mulf %568, %556 : vector<8x32xf32>
    %572 = arith.mulf %567, %569 : vector<8x32xf32>
    %573 = arith.addf %571, %572 : vector<8x32xf32>
    %574 = math.tanh %573 : vector<8x32xf32>
    %575 = arith.mulf %570, %574 : vector<8x32xf32>
    %c40_166 = arith.constant 40 : index
    %c0_167 = arith.constant 0 : index
    %576 = vector.load %arg24[%c40_166, %c0_167] : memref<64x32xf32, #tpu.memory_space<vmem>>, vector<8x32xf32>
    tpu.vector_store %arg24[%c40_166, %c0_167], %575 {strides = array<i32>} : memref<64x32xf32, #tpu.memory_space<vmem>>, vector<8x32xf32>,
    %c48_168 = arith.constant 48 : index
    %c0_169 = arith.constant 0 : index
    %577 = vector.load %arg22[%c48_168, %c0_169] : memref<64x128xf32, #tpu.memory_space<vmem>>, vector<8x128xf32>
    %cst_170 = arith.constant dense<0.000000e+00> : vector<8x128xf32>
    %578 = tpu.matmul %575, %472, %cst_170 {dimension_numbers = #tpu.dot_dimension_numbers<[1], [0], [0], [1], [0, 0, 1, 1], [], []>} : vector<8x32xf32>, vector<32x128xf32>, vector<8x128xf32> -> vector<8x128xf32>
    %579 = arith.addf %577, %578 : vector<8x128xf32>
    %580 = arith.mulf %579, %27 : vector<8x128xf32>
    %581 = math.tanh %580 : vector<8x128xf32>
    %582 = arith.mulf %581, %27 : vector<8x128xf32>
    %583 = arith.addf %582, %30 : vector<8x128xf32>
    %584 = vector.extract_strided_slice %583 {offsets = [0, 0], sizes = [8, 32], strides = [1, 1]} : vector<8x128xf32> to vector<8x32xf32>
    %585 = vector.extract_strided_slice %583 {offsets = [0, 32], sizes = [8, 32], strides = [1, 1]} : vector<8x128xf32> to vector<8x32xf32>
    %586 = vector.extract_strided_slice %583 {offsets = [0, 64], sizes = [8, 32], strides = [1, 1]} : vector<8x128xf32> to vector<8x32xf32>
    %587 = vector.extract_strided_slice %583 {offsets = [0, 96], sizes = [8, 32], strides = [1, 1]} : vector<8x128xf32> to vector<8x32xf32>
    %588 = arith.mulf %585, %573 : vector<8x32xf32>
    %589 = arith.mulf %584, %586 : vector<8x32xf32>
    %590 = arith.addf %588, %589 : vector<8x32xf32>
    %591 = math.tanh %590 : vector<8x32xf32>
    %592 = arith.mulf %587, %591 : vector<8x32xf32>
    %c48_171 = arith.constant 48 : index
    %c0_172 = arith.constant 0 : index
    %593 = vector.load %arg24[%c48_171, %c0_172] : memref<64x32xf32, #tpu.memory_space<vmem>>, vector<8x32xf32>
    tpu.vector_store %arg24[%c48_171, %c0_172], %592 {strides = array<i32>} : memref<64x32xf32, #tpu.memory_space<vmem>>, vector<8x32xf32>,
    %c56_173 = arith.constant 56 : index
    %c0_174 = arith.constant 0 : index
    %594 = vector.load %arg22[%c56_173, %c0_174] : memref<64x128xf32, #tpu.memory_space<vmem>>, vector<8x128xf32>
    %cst_175 = arith.constant dense<0.000000e+00> : vector<8x128xf32>
    %595 = tpu.matmul %592, %472, %cst_175 {dimension_numbers = #tpu.dot_dimension_numbers<[1], [0], [0], [1], [0, 0, 1, 1], [], []>} : vector<8x32xf32>, vector<32x128xf32>, vector<8x128xf32> -> vector<8x128xf32>
    %596 = arith.addf %594, %595 : vector<8x128xf32>
    %597 = arith.mulf %596, %27 : vector<8x128xf32>
    %598 = math.tanh %597 : vector<8x128xf32>
    %599 = arith.mulf %598, %27 : vector<8x128xf32>
    %600 = arith.addf %599, %30 : vector<8x128xf32>
    %601 = vector.extract_strided_slice %600 {offsets = [0, 0], sizes = [8, 32], strides = [1, 1]} : vector<8x128xf32> to vector<8x32xf32>
    %602 = vector.extract_strided_slice %600 {offsets = [0, 32], sizes = [8, 32], strides = [1, 1]} : vector<8x128xf32> to vector<8x32xf32>
    %603 = vector.extract_strided_slice %600 {offsets = [0, 64], sizes = [8, 32], strides = [1, 1]} : vector<8x128xf32> to vector<8x32xf32>
    %604 = vector.extract_strided_slice %600 {offsets = [0, 96], sizes = [8, 32], strides = [1, 1]} : vector<8x128xf32> to vector<8x32xf32>
    %605 = arith.mulf %602, %590 : vector<8x32xf32>
    %606 = arith.mulf %601, %603 : vector<8x32xf32>
    %607 = arith.addf %605, %606 : vector<8x32xf32>
    %608 = math.tanh %607 : vector<8x32xf32>
    %609 = arith.mulf %604, %608 : vector<8x32xf32>
    %c56_176 = arith.constant 56 : index
    %c0_177 = arith.constant 0 : index
    %610 = vector.load %arg24[%c56_176, %c0_177] : memref<64x32xf32, #tpu.memory_space<vmem>>, vector<8x32xf32>
    tpu.vector_store %arg24[%c56_176, %c0_177], %609 {strides = array<i32>} : memref<64x32xf32, #tpu.memory_space<vmem>>, vector<8x32xf32>,
    %c0_178 = arith.constant 0 : index
    %c0_179 = arith.constant 0 : index
    %611 = vector.load %arg24[%c0_178, %c0_179] : memref<64x32xf32, #tpu.memory_space<vmem>>, vector<64x32xf32>
    %c0_180 = arith.constant 0 : index
    %c0_181 = arith.constant 0 : index
    %612 = vector.load %arg13[%c0_180, %c0_181] : memref<32x128xf32, #tpu.memory_space<vmem>>, vector<32x128xf32>
    %cst_182 = arith.constant dense<0.000000e+00> : vector<64x128xf32>
    %613 = tpu.matmul %611, %612, %cst_182 {dimension_numbers = #tpu.dot_dimension_numbers<[1], [0], [0], [1], [0, 0, 1, 1], [], []>} : vector<64x32xf32>, vector<32x128xf32>, vector<64x128xf32> -> vector<64x128xf32>
    %c0_183 = arith.constant 0 : index
    %c0_184 = arith.constant 0 : index
    %614 = vector.load %arg15[%c0_183, %c0_184] : memref<1x128xf32, #tpu.memory_space<vmem>>, vector<1x128xf32>
    %615 = vector.shape_cast %614 : vector<1x128xf32> to vector<1x128xf32>
    %616 = vector.broadcast %615 : vector<1x128xf32> to vector<64x128xf32>
    %617 = arith.addf %613, %616 : vector<64x128xf32>
    %c0_185 = arith.constant 0 : index
    %c0_186 = arith.constant 0 : index
    %618 = vector.load %arg22[%c0_185, %c0_186] : memref<64x128xf32, #tpu.memory_space<vmem>>, vector<64x128xf32>
    tpu.vector_store %arg22[%c0_185, %c0_186], %617 {strides = array<i32>} : memref<64x128xf32, #tpu.memory_space<vmem>>, vector<64x128xf32>,
    %c0_187 = arith.constant 0 : index
    %c0_188 = arith.constant 0 : index
    %619 = vector.load %arg14[%c0_187, %c0_188] : memref<32x128xf32, #tpu.memory_space<vmem>>, vector<32x128xf32>
    %cst_189 = arith.constant 0.000000e+00 : f32
    %620 = vector.broadcast %cst_189 : f32 to vector<8x32xf32>
    %cst_190 = arith.constant 0.000000e+00 : f32
    %621 = vector.broadcast %cst_190 : f32 to vector<8x32xf32>
    %c0_191 = arith.constant 0 : index
    %c0_192 = arith.constant 0 : index
    %622 = vector.load %arg22[%c0_191, %c0_192] : memref<64x128xf32, #tpu.memory_space<vmem>>, vector<8x128xf32>
    %cst_193 = arith.constant dense<0.000000e+00> : vector<8x128xf32>
    %623 = tpu.matmul %620, %619, %cst_193 {dimension_numbers = #tpu.dot_dimension_numbers<[1], [0], [0], [1], [0, 0, 1, 1], [], []>} : vector<8x32xf32>, vector<32x128xf32>, vector<8x128xf32> -> vector<8x128xf32>
    %624 = arith.addf %622, %623 : vector<8x128xf32>
    %625 = arith.mulf %624, %27 : vector<8x128xf32>
    %626 = math.tanh %625 : vector<8x128xf32>
    %627 = arith.mulf %626, %27 : vector<8x128xf32>
    %628 = arith.addf %627, %30 : vector<8x128xf32>
    %629 = vector.extract_strided_slice %628 {offsets = [0, 0], sizes = [8, 32], strides = [1, 1]} : vector<8x128xf32> to vector<8x32xf32>
    %630 = vector.extract_strided_slice %628 {offsets = [0, 32], sizes = [8, 32], strides = [1, 1]} : vector<8x128xf32> to vector<8x32xf32>
    %631 = vector.extract_strided_slice %628 {offsets = [0, 64], sizes = [8, 32], strides = [1, 1]} : vector<8x128xf32> to vector<8x32xf32>
    %632 = vector.extract_strided_slice %628 {offsets = [0, 96], sizes = [8, 32], strides = [1, 1]} : vector<8x128xf32> to vector<8x32xf32>
    %633 = arith.mulf %630, %621 : vector<8x32xf32>
    %634 = arith.mulf %629, %631 : vector<8x32xf32>
    %635 = arith.addf %633, %634 : vector<8x32xf32>
    %636 = math.tanh %635 : vector<8x32xf32>
    %637 = arith.mulf %632, %636 : vector<8x32xf32>
    %c0_194 = arith.constant 0 : index
    %c0_195 = arith.constant 0 : index
    %638 = vector.load %arg25[%c0_194, %c0_195] : memref<8x256xf32, #tpu.memory_space<vmem>>, vector<8x32xf32>
    tpu.vector_store %arg25[%c0_194, %c0_195], %637 {strides = array<i32>} : memref<8x256xf32, #tpu.memory_space<vmem>>, vector<8x32xf32>,
    %c8_196 = arith.constant 8 : index
    %c0_197 = arith.constant 0 : index
    %639 = vector.load %arg22[%c8_196, %c0_197] : memref<64x128xf32, #tpu.memory_space<vmem>>, vector<8x128xf32>
    %cst_198 = arith.constant dense<0.000000e+00> : vector<8x128xf32>
    %640 = tpu.matmul %637, %619, %cst_198 {dimension_numbers = #tpu.dot_dimension_numbers<[1], [0], [0], [1], [0, 0, 1, 1], [], []>} : vector<8x32xf32>, vector<32x128xf32>, vector<8x128xf32> -> vector<8x128xf32>
    %641 = arith.addf %639, %640 : vector<8x128xf32>
    %642 = arith.mulf %641, %27 : vector<8x128xf32>
    %643 = math.tanh %642 : vector<8x128xf32>
    %644 = arith.mulf %643, %27 : vector<8x128xf32>
    %645 = arith.addf %644, %30 : vector<8x128xf32>
    %646 = vector.extract_strided_slice %645 {offsets = [0, 0], sizes = [8, 32], strides = [1, 1]} : vector<8x128xf32> to vector<8x32xf32>
    %647 = vector.extract_strided_slice %645 {offsets = [0, 32], sizes = [8, 32], strides = [1, 1]} : vector<8x128xf32> to vector<8x32xf32>
    %648 = vector.extract_strided_slice %645 {offsets = [0, 64], sizes = [8, 32], strides = [1, 1]} : vector<8x128xf32> to vector<8x32xf32>
    %649 = vector.extract_strided_slice %645 {offsets = [0, 96], sizes = [8, 32], strides = [1, 1]} : vector<8x128xf32> to vector<8x32xf32>
    %650 = arith.mulf %647, %635 : vector<8x32xf32>
    %651 = arith.mulf %646, %648 : vector<8x32xf32>
    %652 = arith.addf %650, %651 : vector<8x32xf32>
    %653 = math.tanh %652 : vector<8x32xf32>
    %654 = arith.mulf %649, %653 : vector<8x32xf32>
    %c0_199 = arith.constant 0 : index
    %c32_200 = arith.constant 32 : index
    %655 = vector.load %arg25[%c0_199, %c32_200] : memref<8x256xf32, #tpu.memory_space<vmem>>, vector<8x32xf32>
    tpu.vector_store %arg25[%c0_199, %c32_200], %654 {strides = array<i32>} : memref<8x256xf32, #tpu.memory_space<vmem>>, vector<8x32xf32>,
    %c16_201 = arith.constant 16 : index
    %c0_202 = arith.constant 0 : index
    %656 = vector.load %arg22[%c16_201, %c0_202] : memref<64x128xf32, #tpu.memory_space<vmem>>, vector<8x128xf32>
    %cst_203 = arith.constant dense<0.000000e+00> : vector<8x128xf32>
    %657 = tpu.matmul %654, %619, %cst_203 {dimension_numbers = #tpu.dot_dimension_numbers<[1], [0], [0], [1], [0, 0, 1, 1], [], []>} : vector<8x32xf32>, vector<32x128xf32>, vector<8x128xf32> -> vector<8x128xf32>
    %658 = arith.addf %656, %657 : vector<8x128xf32>
    %659 = arith.mulf %658, %27 : vector<8x128xf32>
    %660 = math.tanh %659 : vector<8x128xf32>
    %661 = arith.mulf %660, %27 : vector<8x128xf32>
    %662 = arith.addf %661, %30 : vector<8x128xf32>
    %663 = vector.extract_strided_slice %662 {offsets = [0, 0], sizes = [8, 32], strides = [1, 1]} : vector<8x128xf32> to vector<8x32xf32>
    %664 = vector.extract_strided_slice %662 {offsets = [0, 32], sizes = [8, 32], strides = [1, 1]} : vector<8x128xf32> to vector<8x32xf32>
    %665 = vector.extract_strided_slice %662 {offsets = [0, 64], sizes = [8, 32], strides = [1, 1]} : vector<8x128xf32> to vector<8x32xf32>
    %666 = vector.extract_strided_slice %662 {offsets = [0, 96], sizes = [8, 32], strides = [1, 1]} : vector<8x128xf32> to vector<8x32xf32>
    %667 = arith.mulf %664, %652 : vector<8x32xf32>
    %668 = arith.mulf %663, %665 : vector<8x32xf32>
    %669 = arith.addf %667, %668 : vector<8x32xf32>
    %670 = math.tanh %669 : vector<8x32xf32>
    %671 = arith.mulf %666, %670 : vector<8x32xf32>
    %c0_204 = arith.constant 0 : index
    %c64 = arith.constant 64 : index
    %672 = vector.load %arg25[%c0_204, %c64] : memref<8x256xf32, #tpu.memory_space<vmem>>, vector<8x32xf32>
    tpu.vector_store %arg25[%c0_204, %c64], %671 {strides = array<i32>} : memref<8x256xf32, #tpu.memory_space<vmem>>, vector<8x32xf32>,
    %c24_205 = arith.constant 24 : index
    %c0_206 = arith.constant 0 : index
    %673 = vector.load %arg22[%c24_205, %c0_206] : memref<64x128xf32, #tpu.memory_space<vmem>>, vector<8x128xf32>
    %cst_207 = arith.constant dense<0.000000e+00> : vector<8x128xf32>
    %674 = tpu.matmul %671, %619, %cst_207 {dimension_numbers = #tpu.dot_dimension_numbers<[1], [0], [0], [1], [0, 0, 1, 1], [], []>} : vector<8x32xf32>, vector<32x128xf32>, vector<8x128xf32> -> vector<8x128xf32>
    %675 = arith.addf %673, %674 : vector<8x128xf32>
    %676 = arith.mulf %675, %27 : vector<8x128xf32>
    %677 = math.tanh %676 : vector<8x128xf32>
    %678 = arith.mulf %677, %27 : vector<8x128xf32>
    %679 = arith.addf %678, %30 : vector<8x128xf32>
    %680 = vector.extract_strided_slice %679 {offsets = [0, 0], sizes = [8, 32], strides = [1, 1]} : vector<8x128xf32> to vector<8x32xf32>
    %681 = vector.extract_strided_slice %679 {offsets = [0, 32], sizes = [8, 32], strides = [1, 1]} : vector<8x128xf32> to vector<8x32xf32>
    %682 = vector.extract_strided_slice %679 {offsets = [0, 64], sizes = [8, 32], strides = [1, 1]} : vector<8x128xf32> to vector<8x32xf32>
    %683 = vector.extract_strided_slice %679 {offsets = [0, 96], sizes = [8, 32], strides = [1, 1]} : vector<8x128xf32> to vector<8x32xf32>
    %684 = arith.mulf %681, %669 : vector<8x32xf32>
    %685 = arith.mulf %680, %682 : vector<8x32xf32>
    %686 = arith.addf %684, %685 : vector<8x32xf32>
    %687 = math.tanh %686 : vector<8x32xf32>
    %688 = arith.mulf %683, %687 : vector<8x32xf32>
    %c0_208 = arith.constant 0 : index
    %c96 = arith.constant 96 : index
    %689 = vector.load %arg25[%c0_208, %c96] : memref<8x256xf32, #tpu.memory_space<vmem>>, vector<8x32xf32>
    tpu.vector_store %arg25[%c0_208, %c96], %688 {strides = array<i32>} : memref<8x256xf32, #tpu.memory_space<vmem>>, vector<8x32xf32>,
    %c32_209 = arith.constant 32 : index
    %c0_210 = arith.constant 0 : index
    %690 = vector.load %arg22[%c32_209, %c0_210] : memref<64x128xf32, #tpu.memory_space<vmem>>, vector<8x128xf32>
    %cst_211 = arith.constant dense<0.000000e+00> : vector<8x128xf32>
    %691 = tpu.matmul %688, %619, %cst_211 {dimension_numbers = #tpu.dot_dimension_numbers<[1], [0], [0], [1], [0, 0, 1, 1], [], []>} : vector<8x32xf32>, vector<32x128xf32>, vector<8x128xf32> -> vector<8x128xf32>
    %692 = arith.addf %690, %691 : vector<8x128xf32>
    %693 = arith.mulf %692, %27 : vector<8x128xf32>
    %694 = math.tanh %693 : vector<8x128xf32>
    %695 = arith.mulf %694, %27 : vector<8x128xf32>
    %696 = arith.addf %695, %30 : vector<8x128xf32>
    %697 = vector.extract_strided_slice %696 {offsets = [0, 0], sizes = [8, 32], strides = [1, 1]} : vector<8x128xf32> to vector<8x32xf32>
    %698 = vector.extract_strided_slice %696 {offsets = [0, 32], sizes = [8, 32], strides = [1, 1]} : vector<8x128xf32> to vector<8x32xf32>
    %699 = vector.extract_strided_slice %696 {offsets = [0, 64], sizes = [8, 32], strides = [1, 1]} : vector<8x128xf32> to vector<8x32xf32>
    %700 = vector.extract_strided_slice %696 {offsets = [0, 96], sizes = [8, 32], strides = [1, 1]} : vector<8x128xf32> to vector<8x32xf32>
    %701 = arith.mulf %698, %686 : vector<8x32xf32>
    %702 = arith.mulf %697, %699 : vector<8x32xf32>
    %703 = arith.addf %701, %702 : vector<8x32xf32>
    %704 = math.tanh %703 : vector<8x32xf32>
    %705 = arith.mulf %700, %704 : vector<8x32xf32>
    %c0_212 = arith.constant 0 : index
    %c128 = arith.constant 128 : index
    %706 = vector.load %arg25[%c0_212, %c128] : memref<8x256xf32, #tpu.memory_space<vmem>>, vector<8x32xf32>
    tpu.vector_store %arg25[%c0_212, %c128], %705 {strides = array<i32>} : memref<8x256xf32, #tpu.memory_space<vmem>>, vector<8x32xf32>,
    %c40_213 = arith.constant 40 : index
    %c0_214 = arith.constant 0 : index
    %707 = vector.load %arg22[%c40_213, %c0_214] : memref<64x128xf32, #tpu.memory_space<vmem>>, vector<8x128xf32>
    %cst_215 = arith.constant dense<0.000000e+00> : vector<8x128xf32>
    %708 = tpu.matmul %705, %619, %cst_215 {dimension_numbers = #tpu.dot_dimension_numbers<[1], [0], [0], [1], [0, 0, 1, 1], [], []>} : vector<8x32xf32>, vector<32x128xf32>, vector<8x128xf32> -> vector<8x128xf32>
    %709 = arith.addf %707, %708 : vector<8x128xf32>
    %710 = arith.mulf %709, %27 : vector<8x128xf32>
    %711 = math.tanh %710 : vector<8x128xf32>
    %712 = arith.mulf %711, %27 : vector<8x128xf32>
    %713 = arith.addf %712, %30 : vector<8x128xf32>
    %714 = vector.extract_strided_slice %713 {offsets = [0, 0], sizes = [8, 32], strides = [1, 1]} : vector<8x128xf32> to vector<8x32xf32>
    %715 = vector.extract_strided_slice %713 {offsets = [0, 32], sizes = [8, 32], strides = [1, 1]} : vector<8x128xf32> to vector<8x32xf32>
    %716 = vector.extract_strided_slice %713 {offsets = [0, 64], sizes = [8, 32], strides = [1, 1]} : vector<8x128xf32> to vector<8x32xf32>
    %717 = vector.extract_strided_slice %713 {offsets = [0, 96], sizes = [8, 32], strides = [1, 1]} : vector<8x128xf32> to vector<8x32xf32>
    %718 = arith.mulf %715, %703 : vector<8x32xf32>
    %719 = arith.mulf %714, %716 : vector<8x32xf32>
    %720 = arith.addf %718, %719 : vector<8x32xf32>
    %721 = math.tanh %720 : vector<8x32xf32>
    %722 = arith.mulf %717, %721 : vector<8x32xf32>
    %c0_216 = arith.constant 0 : index
    %c160 = arith.constant 160 : index
    %723 = vector.load %arg25[%c0_216, %c160] : memref<8x256xf32, #tpu.memory_space<vmem>>, vector<8x32xf32>
    tpu.vector_store %arg25[%c0_216, %c160], %722 {strides = array<i32>} : memref<8x256xf32, #tpu.memory_space<vmem>>, vector<8x32xf32>,
    %c48_217 = arith.constant 48 : index
    %c0_218 = arith.constant 0 : index
    %724 = vector.load %arg22[%c48_217, %c0_218] : memref<64x128xf32, #tpu.memory_space<vmem>>, vector<8x128xf32>
    %cst_219 = arith.constant dense<0.000000e+00> : vector<8x128xf32>
    %725 = tpu.matmul %722, %619, %cst_219 {dimension_numbers = #tpu.dot_dimension_numbers<[1], [0], [0], [1], [0, 0, 1, 1], [], []>} : vector<8x32xf32>, vector<32x128xf32>, vector<8x128xf32> -> vector<8x128xf32>
    %726 = arith.addf %724, %725 : vector<8x128xf32>
    %727 = arith.mulf %726, %27 : vector<8x128xf32>
    %728 = math.tanh %727 : vector<8x128xf32>
    %729 = arith.mulf %728, %27 : vector<8x128xf32>
    %730 = arith.addf %729, %30 : vector<8x128xf32>
    %731 = vector.extract_strided_slice %730 {offsets = [0, 0], sizes = [8, 32], strides = [1, 1]} : vector<8x128xf32> to vector<8x32xf32>
    %732 = vector.extract_strided_slice %730 {offsets = [0, 32], sizes = [8, 32], strides = [1, 1]} : vector<8x128xf32> to vector<8x32xf32>
    %733 = vector.extract_strided_slice %730 {offsets = [0, 64], sizes = [8, 32], strides = [1, 1]} : vector<8x128xf32> to vector<8x32xf32>
    %734 = vector.extract_strided_slice %730 {offsets = [0, 96], sizes = [8, 32], strides = [1, 1]} : vector<8x128xf32> to vector<8x32xf32>
    %735 = arith.mulf %732, %720 : vector<8x32xf32>
    %736 = arith.mulf %731, %733 : vector<8x32xf32>
    %737 = arith.addf %735, %736 : vector<8x32xf32>
    %738 = math.tanh %737 : vector<8x32xf32>
    %739 = arith.mulf %734, %738 : vector<8x32xf32>
    %c0_220 = arith.constant 0 : index
    %c192 = arith.constant 192 : index
    %740 = vector.load %arg25[%c0_220, %c192] : memref<8x256xf32, #tpu.memory_space<vmem>>, vector<8x32xf32>
    tpu.vector_store %arg25[%c0_220, %c192], %739 {strides = array<i32>} : memref<8x256xf32, #tpu.memory_space<vmem>>, vector<8x32xf32>,
    %c56_221 = arith.constant 56 : index
    %c0_222 = arith.constant 0 : index
    %741 = vector.load %arg22[%c56_221, %c0_222] : memref<64x128xf32, #tpu.memory_space<vmem>>, vector<8x128xf32>
    %cst_223 = arith.constant dense<0.000000e+00> : vector<8x128xf32>
    %742 = tpu.matmul %739, %619, %cst_223 {dimension_numbers = #tpu.dot_dimension_numbers<[1], [0], [0], [1], [0, 0, 1, 1], [], []>} : vector<8x32xf32>, vector<32x128xf32>, vector<8x128xf32> -> vector<8x128xf32>
    %743 = arith.addf %741, %742 : vector<8x128xf32>
    %744 = arith.mulf %743, %27 : vector<8x128xf32>
    %745 = math.tanh %744 : vector<8x128xf32>
    %746 = arith.mulf %745, %27 : vector<8x128xf32>
    %747 = arith.addf %746, %30 : vector<8x128xf32>
    %748 = vector.extract_strided_slice %747 {offsets = [0, 0], sizes = [8, 32], strides = [1, 1]} : vector<8x128xf32> to vector<8x32xf32>
    %749 = vector.extract_strided_slice %747 {offsets = [0, 32], sizes = [8, 32], strides = [1, 1]} : vector<8x128xf32> to vector<8x32xf32>
    %750 = vector.extract_strided_slice %747 {offsets = [0, 64], sizes = [8, 32], strides = [1, 1]} : vector<8x128xf32> to vector<8x32xf32>
    %751 = vector.extract_strided_slice %747 {offsets = [0, 96], sizes = [8, 32], strides = [1, 1]} : vector<8x128xf32> to vector<8x32xf32>
    %752 = arith.mulf %749, %737 : vector<8x32xf32>
    %753 = arith.mulf %748, %750 : vector<8x32xf32>
    %754 = arith.addf %752, %753 : vector<8x32xf32>
    %755 = math.tanh %754 : vector<8x32xf32>
    %756 = arith.mulf %751, %755 : vector<8x32xf32>
    %c0_224 = arith.constant 0 : index
    %c224 = arith.constant 224 : index
    %757 = vector.load %arg25[%c0_224, %c224] : memref<8x256xf32, #tpu.memory_space<vmem>>, vector<8x32xf32>
    tpu.vector_store %arg25[%c0_224, %c224], %756 {strides = array<i32>} : memref<8x256xf32, #tpu.memory_space<vmem>>, vector<8x32xf32>,
    %c0_225 = arith.constant 0 : index
    %c0_226 = arith.constant 0 : index
    %758 = vector.load %arg25[%c0_225, %c0_226] : memref<8x256xf32, #tpu.memory_space<vmem>>, vector<8x256xf32>
    %c0_227 = arith.constant 0 : index
    %c0_228 = arith.constant 0 : index
    %759 = vector.load %arg16[%c0_227, %c0_228] : memref<256x128xf32, #tpu.memory_space<vmem>>, vector<256x128xf32>
    %cst_229 = arith.constant dense<0.000000e+00> : vector<8x128xf32>
    %760 = tpu.matmul %758, %759, %cst_229 {dimension_numbers = #tpu.dot_dimension_numbers<[1], [0], [0], [1], [0, 0, 1, 1], [], []>} : vector<8x256xf32>, vector<256x128xf32>, vector<8x128xf32> -> vector<8x128xf32>
    %c0_230 = arith.constant 0 : index
    %c0_231 = arith.constant 0 : index
    %761 = vector.load %arg17[%c0_230, %c0_231] : memref<1x128xf32, #tpu.memory_space<vmem>>, vector<1x128xf32>
    %762 = vector.shape_cast %761 : vector<1x128xf32> to vector<1x128xf32>
    %763 = vector.broadcast %762 : vector<1x128xf32> to vector<8x128xf32>
    %764 = arith.addf %760, %763 : vector<8x128xf32>
    %cst_232 = arith.constant 0.000000e+00 : f32
    %765 = vector.broadcast %cst_232 : f32 to vector<8x128xf32>
    %766 = arith.maximumf %764, %765 : vector<8x128xf32>
    %c0_233 = arith.constant 0 : index
    %c0_234 = arith.constant 0 : index
    %767 = vector.load %arg18[%c0_233, %c0_234] : memref<128x128xf32, #tpu.memory_space<vmem>>, vector<128x128xf32>
    %cst_235 = arith.constant dense<0.000000e+00> : vector<8x128xf32>
    %768 = tpu.matmul %766, %767, %cst_235 {dimension_numbers = #tpu.dot_dimension_numbers<[1], [0], [0], [1], [0, 0, 1, 1], [], []>} : vector<8x128xf32>, vector<128x128xf32>, vector<8x128xf32> -> vector<8x128xf32>
    %c0_236 = arith.constant 0 : index
    %c0_237 = arith.constant 0 : index
    %769 = vector.load %arg19[%c0_236, %c0_237] : memref<1x128xf32, #tpu.memory_space<vmem>>, vector<1x128xf32>
    %770 = vector.shape_cast %769 : vector<1x128xf32> to vector<1x128xf32>
    %771 = vector.broadcast %770 : vector<1x128xf32> to vector<8x128xf32>
    %772 = arith.addf %768, %771 : vector<8x128xf32>
    %cst_238 = arith.constant dense<0xFF800000> : vector<8xf32>
    %773 = vector.multi_reduction <maximumf>, %772, %cst_238 [1] : vector<8x128xf32> to vector<8xf32>
    %774 = vector.shape_cast %773 : vector<8xf32> to vector<8x1xf32>
    %775 = vector.broadcast %774 : vector<8x1xf32> to vector<8x128xf32>
    %776 = arith.subf %772, %775 : vector<8x128xf32>
    %777 = math.exp %776 : vector<8x128xf32>
    %cst_239 = arith.constant dense<0.000000e+00> : vector<8xf32>
    %778 = vector.multi_reduction <add>, %777, %cst_239 [1] : vector<8x128xf32> to vector<8xf32>
    %779 = vector.shape_cast %778 : vector<8xf32> to vector<8x1xf32>
    %780 = math.log %779 : vector<8x1xf32>
    %781 = vector.broadcast %780 : vector<8x1xf32> to vector<8x128xf32>
    %782 = arith.subf %776, %781 : vector<8x128xf32>
    %c0_240 = arith.constant 0 : index
    %c0_241 = arith.constant 0 : index
    %783 = vector.load %arg20[%c0_240, %c0_241] : memref<8x128xf32, #tpu.memory_space<vmem>>, vector<8x128xf32>
    tpu.vector_store %arg20[%c0_240, %c0_241], %782 {strides = array<i32>} : memref<8x128xf32, #tpu.memory_space<vmem>>, vector<8x128xf32>,
    return
  }
}

</mosaic_0001>

<bundles_post_ra>
// kernel: imdb_forward.1
= control target key start
LH: loop header
LB: loop body
LE: loop exit
PB: predicated region body
PF: predicated region fallthrough
CT: control target
= control target key end

     0   :  { %s5174_s0 = inlined_call_operand.vmem [shape: s32[8,8], index: 0, kind: input, shape index: {}]   ;;  %s5175_s1 = inlined_call_operand.hbm [shape: f32[64,128], index: 1, kind: input, shape index: {}]   ;;  %s5176_s2 = inlined_call_operand.hbm [shape: f32[128,256], index: 2, kind: input, shape index: {}]   ;;  %s5177_s3 = inlined_call_operand.hbm [shape: f32[64,256], index: 3, kind: input, shape index: {}]   ;;  %s5178_s4 = inlined_call_operand.vmem [shape: f32[1,256], index: 4, kind: input, shape index: {}]   ;;  %s5179_s5 = inlined_call_operand.hbm [shape: f32[64,256], index: 5, kind: input, shape index: {}]   ;;  %s5180_s6 = inlined_call_operand.hbm [shape: f32[64,256], index: 6, kind: input, shape index: {}]   ;;  %s5181_s7 = inlined_call_operand.vmem [shape: f32[1,256], index: 7, kind: input, shape index: {}]   ;;  %s5182_s8 = inlined_call_operand.hbm [shape: f32[64,1024], index: 8, kind: input, shape index: {}]   ;;  %s5183_s9 = inlined_call_operand.vmem [shape: f32[1,1024], index: 9, kind: input, shape index: {}]   ;;  %s5184_s10 = inlined_call_operand.hbm [shape: f32[128,128], index: 10, kind: input, shape index: {}]   ;;  %s5185_s11 = inlined_call_operand.hbm [shape: f32[32,128], index: 11, kind: input, shape index: {}]   ;;  %s5186_s12 = inlined_call_operand.vmem [shape: f32[1,128], index: 12, kind: input, shape index: {}]   ;;  %s5187_s13 = inlined_call_operand.hbm [shape: f32[32,128], index: 13, kind: input, shape index: {}]   ;;  %s5188_s14 = inlined_call_operand.hbm [shape: f32[32,128], index: 14, kind: input, shape index: {}]   ;;  %s5189_s15 = inlined_call_operand.vmem [shape: f32[1,128], index: 15, kind: input, shape index: {}]   ;;  %s5190_s16 = inlined_call_operand.hbm [shape: f32[256,128], index: 16, kind: input, shape index: {}]   ;;  %s5191_s17 = inlined_call_operand.vmem [shape: f32[1,128], index: 17, kind: input, shape index: {}]   ;;  %s5192_s18 = inlined_call_operand.hbm [shape: f32[128,128], index: 18, kind: input, shape index: {}]   ;;  %s5193_s19 = inlined_call_operand.vmem [shape: f32[1,128], index: 19, kind: input, shape index: {}]   ;;  %s5194_s20 = inlined_call_operand.vmem [shape: f32[8,128], index: 20, kind: output, shape index: {}]  }
   0x1   :  { %5201 = sst [smem:[#allocation33_spill]] %s5174_s0 }
   0x2   :  { %5202 = sst [smem:[#allocation34_spill]] %s5175_s1 }
   0x3   :  { %5203 = sst [smem:[#allocation35_spill]] %s5176_s2 }
   0x4   :  { %5204 = sst [smem:[#allocation36_spill]] %s5177_s3 }
   0x5   :  { %5205 = sst [smem:[#allocation37_spill]] %s5178_s4 }
   0x6   :  { %25 = vsyncpa [#allocation8], 0 }
   0x7   :  { %26 = vsyncpa [#allocation10], 0 }
   0x8   :  { %27 = vsyncpa [#allocation13], 0 }
   0x9   :  { %28 = vsyncpa [#allocation16], 0 }
   0xa   :  { %29 = vsyncpa [#allocation19], 0 }
   0xb   :  { %30 = vsyncpa [#allocation22], 0  ;;  %s5206_s23 = sld [smem:[#allocation35_spill]] }
  0x11   :  { %s51_s24 = sshll.u32 %s5206_s23, 4  ;;  %s52_s24 = int_to_ptr.hbm [resolvable:$true] %s51_s24 }
  0x12   :  { %31 = vsyncpa [#allocation25], 0  ;;  %s3792_s2 = smov [#allocation9]   ;;  %s79_s27 = sshll.u32 %s5179_s5, 4  ;;  %s80_s27 = int_to_ptr.hbm [resolvable:$true] %s79_s27 }
  0x13   :  { %s53_s25 = sshll.u32 %s3792_s2, 4  ;;  %s3793_s28 = smov 256   ;;  %s54_s25 = int_to_ptr.vmem [resolvable:$true] %s53_s25 }
  0x14   :  { %s3794_s4 = smov 16   ;;  %s3795_s29 = smov [#allocation12]  }
  0x15   :  { %59 = dma.hbm_to_vmem [thread:$0]  %s52_s24, 4096, %s54_s25, [#allocation10], %s3793_s28, %s3793_s28, %s3794_s4  }
  0x16   :  { %s81_s30 = sshll.u32 %s3795_s29, 4  ;;  %s107_s1 = sshll.u32 %s5182_s8, 4  ;;  %s82_s30 = int_to_ptr.vmem [resolvable:$true] %s81_s30  ;;  %s108_s1 = int_to_ptr.hbm [resolvable:$true] %s107_s1 }
  0x17   :  { %87 = dma.hbm_to_vmem [thread:$0]  %s80_s27, 2048, %s82_s30, [#allocation13], %s3793_s28, %s3793_s28, %s3794_s4  }
  0x18   :  { %s3796_s5 = smov [#allocation15]   ;;  %s3797_s23 = smov 1024  }
  0x19   :  { %s109_s22 = sshll.u32 %s3796_s5, 4  ;;  %s5195_s2 = smov 64   ;;  %s110_s22 = int_to_ptr.vmem [resolvable:$true] %s109_s22 }
  0x1a   :  { %115 = dma.hbm_to_vmem [thread:$0]  %s108_s1, 8192, %s110_s22, [#allocation16], %s3797_s23, %s3797_s23, %s5195_s2  }
  0x1b   :  { %s135_s3 = sshll.u32 %s5185_s11, 4  ;;  %s3799_s26 = smov [#allocation18]   ;;  %s136_s3 = int_to_ptr.hbm [resolvable:$true] %s135_s3 }
  0x1c   :  { %s137_s8 = sshll.u32 %s3799_s26, 4  ;;  %s163_s21 = sshll.u32 %s5188_s14, 4  ;;  %s138_s8 = int_to_ptr.vmem [resolvable:$true] %s137_s8  ;;  %s164_s21 = int_to_ptr.hbm [resolvable:$true] %s163_s21 }
  0x1d   :  { %s3800_s27 = smov 128   ;;  %s3801_s30 = smov 8  }
  0x1e   :  { %143 = dma.hbm_to_vmem [thread:$0]  %s136_s3, 512, %s138_s8, [#allocation19], %s3800_s27, %s3800_s27, %s3801_s30  }
  0x1f   :  { %s5207_s22 = sld [smem:[#allocation34_spill]]  ;;  %s3802_s11 = smov [#allocation21]  }
  0x20   :  { %s165_s24 = sshll.u32 %s3802_s11, 4  ;;  %s3803_s14 = smov [#allocation7]   ;;  %s166_s24 = int_to_ptr.vmem [resolvable:$true] %s165_s24 }
  0x21   :  { %171 = dma.hbm_to_vmem [thread:$0]  %s164_s21, 512, %s166_s24, [#allocation22], %s3800_s27, %s3800_s27, %s3801_s30  }
  0x22   :  { %s40_s25 = sshll.u32 %s3803_s14, 4  ;;  %s5208_s0 = sld [smem:[#allocation36_spill]]  ;;  %s41_s25 = int_to_ptr.vmem [resolvable:$true] %s40_s25 }
  0x23   :  { %s92_s1 = sshll.u32 %s5180_s6, 4  ;;  %s3804_s5 = smov [#allocation11]   ;;  %s93_s1 = int_to_ptr.hbm [resolvable:$true] %s92_s1 }
  0x24   :  { %s3805_s21 = smov [#allocation14]   ;;  %s122_s26 = sshll.u32 %s5184_s10, 4  ;;  %s123_s26 = int_to_ptr.hbm [resolvable:$true] %s122_s26 }
  0x25   :  { %s38_s23 = sshll.u32 %s5207_s22, 4  ;;  %s66_s22 = sshll.u32 %s3804_s5, 4  ;;  %s39_s23 = int_to_ptr.hbm [resolvable:$true] %s38_s23  ;;  %s67_s22 = int_to_ptr.vmem [resolvable:$true] %s66_s22 }
  0x26   :  { %46 = dma.hbm_to_vmem [thread:$0]  %s39_s23, 1024, %s41_s25, [#allocation8], %s3800_s27, %s3800_s27, %s3801_s30  }
  0x27   :  { %s94_s11 = sshll.u32 %s3805_s21, 4  ;;  %s150_s25 = sshll.u32 %s5187_s13, 4  ;;  %s95_s11 = int_to_ptr.vmem [resolvable:$true] %s94_s11  ;;  %s151_s25 = int_to_ptr.hbm [resolvable:$true] %s150_s25 }
  0x28   :  { %s64_s2 = sshll.u32 %s5208_s0, 4  ;;  %s3806_s29 = smov [#allocation17]   ;;  %s65_s2 = int_to_ptr.hbm [resolvable:$true] %s64_s2 }
  0x29   :  { %72 = dma.hbm_to_vmem [thread:$0]  %s65_s2, 2048, %s67_s22, [#allocation10], %s3793_s28, %s3793_s28, %s3794_s4  }
  0x2a   :  { %100 = dma.hbm_to_vmem [thread:$0]  %s93_s1, 2048, %s95_s11, [#allocation13], %s3793_s28, %s3793_s28, %s3794_s4  }
  0x2b   :  { %s124_s0 = sshll.u32 %s3806_s29, 4  ;;  %s3807_s2 = smov [#allocation20]   ;;  %s125_s0 = int_to_ptr.vmem [resolvable:$true] %s124_s0 }
  0x2c   :  { %130 = dma.hbm_to_vmem [thread:$0]  %s123_s26, 2048, %s125_s0, [#allocation16], %s3800_s27, %s3800_s27, %s3801_s30  }
  0x2d   :  { %s152_s10 = sshll.u32 %s3807_s2, 4  ;;  %s178_s5 = sshll.u32 %s5190_s16, 4  ;;  %s153_s10 = int_to_ptr.vmem [resolvable:$true] %s152_s10  ;;  %s179_s5 = int_to_ptr.hbm [resolvable:$true] %s178_s5 }
  0x2e   :  { %158 = dma.hbm_to_vmem [thread:$0]  %s151_s25, 512, %s153_s10, [#allocation19], %s3800_s27, %s3800_s27, %s3801_s30  }
  0x2f   :  { %s193_s4 = sshll.u32 %s5192_s18, 4  ;;  %s3808_s1 = smov [#allocation23]   ;;  %s194_s4 = int_to_ptr.hbm [resolvable:$true] %s193_s4 }
  0x30   :  { %s180_s22 = sshll.u32 %s3808_s1, 4  ;;  %s3809_s21 = smov [#allocation24]   ;;  %s181_s22 = int_to_ptr.vmem [resolvable:$true] %s180_s22 }
  0x31   :  { %186 = dma.hbm_to_vmem [thread:$0]  %s179_s5, 4096, %s181_s22, [#allocation22], %s3800_s27, %s3800_s27, %s3801_s30  }
  0x32   :  { %s195_s16 = sshll.u32 %s3809_s21, 4  ;;  %s196_s16 = int_to_ptr.vmem [resolvable:$true] %s195_s16 }
  0x33   :  { %201 = dma.hbm_to_vmem [thread:$0]  %s194_s4, 2048, %s196_s16, [#allocation25], %s3800_s27, %s3800_s27, %s3801_s30  }
  0x34   :  { %3778 = dma.done.wait [#allocation8], 1024  }
  0x35   :  { %3779 = vsyncadd [#allocation8], 4294966272 }
  0x36   :  { %3780 = dma.done.wait [#allocation10], 6144  }
  0x37   :  { %3781 = vsyncadd [#allocation10], 4294961152 }
  0x38   :  { %3782 = dma.done.wait [#allocation13], 4096  }
  0x39   :  { %3783 = vsyncadd [#allocation13], 4294963200 }
  0x3a   :  { %3784 = dma.done.wait [#allocation16], 10240  }
  0x3b   :  { %3785 = vsyncadd [#allocation16], 4294957056 }
  0x3c   :  { %3786 = dma.done.wait [#allocation19], 1024  }
  0x3d   :  { %3787 = vsyncadd [#allocation19], 4294966272 }
  0x3e   :  { %3788 = dma.done.wait [#allocation22], 4608  }
  0x3f   :  { %3789 = vsyncadd [#allocation22], 4294962688 }
  0x40   :  { %3790 = dma.done.wait [#allocation25], 2048  }
  0x41   :  { %3791 = vsyncadd [#allocation25], 4294965248  ;;  %v3810_v0 = vmov 0   ;;  %v3811_v1 = vmov 2   ;;  %v3812_v2 = vmov 4   ;;  %s5209_s30 = sld [smem:[#allocation33_spill]]  ;;  %v252_v17 = vlaneseq }
  0x42   :  { %3313 = vset.pattern.permute.xlu0 %v3810_v0  ;;  %3315 = vset.pattern.permute.xlu1 %v3811_v1  ;;  %v331_v4 = vld [vmem:[#allocation7 + $0x38] sm:$0xff]  ;;  %v330_v5 = vld [vmem:[#allocation7 + $0x30] sm:$0xff]  ;;  %v329_v6 = vld [vmem:[#allocation7 + $0x28] sm:$0xff]  ;;  %v3813_v9 = vmov 1   ;;  %v3814_v10 = vmov 3   ;;  %v3815_v12 = vmov 5  }
  0x43   :  { %3317 = vset.pattern.permute.xlu2 %v3812_v2  ;;  %365 = vmatpush.msra.mxu0 %v331_v4  ;;  %v328_v7 = vld [vmem:[#allocation7 + $0x20] sm:$0xff]  ;;  %v327_v8 = vld [vmem:[#allocation7 + $0x18] sm:$0xff]  ;;  %v326_v11 = vld [vmem:[#allocation7 + $0x10] sm:$0xff]  ;;  %v3816_v14 = vmov 6   ;;  %v3817_v15 = vmov 7   ;;  %v4000_v18 = vand.u32 127, %v252_v17 }
  0x44   :  { %v325_v13 = vld [vmem:[#allocation7 + $0x8] sm:$0xff]  ;;  %v324_v16 = vld [vmem:[#allocation7] sm:$0xff]  ;;  %vm332_vm0 = vcmask 523264   ;;  %v5199_v20 = vmov 0.0   ;;  %v428_v29 = vld [vmem:[#allocation9 + $0xf0] sm:$0xff]  ;;  %s5210_s14 = sld [smem:[#allocation37_spill]] }
  0x45   :  { %366 = vmatpush.msra.mxu0 %v330_v5  ;;  %v429_v30 = vld [vmem:[#allocation9 + $0xf8] sm:$0xff]  ;;  %v426_v31 = vld [vmem:[#allocation9 + $0xe0] sm:$0xff]  ;;  %436 = vmatpush.msra.mxu1 %v428_v29  ;;  %v427_v32 = vld [vmem:[#allocation9 + $0xe8] sm:$0xff]  ;;  %s5215_s26 = smov 64   ;;  %vm268_vm12 = vcmp.lt.s32.totalorder %v4000_v18, 32  ;;  %vm265_vm13 = vcmp.ge.s32.totalorder %v4000_v18, 64 }
  0x46   :  { %477 = vmatpush.msra.mxu2 %v429_v30  ;;  %v424_v33 = vld [vmem:[#allocation9 + $0xd0] sm:$0xff]  ;;  %v425_v34 = vld [vmem:[#allocation9 + $0xd8] sm:$0xff]  ;;  %v422_v35 = vld [vmem:[#allocation9 + $0xc0] sm:$0xff]  ;;  %vm266_vm14 = vcmp.lt.s32.totalorder %v4000_v18, 96 }
  0x47   :  { %v275_v3 = vld [vmem:[%s5209_s30] sm:$0xff]  ;;  %367 = vmatpush.msra.mxu0 %v329_v6  ;;  %437 = vmatpush.msra.mxu1 %v426_v31  ;;  %v423_v36 = vld [vmem:[#allocation9 + $0xc8] sm:$0xff]  ;;  %v421_v39 = vld [vmem:[#allocation9 + $0xb8] sm:$0xff] }
  0x48   :  { %277 = vperm.xlu0 %3313, %v275_v3   ;;  %289 = vperm.xlu1 %3315, %v275_v3   ;;  %v420_v38 = vld [vmem:[#allocation9 + $0xb0] sm:$0xff]  ;;  %v418_v41 = vld [vmem:[#allocation9 + $0xa0] sm:$0xff]  ;;  %v419_v42 = vld [vmem:[#allocation9 + $0xa8] sm:$0xff] }
  0x49   :  { %301 = vperm.xlu2 %3317, %v275_v3   ;;  %368 = vmatpush.msra.mxu0 %v328_v7  ;;  %v416_v43 = vld [vmem:[#allocation9 + $0x90] sm:$0xff]  ;;  %v417_v44 = vld [vmem:[#allocation9 + $0x98] sm:$0xff]  ;;  %v414_v45 = vld [vmem:[#allocation9 + $0x80] sm:$0xff] }
  0x4a   :  { %478 = vmatpush.msra.mxu2 %v427_v32  ;;  %438 = vmatpush.msra.mxu1 %v424_v33  ;;  %v415_v46 = vld [vmem:[#allocation9 + $0x88] sm:$0xff]  ;;  %v412_v48 = vld [vmem:[#allocation9 + $0x70] sm:$0xff]  ;;  %v413_v49 = vld [vmem:[#allocation9 + $0x78] sm:$0xff] }
  0x4b   :  { %369 = vmatpush.msra.mxu0 %v327_v8  ;;  %v410_v51 = vld [vmem:[#allocation9 + $0x60] sm:$0xff]  ;;  %v411_v52 = vld [vmem:[#allocation9 + $0x68] sm:$0xff]  ;;  %v408_v53 = vld [vmem:[#allocation9 + $0x50] sm:$0xff] }
  0x4c   :  { %479 = vmatpush.msra.mxu2 %v425_v34  ;;  %439 = vmatpush.msra.mxu1 %v422_v35  ;;  %v409_v54 = vld [vmem:[#allocation9 + $0x58] sm:$0xff]  ;;  %v406_v55 = vld [vmem:[#allocation9 + $0x40] sm:$0xff]  ;;  %v407_v56 = vld [vmem:[#allocation9 + $0x48] sm:$0xff] }
  0x4d   :  { %370 = vmatpush.msra.mxu0 %v326_v11  ;;  %v404_v58 = vld [vmem:[#allocation9 + $0x30] sm:$0xff]  ;;  %v405_v59 = vld [vmem:[#allocation9 + $0x38] sm:$0xff]  ;;  %v402_v61 = vld [vmem:[#allocation9 + $0x20] sm:$0xff] }
  0x4e   :  { %480 = vmatpush.msra.mxu2 %v423_v36  ;;  %440 = vmatpush.msra.mxu1 %v420_v38  ;;  %v403_v62 = vld [vmem:[#allocation9 + $0x28] sm:$0xff]  ;;  %v400_v63 = vld [vmem:[#allocation9 + $0x10] sm:$0xff]  ;;  %v401_v0 = vld [vmem:[#allocation9 + $0x18] sm:$0xff] }
  0x4f   :  { %371 = vmatpush.msra.mxu0 %v325_v13  ;;  %v398_v2 = vld [vmem:[#allocation9] sm:$0xff]  ;;  %v4026_v4 = vld [vmem:[#allocation11 + $0x70] sm:$0xff]  ;;  %v4056_v13 = vld [vmem:[#allocation11 + $0x78] sm:$0xff] }
  0x50   :  { %3314 = vset.pattern.permute.xlu0 %v3813_v9  ;;  %3316 = vset.pattern.permute.xlu1 %v3814_v10  ;;  %v4031_v6 = vld [vmem:[#allocation11 + $0x60] sm:$0xff]  ;;  %v4034_v7 = vld [vmem:[#allocation11 + $0x50] sm:$0xff]  ;;  %v4075_v17 = vld [vmem:[#allocation11 + $0x58] sm:$0xff] }
  0x51   :  { %283 = vperm.xlu0 %3314, %v275_v3   ;;  %295 = vperm.xlu1 %3316, %v275_v3   ;;  %v4037_v8 = vld [vmem:[#allocation11 + $0x40] sm:$0xff]  ;;  %v4042_v9 = vld [vmem:[#allocation11 + $0x30] sm:$0xff]  ;;  %vm267_vm15 = vmand %vm265_vm13, %vm266_vm14 }
  0x52   :  { %3318 = vset.pattern.permute.xlu2 %v3815_v12  ;;  %372 = vmatpush.msra.mxu0 %v324_v16  ;;  %v4049_v10 = vld [vmem:[#allocation11 + $0x20] sm:$0xff]  ;;  %v4053_v12 = vld [vmem:[#allocation11 + $0x10] sm:$0xff] }
  0x53   :  { %307 = vperm.xlu2 %3318, %v275_v3   ;;  %481 = vmatpush.msra.mxu2 %v421_v39  ;;  %v430_v33 = vld [vmem:[%s5210_s14] sm:$0x3] }
  0x54   :  { %441 = vmatpush.msra.mxu1 %v418_v41  ;;  %579 = vmatpush.msra.mxu3 %v4026_v4  ;;  %v432_v35 = vperm.slane %v430_v33, 0  ;;  %v261_v41 = vand.u32 63, %v4000_v18 }
  0x55   :  { %482 = vmatpush.msra.mxu2 %v419_v42  ;;  %715 = vmatpush.msrb.mxu0 %v4026_v4 }
  0x56   :  { %442 = vmatpush.msra.mxu1 %v416_v43  ;;  %580 = vmatpush.msra.mxu3 %v4031_v6  ;;  %v254_v43 = vadd.s32 128, %v4000_v18  ;;  %vm4149_vm9 = vcmp.lt.s32.totalorder %v261_v41, 32 }
  0x57   :  { %483 = vmatpush.msra.mxu2 %v417_v44  ;;  %716 = vmatpush.msrb.mxu0 %v4031_v6 }
  0x58   :  { %443 = vmatpush.msra.mxu1 %v414_v45  ;;  %581 = vmatpush.msra.mxu3 %v4034_v7  ;;  %vm258_vm11 = vcmp.lt.s32.totalorder %v254_v43, 192 }
  0x59   :  { %3319 = vset.pattern.permute.xlu1 %v3816_v14  ;;  %3321 = vset.pattern.permute.xlu0 %v3817_v15  ;;  %v4059_v14 = vld [vmem:[#allocation11] sm:$0xff] }
  0x5a   :  { %313 = vperm.xlu1 %3319, %v275_v3   ;;  %484 = vmatpush.msra.mxu2 %v415_v46 }
  0x5b   :  { %3320 = vset.pattern.permute.xlu2 %v3817_v15  ;;  %444 = vmatpush.msra.mxu1 %v412_v48  ;;  %v4064_v15 = vld [vmem:[#allocation11 + $0x68] sm:$0xff] }
  0x5c   :  { %319 = vperm.xlu2 %3320, %v275_v3   ;;  %485 = vmatpush.msra.mxu2 %v413_v49  ;;  %v399_v3 = vld [vmem:[#allocation9 + $0x8] sm:$0xff] }
  0x5d   :  { %445 = vmatpush.msra.mxu1 %v410_v51  ;;  %717 = vmatpush.msrb.mxu0 %v4034_v7 }
  0x5e   :  { %486 = vmatpush.msra.mxu2 %v411_v52  ;;  %582 = vmatpush.msra.mxu3 %v4037_v8 }
  0x5f   :  { %446 = vmatpush.msra.mxu1 %v408_v53  ;;  %718 = vmatpush.msrb.mxu0 %v4037_v8 }
  0x60   :  { %487 = vmatpush.msra.mxu2 %v409_v54  ;;  %583 = vmatpush.msra.mxu3 %v4042_v9 }
  0x61   :  { %447 = vmatpush.msra.mxu1 %v406_v55  ;;  %719 = vmatpush.msrb.mxu0 %v4042_v9 }
  0x62   :  { %488 = vmatpush.msra.mxu2 %v407_v56  ;;  %584 = vmatpush.msra.mxu3 %v4049_v10 }
  0x63   :  { %448 = vmatpush.msra.mxu1 %v404_v58  ;;  %720 = vmatpush.msrb.mxu0 %v4049_v10 }
  0x64   :  { %489 = vmatpush.msra.mxu2 %v405_v59  ;;  %585 = vmatpush.msra.mxu3 %v4053_v12 }
  0x65   :  { %449 = vmatpush.msra.mxu1 %v402_v61  ;;  %721 = vmatpush.msrb.mxu0 %v4053_v12 }
  0x66   :  { %490 = vmatpush.msra.mxu2 %v403_v62  ;;  %586 = vmatpush.msra.mxu3 %v4059_v14 }
  0x67   :  { %450 = vmatpush.msra.mxu1 %v400_v63  ;;  %722 = vmatpush.msrb.mxu0 %v4059_v14 }
  0x68   :  { %491 = vmatpush.msra.mxu2 %v401_v0  ;;  %599 = vmatpush.msrb.mxu3 %v4056_v13 }
  0x69   :  { %451 = vmatpush.msra.mxu1 %v398_v2  ;;  %587 = vmatmul.f32.vlgmr.msra.gmra.mxu3 %v5199_v20 }
  0x6a   :  { %492 = vmatpush.msra.mxu2 %v399_v3  ;;  %600 = vmatpush.msrb.mxu3 %v4064_v15 }
  0x6b   :  { %803 = vmatpush.msrb.mxu1 %v4056_v13 }
  0x6c   :  { %851 = vmatpush.msrb.mxu2 %v4026_v4  ;;  %601 = vmatpush.msrb.mxu3 %v4075_v17 }
  0x6d   :  { %804 = vmatpush.msrb.mxu1 %v4064_v15 }
  0x6e   :  { %852 = vmatpush.msrb.mxu2 %v4031_v6 }
  0x6f   :  { %805 = vmatpush.msrb.mxu1 %v4075_v17 }
  0x70   :  { %853 = vmatpush.msrb.mxu2 %v4034_v7 }
  0x72   :  { %854 = vmatpush.msrb.mxu2 %v4037_v8 }
  0x74   :  { %855 = vmatpush.msrb.mxu2 %v4042_v9 }
  0x76   :  { %856 = vmatpush.msrb.mxu2 %v4049_v10 }
  0x78   :  { %857 = vmatpush.msrb.mxu2 %v4053_v12 }
  0x7a   :  { %858 = vmatpush.msrb.mxu2 %v4059_v14 }
  0xa3   :  { %v302_v28 = vpop.permute.xlu2 %301 }
  0xa4   :  { %vm303_vm5 = vcmp.eq.s32.totalorder %v302_v28, %v4000_v18 }
  0xa5   :  { %v3197_v37 = vsel %vm303_vm5, 1.0, %v5199_v20 }
  0xad   :  { %v308_v40 = vpop.permute.xlu2 %307 }
  0xae   :  { %vm309_vm6 = vcmp.eq.s32.totalorder %v308_v40, %v4000_v18 }
  0xaf   :  { %v3198_v47 = vsel %vm309_vm6, 1.0, %v5199_v20 }
  0xb6   :  { %v320_v60 = vpop.permute.xlu2 %319 }
  0xb7   :  { %vm321_vm8 = vcmp.eq.s32.totalorder %v320_v60, %v4000_v18 }
  0xb8   :  { %v3200_v1 = vsel %vm321_vm8, 1.0, %v5199_v20 }
  0xba   :  { %v278_v19 = vpop.permute.xlu0 %277  ;;  %v290_v23 = vpop.permute.xlu1 %289 }
  0xbb   :  { %vm279_vm1 = vcmp.eq.s32.totalorder %v278_v19, %v4000_v18  ;;  %vm291_vm3 = vcmp.eq.s32.totalorder %v290_v23, %v4000_v18  ;;  %v4079_v19 = vld [vmem:[#allocation11 + $0x48] sm:$0xff] }
  0xbc   :  { %v3193_v21 = vsel %vm279_vm1, 1.0, %v5199_v20  ;;  %v3195_v25 = vsel %vm291_vm3, 1.0, %v5199_v20  ;;  %806 = vmatpush.msrb.mxu1 %v4079_v19  ;;  %602 = vmatpush.msrb.mxu3 %v4079_v19  ;;  %vm2745_vm1 = vcmask 523520   ;;  %vm2847_vm3 = vcmask 1048320  }
  0xbd   :  { %3201 = vmatmul.msk.f32.vlgmr.msra.gmra.mxu0 %vm332_vm0, %v3193_v21  ;;  %v4085_v21 = vld [vmem:[#allocation11 + $0x38] sm:$0xff] }
  0xbe   :  { %783 = vmatpush.msra.mxu0 %v4026_v4  ;;  %807 = vmatpush.msrb.mxu1 %v4085_v21 }
  0xbf   :  { %603 = vmatpush.msrb.mxu3 %v4085_v21 }
  0xc0   :  { %784 = vmatpush.msra.mxu0 %v4031_v6 }
  0xc2   :  { %785 = vmatpush.msra.mxu0 %v4034_v7 }
  0xc3   :  { %v284_v22 = vpop.permute.xlu0 %283  ;;  %v296_v26 = vpop.permute.xlu1 %295 }
  0xc4   :  { %vm285_vm2 = vcmp.eq.s32.totalorder %v284_v22, %v4000_v18  ;;  %vm297_vm4 = vcmp.eq.s32.totalorder %v296_v26, %v4000_v18  ;;  %v4091_v22 = vld [vmem:[#allocation11 + $0x28] sm:$0xff]  ;;  %786 = vmatpush.msra.mxu0 %v4037_v8 }
  0xc5   :  { %v3194_v24 = vsel %vm285_vm2, 1.0, %v5199_v20  ;;  %v3196_v27 = vsel %vm297_vm4, 1.0, %v5199_v20  ;;  %808 = vmatpush.msrb.mxu1 %v4091_v22  ;;  %604 = vmatpush.msrb.mxu3 %v4091_v22  ;;  %vm2798_vm2 = vcmask 785920  }
  0xc6   :  { %3202 = vmatmul.msk.f32.gmra.mxu0 %vm332_vm0, %v3194_v24  ;;  %v4097_v24 = vld [vmem:[#allocation11 + $0x18] sm:$0xff] }
  0xc7   :  { %809 = vmatpush.msrb.mxu1 %v4097_v24  ;;  %787 = vmatpush.msra.mxu0 %v4042_v9 }
  0xc8   :  { %605 = vmatpush.msrb.mxu3 %v4097_v24 }
  0xc9   :  { %788 = vmatpush.msra.mxu0 %v4049_v10 }
  0xcb   :  { %789 = vmatpush.msra.mxu0 %v4053_v12 }
  0xcc   :  { %v314_v50 = vpop.permute.xlu1 %313 }
  0xcd   :  { %vm315_vm7 = vcmp.eq.s32.totalorder %v314_v50, %v4000_v18  ;;  %790 = vmatpush.msra.mxu0 %v4059_v14  ;;  %v433_v50 = vperm.slane %v430_v33, 1 }
  0xce   :  { %3203 = vmatmul.msk.f32.gmra.mxu0 %vm332_vm0, %v3195_v25  ;;  %v3199_v57 = vsel %vm315_vm7, 1.0, %v5199_v20  ;;  %v4101_v25 = vld [vmem:[#allocation11 + $0x8] sm:$0xff] }
  0xcf   :  { %810 = vmatpush.msrb.mxu1 %v4101_v25  ;;  %606 = vmatpush.msrb.mxu3 %v4101_v25 }
  0xd0   :  { %607 = vmatmul.f32.vlgmr.msrb.gmra.mxu3 %v5199_v20 }
  0xd1   :  { %647 = vmatpush.msra.mxu3 %v4026_v4 }
  0xd3   :  { %648 = vmatpush.msra.mxu3 %v4031_v6 }
  0xd5   :  { %649 = vmatpush.msra.mxu3 %v4034_v7 }
  0xd6   :  { %3204 = vmatmul.msk.f32.gmra.mxu0 %vm332_vm0, %v3196_v27 }
  0xd7   :  { %650 = vmatpush.msra.mxu3 %v4037_v8 }
  0xd9   :  { %651 = vmatpush.msra.mxu3 %v4042_v9 }
  0xdb   :  { %652 = vmatpush.msra.mxu3 %v4049_v10 }
  0xdd   :  { %653 = vmatpush.msra.mxu3 %v4053_v12 }
  0xde   :  { %3205 = vmatmul.msk.f32.gmra.mxu0 %vm332_vm0, %v3197_v37 }
  0xdf   :  { %654 = vmatpush.msra.mxu3 %v4059_v14 }
  0xe1   :  { %667 = vmatpush.msrb.mxu3 %v4056_v13 }
  0xe3   :  { %668 = vmatpush.msrb.mxu3 %v4064_v15 }
  0xe5   :  { %669 = vmatpush.msrb.mxu3 %v4075_v17 }
  0xe6   :  { %3206 = vmatmul.msk.f32.gmra.mxu0 %vm332_vm0, %v3198_v47  ;;  %v262_v47 = vand.u32 63, %v254_v43 }
  0xe7   :  { %670 = vmatpush.msrb.mxu3 %v4079_v19 }
  0xe8   :  { %vm4163_vm10 = vcmp.lt.s32.totalorder %v262_v47, 32 }
  0xe9   :  { %671 = vmatpush.msrb.mxu3 %v4085_v21 }
  0xeb   :  { %672 = vmatpush.msrb.mxu3 %v4091_v22 }
  0xed   :  { %673 = vmatpush.msrb.mxu3 %v4097_v24 }
  0xee   :  { %3207 = vmatmul.msk.f32.gmra.mxu0 %vm332_vm0, %v3199_v57 }
  0xef   :  { %674 = vmatpush.msrb.mxu3 %v4101_v25 }
  0xf6   :  { %3208 = vmatmul.msk.f32.gmra.mxu0 %vm332_vm0, %v3200_v1 }
 0x13a   :  { %v374_v5 = vpop.f32.mrf.mxu0 }
 0x13b   :  { %452 = vmatmul.f32.vlgmr.msra.gmra.mxu1 %v374_v5  ;;  %493 = vmatmul.f32.vlgmr.msra.gmra.mxu2 %v374_v5 }
 0x13c   :  { %987 = vmatpush.msra.mxu2 %v4026_v4  ;;  %939 = vmatpush.msra.mxu1 %v4056_v13 }
 0x13e   :  { %988 = vmatpush.msra.mxu2 %v4031_v6  ;;  %940 = vmatpush.msra.mxu1 %v4064_v15 }
 0x140   :  { %989 = vmatpush.msra.mxu2 %v4034_v7  ;;  %941 = vmatpush.msra.mxu1 %v4075_v17 }
 0x142   :  { %990 = vmatpush.msra.mxu2 %v4037_v8  ;;  %942 = vmatpush.msra.mxu1 %v4079_v19 }
 0x143   :  { %v377_v11 = vpop.f32.mrf.mxu0 }
 0x144   :  { %455 = vmatmul.f32.gmra.mxu1 %v377_v11  ;;  %496 = vmatmul.f32.gmra.mxu2 %v377_v11  ;;  %v588_v11 = vpop.f32.mrf.mxu3 }
 0x145   :  { %991 = vmatpush.msra.mxu2 %v4042_v9  ;;  %943 = vmatpush.msra.mxu1 %v4085_v21 }
 0x147   :  { %992 = vmatpush.msra.mxu2 %v4049_v10  ;;  %944 = vmatpush.msra.mxu1 %v4091_v22 }
 0x149   :  { %993 = vmatpush.msra.mxu2 %v4053_v12  ;;  %945 = vmatpush.msra.mxu1 %v4097_v24 }
 0x14b   :  { %v380_v16 = vpop.f32.mrf.mxu0  ;;  %994 = vmatpush.msra.mxu2 %v4059_v14  ;;  %946 = vmatpush.msra.mxu1 %v4101_v25 }
 0x14c   :  { %458 = vmatmul.f32.gmra.mxu1 %v380_v16  ;;  %499 = vmatmul.f32.gmra.mxu2 %v380_v16 }
 0x153   :  { %v383_v23 = vpop.f32.mrf.mxu0  ;;  %v608_v41 = vpop.f32.mrf.mxu3 }
 0x154   :  { %461 = vmatmul.f32.gmra.mxu1 %v383_v23  ;;  %502 = vmatmul.f32.gmra.mxu2 %v383_v23 }
 0x15b   :  { %v386_v26 = vpop.f32.mrf.mxu0 }
 0x15c   :  { %464 = vmatmul.f32.gmra.mxu1 %v386_v26  ;;  %505 = vmatmul.f32.gmra.mxu2 %v386_v26 }
 0x163   :  { %v389_v27 = vpop.f32.mrf.mxu0 }
 0x164   :  { %467 = vmatmul.f32.gmra.mxu1 %v389_v27  ;;  %508 = vmatmul.f32.gmra.mxu2 %v389_v27 }
 0x16b   :  { %v392_v28 = vpop.f32.mrf.mxu0 }
 0x16c   :  { %470 = vmatmul.f32.gmra.mxu1 %v392_v28  ;;  %511 = vmatmul.f32.gmra.mxu2 %v392_v28 }
 0x173   :  { %v395_v29 = vpop.f32.mrf.mxu0 }
 0x174   :  { %473 = vmatmul.f32.gmra.mxu1 %v395_v29  ;;  %514 = vmatmul.f32.gmra.mxu2 %v395_v29 }
 0x1b8   :  { %v453_v30 = vpop.f32.mrf.mxu1 }
 0x1b9   :  { %v4209_v28 = vadd.f32 %v453_v30, %v432_v35 }
 0x1be   :  { %v494_v31 = vpop.f32.mrf.mxu2 }
 0x1c1   :  { %v456_v32 = vpop.f32.mrf.mxu1 }
 0x1c2   :  { %v4189_v0 = vadd.f32 %v456_v32, %v432_v35 }
 0x1c7   :  { %v497_v34 = vpop.f32.mrf.mxu2 }
 0x1c8   :  { %v4205_v23 = vadd.f32 %v497_v34, %v433_v50 }
 0x1c9   :  { %v459_v36 = vpop.f32.mrf.mxu1 }
 0x1ca   :  { %v4143_v37 = vadd.f32 %v459_v36, %v432_v35 }
 0x1cf   :  { %v500_v38 = vpop.f32.mrf.mxu2 }
 0x1d0   :  { %v4185_v61 = vadd.f32 %v500_v38, %v433_v50 }
 0x1d1   :  { %v462_v39 = vpop.f32.mrf.mxu1 }
 0x1d2   :  { %v4145_v40 = vadd.f32 %v462_v39, %v432_v35 }
 0x1d7   :  { %v503_v42 = vpop.f32.mrf.mxu2 }
 0x1d8   :  { %v4167_v53 = vadd.f32 %v503_v42, %v433_v50  ;;  %v5197_v42 = vmov 0.5  }
 0x1d9   :  { %v465_v44 = vpop.f32.mrf.mxu1 }
 0x1da   :  { %v4153_v46 = vadd.f32 %v465_v44, %v432_v35  ;;  %v4230_v44 = vsel %vm258_vm11, 1.0, %v5197_v42 }
 0x1dc   :  { %v530_v48 = vsel %vm4149_vm9, %v4145_v40, %v4153_v46  ;;  %v534_v49 = vsel %vm4149_vm9, %v4153_v46, %v4145_v40 }
 0x1df   :  { %v506_v51 = vpop.f32.mrf.mxu2 }
 0x1e0   :  { %v4169_v54 = vadd.f32 %v506_v51, %v433_v50 }
 0x1e1   :  { %v468_v55 = vpop.f32.mrf.mxu1 }
 0x1e2   :  { %v4171_v56 = vadd.f32 %v468_v55, %v432_v35  ;;  %v535_v57 = vsel %vm4163_vm10, %v4169_v54, %v4167_v53 }
 0x1e4   :  { %v526_v58 = vsel %vm4149_vm9, %v4143_v37, %v4171_v56  ;;  %v538_v59 = vsel %vm4149_vm9, %v4171_v56, %v4143_v37 }
 0x1e7   :  { %v509_v60 = vpop.f32.mrf.mxu2 }
 0x1e8   :  { %v4187_v62 = vadd.f32 %v509_v60, %v433_v50 }
 0x1e9   :  { %v471_v63 = vpop.f32.mrf.mxu1 }
 0x1ea   :  { %v4191_v1 = vadd.f32 %v471_v63, %v432_v35  ;;  %v539_v2 = vsel %vm4163_vm10, %v4187_v62, %v4185_v61  ;;  %v4242_v63 = vsel %vm258_vm11, 0.0, %v5197_v42 }
 0x1ec   :  { %v522_v3 = vsel %vm4149_vm9, %v4189_v0, %v4191_v1  ;;  %v542_v5 = vsel %vm4149_vm9, %v4191_v1, %v4189_v0 }
 0x1ef   :  { %v512_v16 = vpop.f32.mrf.mxu2 }
 0x1f0   :  { %v4207_v26 = vadd.f32 %v512_v16, %v433_v50 }
 0x1f1   :  { %v474_v27 = vpop.f32.mrf.mxu1 }
 0x1f2   :  { %v4211_v29 = vadd.f32 %v474_v27, %v432_v35  ;;  %v543_v32 = vsel %vm4163_vm10, %v4207_v26, %v4205_v23  ;;  %v4225_v35 = vadd.f32 %v494_v31, %v433_v50 }
 0x1f4   :  { %v518_v33 = vsel %vm4149_vm9, %v4209_v28, %v4211_v29  ;;  %v546_v34 = vsel %vm4149_vm9, %v4211_v29, %v4209_v28 }
 0x1f5   :  { %v611_v36 = vadd.f32 %v588_v11, %v518_v33 }
 0x1f7   :  { %v613_v30 = vmul.f32 0.5, %v611_v36  ;;  %v515_v38 = vpop.f32.mrf.mxu2 }
 0x1f8   :  { %v4227_v39 = vadd.f32 %v515_v38, %v433_v50 }
 0x1f9   :  { %3326 = vtanh.f32 %v613_v30 }
 0x1fa   :  { %v519_v47 = vsel %vm4163_vm10, %v4225_v35, %v4227_v39  ;;  %v547_v51 = vsel %vm4163_vm10, %v4227_v39, %v4225_v35  ;;  %v1139_v35 = vld [vmem:[#allocation12 + $0x60] sm:$0xff]  ;;  %v1140_v39 = vld [vmem:[#allocation12 + $0x68] sm:$0xff] }
 0x1fb   :  { %v612_v31 = vadd.f32 %v608_v41, %v519_v47 }
 0x1fd   :  { %v614_v43 = vmul.f32 %v612_v31, %v4230_v44 }
 0x1ff   :  { %3328 = vtanh.f32 %v614_v43  ;;  %v3327_v50 = vpop.eup %3326 }
 0x200   :  { %v617_v55 = vmul.f32 0.5, %v3327_v50 }
 0x202   :  { %v619_v16 = vadd.f32 0.5, %v617_v55 }
 0x204   :  { %v621_v36 = vmul.f32 0.0, %v619_v16 }
 0x205   :  { %v3329_v60 = vpop.eup %3328 }
 0x206   :  { %v618_v11 = vmul.f32 %v3329_v60, %v4230_v44  ;;  %v523_v60 = vsel %vm4163_vm10, %v4205_v23, %v4207_v26 }
 0x208   :  { %v620_v27 = vadd.f32 %v618_v11, %v4242_v63 }
 0x20a   :  { %v622_v33 = vmul.f32 %v620_v27, %v619_v16 }
 0x20c   :  { %624 = vrot.lane.b32.xlu0 %v622_v33, %s5215_s26 }
 0x27e   :  { %v625_v30 = vpop.permute.xlu0 %624 }
 0x27f   :  { %v627_v38 = vadd.f32 %v625_v30, %v621_v36 }
 0x281   :  { %3330 = vtanh.f32 %v627_v38 }
 0x287   :  { %v3331_v41 = vpop.eup %3330 }
 0x288   :  { %v629_v47 = vmul.f32 %v3331_v41, %v620_v27 }
 0x28a   :  { %631 = vrot.lane.b32.xlu1 %v629_v47, %s5215_s26 }
 0x2fc   :  { %v632_v31 = vpop.permute.xlu1 %631 }
 0x2fd   :  { %634 = vst.msk [vmem:[#allocation4] sm:$0xff] %vm332_vm0, %v632_v31  ;;  %3209 = vmatmul.msk.f32.vlgmr.msra.gmra.mxu3 %vm332_vm0, %v632_v31 }
 0x2fe   :  { %735 = vmatpush.msra.mxu3 %v4056_v13 }
 0x300   :  { %736 = vmatpush.msra.mxu3 %v4064_v15 }
 0x302   :  { %737 = vmatpush.msra.mxu3 %v4075_v17 }
 0x304   :  { %738 = vmatpush.msra.mxu3 %v4079_v19 }
 0x305   :  { %3210 = vmatmul.msk.f32.vlgmr.msrb.gmra.mxu3 %vm332_vm0, %v632_v31 }
 0x306   :  { %739 = vmatpush.msra.mxu3 %v4085_v21 }
 0x308   :  { %740 = vmatpush.msra.mxu3 %v4091_v22 }
 0x30a   :  { %741 = vmatpush.msra.mxu3 %v4097_v24 }
 0x30c   :  { %742 = vmatpush.msra.mxu3 %v4101_v25 }
 0x30e   :  { %871 = vmatpush.msrb.mxu3 %v4056_v13 }
 0x310   :  { %872 = vmatpush.msrb.mxu3 %v4064_v15 }
 0x312   :  { %873 = vmatpush.msrb.mxu3 %v4075_v17 }
 0x314   :  { %874 = vmatpush.msrb.mxu3 %v4079_v19 }
 0x316   :  { %875 = vmatpush.msrb.mxu3 %v4085_v21 }
 0x318   :  { %876 = vmatpush.msrb.mxu3 %v4091_v22 }
 0x31a   :  { %877 = vmatpush.msrb.mxu3 %v4097_v24 }
 0x31c   :  { %878 = vmatpush.msrb.mxu3 %v4101_v25 }
 0x380   :  { %v656_v43 = vpop.f32.mrf.mxu3 }
 0x381   :  { %v679_v50 = vadd.f32 %v656_v43, %v522_v3 }
 0x383   :  { %v681_v55 = vmul.f32 0.5, %v679_v50 }
 0x385   :  { %3332 = vtanh.f32 %v681_v55 }
 0x388   :  { %v676_v11 = vpop.f32.mrf.mxu3 }
 0x389   :  { %v680_v16 = vadd.f32 %v676_v11, %v523_v60 }
 0x38b   :  { %v682_v27 = vmul.f32 %v680_v16, %v4230_v44  ;;  %v3333_v33 = vpop.eup %3332 }
 0x38c   :  { %v685_v36 = vmul.f32 0.5, %v3333_v33  ;;  %v527_v33 = vsel %vm4163_vm10, %v4185_v61, %v4187_v62 }
 0x38d   :  { %3334 = vtanh.f32 %v682_v27 }
 0x38e   :  { %v687_v47 = vadd.f32 0.5, %v685_v36 }
 0x390   :  { %v689_v43 = vmul.f32 %v687_v47, %v627_v38 }
 0x393   :  { %v3335_v30 = vpop.eup %3334 }
 0x394   :  { %v686_v41 = vmul.f32 %v3335_v30, %v4230_v44 }
 0x396   :  { %v688_v3 = vadd.f32 %v686_v41, %v4242_v63 }
 0x398   :  { %v690_v31 = vmul.f32 %v688_v3, %v687_v47 }
 0x39a   :  { %692 = vrot.lane.b32.xlu2 %v690_v31, %s5215_s26 }
 0x3f4   :  { %v693_v50 = vpop.permute.xlu2 %692 }
 0x3f5   :  { %v695_v42 = vadd.f32 %v693_v50, %v689_v43 }
 0x3f7   :  { %3336 = vtanh.f32 %v695_v42 }
 0x3fd   :  { %v3337_v55 = vpop.eup %3336 }
 0x3fe   :  { %v697_v60 = vmul.f32 %v3337_v55, %v688_v3 }
 0x400   :  { %699 = vrot.lane.b32.xlu0 %v697_v60, %s5215_s26 }
 0x472   :  { %v700_v11 = vpop.permute.xlu0 %699 }
 0x473   :  { %702 = vst.msk [vmem:[#allocation4 + $0x8] sm:$0xff] %vm332_vm0, %v700_v11  ;;  %3211 = vmatmul.msk.f32.vlgmr.msrb.gmra.mxu0 %vm332_vm0, %v700_v11  ;;  %3212 = vmatmul.msk.f32.vlgmr.msra.gmra.mxu3 %vm332_vm0, %v700_v11 }
 0x474   :  { %919 = vmatpush.msrb.mxu0 %v4026_v4  ;;  %1007 = vmatpush.msra.mxu3 %v4056_v13 }
 0x476   :  { %920 = vmatpush.msrb.mxu0 %v4031_v6  ;;  %1008 = vmatpush.msra.mxu3 %v4064_v15 }
 0x478   :  { %921 = vmatpush.msrb.mxu0 %v4034_v7  ;;  %1009 = vmatpush.msra.mxu3 %v4075_v17 }
 0x47a   :  { %922 = vmatpush.msrb.mxu0 %v4037_v8  ;;  %1010 = vmatpush.msra.mxu3 %v4079_v19 }
 0x47c   :  { %923 = vmatpush.msrb.mxu0 %v4042_v9  ;;  %1011 = vmatpush.msra.mxu3 %v4085_v21 }
 0x47e   :  { %924 = vmatpush.msrb.mxu0 %v4049_v10  ;;  %1012 = vmatpush.msra.mxu3 %v4091_v22 }
 0x480   :  { %925 = vmatpush.msrb.mxu0 %v4053_v12  ;;  %1013 = vmatpush.msra.mxu3 %v4097_v24 }
 0x482   :  { %926 = vmatpush.msrb.mxu0 %v4059_v14  ;;  %1014 = vmatpush.msra.mxu3 %v4101_v25 }
 0x4f0   :  { %v724_v38 = vpop.f32.mrf.mxu0 }
 0x4f1   :  { %v747_v16 = vadd.f32 %v724_v38, %v526_v58 }
 0x4f3   :  { %v749_v27 = vmul.f32 0.5, %v747_v16 }
 0x4f5   :  { %3338 = vtanh.f32 %v749_v27 }
 0x4f6   :  { %v744_v36 = vpop.f32.mrf.mxu3 }
 0x4f7   :  { %v748_v30 = vadd.f32 %v744_v36, %v527_v33 }
 0x4f9   :  { %v750_v41 = vmul.f32 %v748_v30, %v4230_v44 }
 0x4fb   :  { %3340 = vtanh.f32 %v750_v41  ;;  %v3339_v47 = vpop.eup %3338 }
 0x4fc   :  { %v753_v3 = vmul.f32 0.5, %v3339_v47 }
 0x4fe   :  { %v755_v50 = vadd.f32 0.5, %v753_v3 }
 0x500   :  { %v757_v60 = vmul.f32 %v755_v50, %v695_v42 }
 0x501   :  { %v3341_v31 = vpop.eup %3340 }
 0x502   :  { %v754_v43 = vmul.f32 %v3341_v31, %v4230_v44 }
 0x504   :  { %v756_v58 = vadd.f32 %v754_v43, %v4242_v63 }
 0x506   :  { %v758_v55 = vmul.f32 %v756_v58, %v755_v50 }
 0x508   :  { %760 = vrot.lane.b32.xlu1 %v758_v55, %s5215_s26 }
 0x57a   :  { %v761_v11 = vpop.permute.xlu1 %760 }
 0x57b   :  { %v763_v38 = vadd.f32 %v761_v11, %v757_v60 }
 0x57d   :  { %3342 = vtanh.f32 %v763_v38 }
 0x583   :  { %v3343_v16 = vpop.eup %3342 }
 0x584   :  { %v765_v27 = vmul.f32 %v3343_v16, %v756_v58 }
 0x586   :  { %767 = vrot.lane.b32.xlu2 %v765_v27, %s5215_s26 }
 0x5e0   :  { %v768_v33 = vpop.permute.xlu2 %767 }
 0x5e1   :  { %770 = vst.msk [vmem:[#allocation4 + $0x10] sm:$0xff] %vm332_vm0, %v768_v33  ;;  %3213 = vmatmul.msk.f32.vlgmr.msra.gmra.mxu0 %vm332_vm0, %v768_v33  ;;  %3214 = vmatmul.msk.f32.vlgmr.msrb.gmra.mxu1 %vm332_vm0, %v768_v33 }
 0x5e2   :  { %1055 = vmatpush.msra.mxu0 %v4026_v4  ;;  %1075 = vmatpush.msrb.mxu1 %v4056_v13 }
 0x5e4   :  { %1056 = vmatpush.msra.mxu0 %v4031_v6  ;;  %1076 = vmatpush.msrb.mxu1 %v4064_v15  ;;  %v531_v6 = vsel %vm4163_vm10, %v4167_v53, %v4169_v54 }
 0x5e6   :  { %1057 = vmatpush.msra.mxu0 %v4034_v7  ;;  %1077 = vmatpush.msrb.mxu1 %v4075_v17 }
 0x5e8   :  { %1058 = vmatpush.msra.mxu0 %v4037_v8  ;;  %1078 = vmatpush.msrb.mxu1 %v4079_v19 }
 0x5ea   :  { %1059 = vmatpush.msra.mxu0 %v4042_v9  ;;  %1079 = vmatpush.msrb.mxu1 %v4085_v21 }
 0x5ec   :  { %1060 = vmatpush.msra.mxu0 %v4049_v10  ;;  %1080 = vmatpush.msrb.mxu1 %v4091_v22 }
 0x5ee   :  { %1061 = vmatpush.msra.mxu0 %v4053_v12  ;;  %1081 = vmatpush.msrb.mxu1 %v4097_v24 }
 0x5f0   :  { %1062 = vmatpush.msra.mxu0 %v4059_v14  ;;  %1082 = vmatpush.msrb.mxu1 %v4101_v25 }
 0x65e   :  { %v792_v4 = vpop.f32.mrf.mxu0  ;;  %v812_v7 = vpop.f32.mrf.mxu1 }
 0x65f   :  { %v815_v8 = vadd.f32 %v792_v4, %v530_v48  ;;  %v816_v9 = vadd.f32 %v812_v7, %v531_v6 }
 0x661   :  { %v817_v10 = vmul.f32 0.5, %v815_v8  ;;  %v818_v12 = vmul.f32 %v816_v9, %v4230_v44 }
 0x663   :  { %3344 = vtanh.f32 %v817_v10 }
 0x664   :  { %3346 = vtanh.f32 %v818_v12 }
 0x669   :  { %v3345_v13 = vpop.eup %3344 }
 0x66a   :  { %v3347_v14 = vpop.eup %3346  ;;  %v821_v15 = vmul.f32 0.5, %v3345_v13 }
 0x66b   :  { %v822_v17 = vmul.f32 %v3347_v14, %v4230_v44 }
 0x66c   :  { %v823_v19 = vadd.f32 0.5, %v821_v15 }
 0x66d   :  { %v824_v21 = vadd.f32 %v822_v17, %v4242_v63 }
 0x66e   :  { %v825_v24 = vmul.f32 %v823_v19, %v763_v38 }
 0x66f   :  { %v826_v22 = vmul.f32 %v824_v21, %v823_v19 }
 0x671   :  { %828 = vrot.lane.b32.xlu0 %v826_v22, %s5215_s26 }
 0x6e3   :  { %v829_v25 = vpop.permute.xlu0 %828 }
 0x6e4   :  { %v831_v48 = vadd.f32 %v829_v25, %v825_v24 }
 0x6e6   :  { %3348 = vtanh.f32 %v831_v48 }
 0x6ec   :  { %v3349_v42 = vpop.eup %3348 }
 0x6ed   :  { %v833_v36 = vmul.f32 %v3349_v42, %v824_v21 }
 0x6ef   :  { %835 = vrot.lane.b32.xlu1 %v833_v36, %s5215_s26 }
 0x761   :  { %v836_v30 = vpop.permute.xlu1 %835 }
 0x762   :  { %838 = vst.msk [vmem:[#allocation4 + $0x18] sm:$0xff] %vm332_vm0, %v836_v30  ;;  %3215 = vmatmul.msk.f32.vlgmr.msrb.gmra.mxu2 %vm332_vm0, %v836_v30  ;;  %3216 = vmatmul.msk.f32.vlgmr.msrb.gmra.mxu3 %vm332_vm0, %v836_v30 }
 0x7e5   :  { %v860_v41 = vpop.f32.mrf.mxu2  ;;  %v880_v47 = vpop.f32.mrf.mxu3 }
 0x7e6   :  { %v883_v3 = vadd.f32 %v860_v41, %v534_v49  ;;  %v884_v31 = vadd.f32 %v880_v47, %v535_v57 }
 0x7e8   :  { %v885_v43 = vmul.f32 0.5, %v883_v3  ;;  %v886_v50 = vmul.f32 %v884_v31, %v4230_v44 }
 0x7ea   :  { %3350 = vtanh.f32 %v885_v43 }
 0x7eb   :  { %3352 = vtanh.f32 %v886_v50 }
 0x7f0   :  { %v3351_v58 = vpop.eup %3350 }
 0x7f1   :  { %v3353_v55 = vpop.eup %3352  ;;  %v889_v60 = vmul.f32 0.5, %v3351_v58 }
 0x7f2   :  { %v890_v11 = vmul.f32 %v3353_v55, %v4230_v44 }
 0x7f3   :  { %v891_v38 = vadd.f32 0.5, %v889_v60 }
 0x7f4   :  { %v892_v40 = vadd.f32 %v890_v11, %v4242_v63 }
 0x7f5   :  { %v893_v49 = vmul.f32 %v891_v38, %v831_v48 }
 0x7f6   :  { %v894_v46 = vmul.f32 %v892_v40, %v891_v38 }
 0x7f8   :  { %896 = vrot.lane.b32.xlu2 %v894_v46, %s5215_s26 }
 0x852   :  { %v897_v16 = vpop.permute.xlu2 %896 }
 0x853   :  { %v899_v53 = vadd.f32 %v897_v16, %v893_v49 }
 0x855   :  { %3354 = vtanh.f32 %v899_v53 }
 0x85b   :  { %v3355_v54 = vpop.eup %3354 }
 0x85c   :  { %v901_v57 = vmul.f32 %v3355_v54, %v892_v40  ;;  %v1142_v54 = vld [vmem:[#allocation12 + $0x78] sm:$0xff] }
 0x85d   :  { %1222 = vmatpush.msrb.mxu3 %v1142_v54 }
 0x85e   :  { %903 = vrot.lane.b32.xlu0 %v901_v57, %s5215_s26  ;;  %v1138_v57 = vld [vmem:[#allocation12 + $0x58] sm:$0xff] }
 0x85f   :  { %1223 = vmatpush.msrb.mxu3 %v1140_v39 }
 0x861   :  { %1224 = vmatpush.msrb.mxu3 %v1138_v57 }
 0x8d0   :  { %v904_v27 = vpop.permute.xlu0 %903 }
 0x8d1   :  { %906 = vst.msk [vmem:[#allocation4 + $0x20] sm:$0xff] %vm332_vm0, %v904_v27  ;;  %3217 = vmatmul.msk.f32.vlgmr.msrb.gmra.mxu0 %vm332_vm0, %v904_v27  ;;  %3218 = vmatmul.msk.f32.vlgmr.msra.gmra.mxu1 %vm332_vm0, %v904_v27 }
 0x94e   :  { %v928_v33 = vpop.f32.mrf.mxu0  ;;  %v948_v4 = vpop.f32.mrf.mxu1 }
 0x94f   :  { %v951_v6 = vadd.f32 %v928_v33, %v538_v59  ;;  %v952_v7 = vadd.f32 %v948_v4, %v539_v2 }
 0x951   :  { %v953_v8 = vmul.f32 0.5, %v951_v6  ;;  %v954_v9 = vmul.f32 %v952_v7, %v4230_v44 }
 0x953   :  { %3356 = vtanh.f32 %v953_v8  ;;  %v1135_v8 = vld [vmem:[#allocation12 + $0x40] sm:$0xff] }
 0x954   :  { %3358 = vtanh.f32 %v954_v9  ;;  %v1136_v9 = vld [vmem:[#allocation12 + $0x48] sm:$0xff] }
 0x955   :  { %1225 = vmatpush.msrb.mxu3 %v1136_v9 }
 0x959   :  { %v3357_v10 = vpop.eup %3356 }
 0x95a   :  { %v3359_v12 = vpop.eup %3358  ;;  %v957_v13 = vmul.f32 0.5, %v3357_v10  ;;  %v1133_v10 = vld [vmem:[#allocation12 + $0x30] sm:$0xff] }
 0x95b   :  { %v958_v14 = vmul.f32 %v3359_v12, %v4230_v44  ;;  %v1134_v12 = vld [vmem:[#allocation12 + $0x38] sm:$0xff] }
 0x95c   :  { %v959_v15 = vadd.f32 0.5, %v957_v13  ;;  %v1131_v13 = vld [vmem:[#allocation12 + $0x20] sm:$0xff]  ;;  %1226 = vmatpush.msrb.mxu3 %v1134_v12 }
 0x95d   :  { %v960_v37 = vadd.f32 %v958_v14, %v4242_v63  ;;  %v1132_v14 = vld [vmem:[#allocation12 + $0x28] sm:$0xff] }
 0x95e   :  { %v961_v59 = vmul.f32 %v959_v15, %v899_v53  ;;  %1227 = vmatpush.msrb.mxu3 %v1132_v14 }
 0x95f   :  { %v962_v56 = vmul.f32 %v960_v37, %v959_v15  ;;  %v1129_v15 = vld [vmem:[#allocation12 + $0x10] sm:$0xff] }
 0x961   :  { %964 = vrot.lane.b32.xlu1 %v962_v56, %s5215_s26  ;;  %v1127_v56 = vld [vmem:[#allocation12] sm:$0xff] }
 0x9d3   :  { %v965_v17 = vpop.permute.xlu1 %964 }
 0x9d4   :  { %v967_v61 = vadd.f32 %v965_v17, %v961_v59  ;;  %v1128_v59 = vld [vmem:[#allocation12 + $0x8] sm:$0xff] }
 0x9d6   :  { %3360 = vtanh.f32 %v967_v61 }
 0x9dc   :  { %v3361_v62 = vpop.eup %3360 }
 0x9dd   :  { %v969_v2 = vmul.f32 %v3361_v62, %v960_v37  ;;  %v1130_v37 = vld [vmem:[#allocation12 + $0x18] sm:$0xff] }
 0x9de   :  { %1228 = vmatpush.msrb.mxu3 %v1130_v37 }
 0x9df   :  { %971 = vrot.lane.b32.xlu2 %v969_v2, %s5215_s26 }
 0x9e0   :  { %1229 = vmatpush.msrb.mxu3 %v1128_v59 }
 0xa39   :  { %v972_v19 = vpop.permute.xlu2 %971 }
 0xa3a   :  { %974 = vst.msk [vmem:[#allocation4 + $0x28] sm:$0xff] %vm332_vm0, %v972_v19  ;;  %3219 = vmatmul.msk.f32.vlgmr.msra.gmra.mxu2 %vm332_vm0, %v972_v19  ;;  %3220 = vmatmul.msk.f32.vlgmr.msra.gmra.mxu3 %vm332_vm0, %v972_v19 }
 0xabd   :  { %v996_v21 = vpop.f32.mrf.mxu2  ;;  %v1016_v22 = vpop.f32.mrf.mxu3 }
 0xabe   :  { %v1019_v24 = vadd.f32 %v996_v21, %v542_v5  ;;  %v1020_v25 = vadd.f32 %v1016_v22, %v543_v32  ;;  %v4433_v21 = vld [vmem:[#allocation4 + $0x8] sm:$0xff] }
 0xac0   :  { %v1021_v48 = vmul.f32 0.5, %v1019_v24  ;;  %v1022_v42 = vmul.f32 %v1020_v25, %v4230_v44  ;;  %v4441_v24 = vld [vmem:[#allocation4 + $0x28] sm:$0xff]  ;;  %v4443_v25 = vld [vmem:[#allocation4 + $0x10] sm:$0xff] }
 0xac2   :  { %3362 = vtanh.f32 %v1021_v48  ;;  %v1121_v48 = vsel %vm268_vm12, %v4443_v25, %v4441_v24 }
 0xac3   :  { %3364 = vtanh.f32 %v1022_v42  ;;  %v4451_v42 = vld [vmem:[#allocation14 + $0x70] sm:$0xff] }
 0xac4   :  { %1313 = vmatpush.msrb.mxu0 %v4451_v42 }
 0xac8   :  { %v3363_v36 = vpop.eup %3362 }
 0xac9   :  { %v3365_v30 = vpop.eup %3364  ;;  %v1025_v41 = vmul.f32 0.5, %v3363_v36  ;;  %v4453_v36 = vld [vmem:[#allocation14 + $0x78] sm:$0xff] }
 0xaca   :  { %v1026_v47 = vmul.f32 %v3365_v30, %v4230_v44  ;;  %v4455_v30 = vld [vmem:[#allocation14 + $0x60] sm:$0xff]  ;;  %1333 = vmatpush.msra.mxu1 %v4453_v36  ;;  %1597 = vmatpush.msra.mxu3 %v4453_v36 }
 0xacb   :  { %v1027_v3 = vadd.f32 0.5, %v1025_v41  ;;  %v4459_v41 = vld [vmem:[#allocation14 + $0x68] sm:$0xff]  ;;  %1314 = vmatpush.msrb.mxu0 %v4455_v30 }
 0xacc   :  { %v1028_v0 = vadd.f32 %v1026_v47, %v4242_v63  ;;  %v4461_v47 = vld [vmem:[#allocation14 + $0x50] sm:$0xff]  ;;  %1334 = vmatpush.msra.mxu1 %v4459_v41  ;;  %1598 = vmatpush.msra.mxu3 %v4459_v41 }
 0xacd   :  { %v1029_v5 = vmul.f32 %v1027_v3, %v967_v61  ;;  %v4421_v61 = vld [vmem:[#allocation4] sm:$0xff]  ;;  %1315 = vmatpush.msrb.mxu0 %v4461_v47 }
 0xace   :  { %v1030_v1 = vmul.f32 %v1028_v0, %v1027_v3  ;;  %v4463_v3 = vld [vmem:[#allocation14 + $0x58] sm:$0xff] }
 0xacf   :  { %1335 = vmatpush.msra.mxu1 %v4463_v3  ;;  %1599 = vmatpush.msra.mxu3 %v4463_v3 }
 0xad0   :  { %1032 = vrot.lane.b32.xlu0 %v1030_v1, %s5215_s26  ;;  %v1114_v1 = vld [vmem:[#allocation4 + $0x18] sm:$0xff] }
 0xb42   :  { %v1033_v31 = vpop.permute.xlu0 %1032 }
 0xb43   :  { %v1035_v23 = vadd.f32 %v1033_v31, %v1029_v5  ;;  %v4477_v31 = vld [vmem:[#allocation14 + $0x40] sm:$0xff] }
 0xb44   :  { %1316 = vmatpush.msrb.mxu0 %v4477_v31 }
 0xb45   :  { %3366 = vtanh.f32 %v1035_v23 }
 0xb4b   :  { %v3367_v26 = vpop.eup %3366 }
 0xb4c   :  { %v1037_v32 = vmul.f32 %v3367_v26, %v1028_v0  ;;  %v1115_v0 = vld [vmem:[#allocation4 + $0x20] sm:$0xff] }
 0xb4d   :  { %v1122_v5 = vsel %vm268_vm12, %v1114_v1, %v1115_v0  ;;  %v4483_v26 = vld [vmem:[#allocation14 + $0x30] sm:$0xff] }
 0xb4e   :  { %1039 = vrot.lane.b32.xlu1 %v1037_v32, %s5215_s26  ;;  %v4485_v32 = vld [vmem:[#allocation14 + $0x38] sm:$0xff]  ;;  %1317 = vmatpush.msrb.mxu0 %v4483_v26 }
 0xbc0   :  { %v1040_v43 = vpop.permute.xlu1 %1039 }
 0xbc1   :  { %1042 = vst.msk [vmem:[#allocation4 + $0x30] sm:$0xff] %vm332_vm0, %v1040_v43  ;;  %3221 = vmatmul.msk.f32.vlgmr.msra.gmra.mxu0 %vm332_vm0, %v1040_v43  ;;  %3222 = vmatmul.msk.f32.vlgmr.msrb.gmra.mxu1 %vm332_vm0, %v1040_v43  ;;  %v4489_v43 = vld [vmem:[#allocation14 + $0x20] sm:$0xff] }
 0xbc2   :  { %1318 = vmatpush.msrb.mxu0 %v4489_v43 }
 0xbc8   :  { %v4431_v19 = vld [vmem:[#allocation4 + $0x30] sm:$0xff] }
 0xbc9   :  { %v1120_v22 = vsel %vm268_vm12, %v4433_v21, %v4431_v19 }
 0xc3e   :  { %v1064_v50 = vpop.f32.mrf.mxu0  ;;  %v1084_v58 = vpop.f32.mrf.mxu1 }
 0xc3f   :  { %v1087_v55 = vadd.f32 %v1064_v50, %v546_v34  ;;  %v1088_v60 = vadd.f32 %v1084_v58, %v547_v51  ;;  %v1141_v34 = vld [vmem:[#allocation12 + $0x70] sm:$0xff]  ;;  %v4491_v50 = vld [vmem:[#allocation14 + $0x28] sm:$0xff] }
 0xc40   :  { %1181 = vmatpush.msrb.mxu2 %v1141_v34  ;;  %v1137_v51 = vld [vmem:[#allocation12 + $0x50] sm:$0xff] }
 0xc41   :  { %v1089_v11 = vmul.f32 0.5, %v1087_v55  ;;  %v1090_v38 = vmul.f32 %v1088_v60, %v4230_v44  ;;  %v4497_v58 = vld [vmem:[#allocation14 + $0x10] sm:$0xff]  ;;  %v4499_v55 = vld [vmem:[#allocation14 + $0x18] sm:$0xff]  ;;  %v4505_v60 = vld [vmem:[#allocation14] sm:$0xff] }
 0xc42   :  { %1182 = vmatpush.msrb.mxu2 %v1139_v35  ;;  %1319 = vmatpush.msrb.mxu0 %v4497_v58 }
 0xc43   :  { %3368 = vtanh.f32 %v1089_v11  ;;  %v4507_v11 = vld [vmem:[#allocation14 + $0x8] sm:$0xff] }
 0xc44   :  { %3370 = vtanh.f32 %v1090_v38  ;;  %1183 = vmatpush.msrb.mxu2 %v1137_v51  ;;  %v1123_v38 = vsel %vm268_vm12, %v1115_v0, %v1114_v1  ;;  %1320 = vmatpush.msrb.mxu0 %v4505_v60 }
 0xc45   :  { %1321 = vmatmul.f32.vlgmr.msrb.gmra.mxu0 %v5199_v20 }
 0xc46   :  { %1184 = vmatpush.msrb.mxu2 %v1135_v8  ;;  %1379 = vmatpush.msra.mxu0 %v4451_v42 }
 0xc48   :  { %1185 = vmatpush.msrb.mxu2 %v1133_v10  ;;  %1380 = vmatpush.msra.mxu0 %v4455_v30 }
 0xc49   :  { %v3369_v40 = vpop.eup %3368 }
 0xc4a   :  { %v3371_v46 = vpop.eup %3370  ;;  %v1093_v49 = vmul.f32 0.5, %v3369_v40  ;;  %1186 = vmatpush.msrb.mxu2 %v1131_v13  ;;  %v1124_v40 = vsel %vm268_vm12, %v4441_v24, %v4443_v25  ;;  %1381 = vmatpush.msra.mxu0 %v4461_v47 }
 0xc4b   :  { %v1094_v16 = vmul.f32 %v3371_v46, %v4230_v44  ;;  %v1125_v46 = vsel %vm268_vm12, %v4431_v19, %v4433_v21 }
 0xc4c   :  { %v1095_v53 = vadd.f32 0.5, %v1093_v49  ;;  %1187 = vmatpush.msrb.mxu2 %v1129_v15  ;;  %1382 = vmatpush.msra.mxu0 %v4477_v31 }
 0xc4d   :  { %v1096_v28 = vadd.f32 %v1094_v16, %v4242_v63 }
 0xc4e   :  { %v1097_v27 = vmul.f32 %v1095_v53, %v1035_v23  ;;  %1188 = vmatpush.msrb.mxu2 %v1127_v56  ;;  %v4479_v23 = vld [vmem:[#allocation14 + $0x48] sm:$0xff]  ;;  %1383 = vmatpush.msra.mxu0 %v4483_v26 }
 0xc4f   :  { %v1098_v29 = vmul.f32 %v1096_v28, %v1095_v53  ;;  %1336 = vmatpush.msra.mxu1 %v4479_v23  ;;  %1600 = vmatpush.msra.mxu3 %v4479_v23 }
 0xc50   :  { %1577 = vmatpush.msra.mxu2 %v4451_v42  ;;  %1384 = vmatpush.msra.mxu0 %v4489_v43 }
 0xc51   :  { %1100 = vrot.lane.b32.xlu2 %v1098_v29, %s5215_s26  ;;  %1337 = vmatpush.msra.mxu1 %v4485_v32 }
 0xc52   :  { %1578 = vmatpush.msra.mxu2 %v4455_v30  ;;  %1601 = vmatpush.msra.mxu3 %v4485_v32 }
 0xc53   :  { %1338 = vmatpush.msra.mxu1 %v4491_v50  ;;  %1385 = vmatpush.msra.mxu0 %v4497_v58 }
 0xc54   :  { %1579 = vmatpush.msra.mxu2 %v4461_v47  ;;  %1602 = vmatpush.msra.mxu3 %v4491_v50 }
 0xc55   :  { %1339 = vmatpush.msra.mxu1 %v4499_v55  ;;  %1386 = vmatpush.msra.mxu0 %v4505_v60 }
 0xc56   :  { %1580 = vmatpush.msra.mxu2 %v4477_v31  ;;  %1603 = vmatpush.msra.mxu3 %v4499_v55 }
 0xc57   :  { %1340 = vmatpush.msra.mxu1 %v4507_v11  ;;  %1445 = vmatpush.msrb.mxu0 %v4451_v42 }
 0xc58   :  { %1581 = vmatpush.msra.mxu2 %v4483_v26  ;;  %1341 = vmatmul.f32.vlgmr.msra.gmra.mxu1 %v5199_v20 }
 0xc59   :  { %1399 = vmatpush.msrb.mxu1 %v4453_v36  ;;  %1604 = vmatpush.msra.mxu3 %v4507_v11 }
 0xc5a   :  { %1582 = vmatpush.msra.mxu2 %v4489_v43  ;;  %1446 = vmatpush.msrb.mxu0 %v4455_v30 }
 0xc5b   :  { %1400 = vmatpush.msrb.mxu1 %v4459_v41 }
 0xc5c   :  { %1583 = vmatpush.msra.mxu2 %v4497_v58  ;;  %1447 = vmatpush.msrb.mxu0 %v4461_v47 }
 0xc5d   :  { %1401 = vmatpush.msrb.mxu1 %v4463_v3 }
 0xc5e   :  { %1584 = vmatpush.msra.mxu2 %v4505_v60  ;;  %1448 = vmatpush.msrb.mxu0 %v4477_v31 }
 0xc5f   :  { %1402 = vmatpush.msrb.mxu1 %v4479_v23 }
 0xc60   :  { %1449 = vmatpush.msrb.mxu0 %v4483_v26 }
 0xc61   :  { %1403 = vmatpush.msrb.mxu1 %v4485_v32 }
 0xc62   :  { %1450 = vmatpush.msrb.mxu0 %v4489_v43 }
 0xc63   :  { %1404 = vmatpush.msrb.mxu1 %v4491_v50 }
 0xc64   :  { %1451 = vmatpush.msrb.mxu0 %v4497_v58 }
 0xc65   :  { %1405 = vmatpush.msrb.mxu1 %v4499_v55 }
 0xc66   :  { %1452 = vmatpush.msrb.mxu0 %v4505_v60 }
 0xc67   :  { %1406 = vmatpush.msrb.mxu1 %v4507_v11 }
 0xc69   :  { %1465 = vmatpush.msra.mxu1 %v4453_v36 }
 0xc6b   :  { %1466 = vmatpush.msra.mxu1 %v4459_v41 }
 0xc6d   :  { %1467 = vmatpush.msra.mxu1 %v4463_v3 }
 0xc6f   :  { %1468 = vmatpush.msra.mxu1 %v4479_v23 }
 0xc71   :  { %1469 = vmatpush.msra.mxu1 %v4485_v32 }
 0xc73   :  { %1470 = vmatpush.msra.mxu1 %v4491_v50 }
 0xc75   :  { %1471 = vmatpush.msra.mxu1 %v4499_v55 }
 0xc77   :  { %1472 = vmatpush.msra.mxu1 %v4507_v11 }
 0xcab   :  { %v1101_v33 = vpop.permute.xlu2 %1100 }
 0xcac   :  { %v1103_v4 = vadd.f32 %v1101_v33, %v1097_v27 }
 0xcae   :  { %3372 = vtanh.f32 %v1103_v4 }
 0xcb4   :  { %v3373_v6 = vpop.eup %3372 }
 0xcb5   :  { %v1105_v7 = vmul.f32 %v3373_v6, %v1096_v28  ;;  %v1143_v28 = vld [vmem:[%s5181_s7] sm:$0x3] }
 0xcb6   :  { %v1145_v29 = vperm.slane %v1143_v28, 0  ;;  %v1146_v34 = vperm.slane %v1143_v28, 1 }
 0xcb7   :  { %1107 = vrot.lane.b32.xlu0 %v1105_v7, %s5215_s26 }
 0xd29   :  { %v1108_v17 = vpop.permute.xlu0 %1107 }
 0xd2a   :  { %1110 = vst.msk [vmem:[#allocation4 + $0x38] sm:$0xff] %vm332_vm0, %v1108_v17 }
 0xd31   :  { %v4423_v62 = vld [vmem:[#allocation4 + $0x38] sm:$0xff] }
 0xd32   :  { %v1119_v2 = vsel %vm268_vm12, %v4421_v61, %v4423_v62  ;;  %v1126_v49 = vsel %vm268_vm12, %v4423_v62, %v4421_v61 }
 0xd33   :  { %3223 = vmatmul.msk.f32.vlgmr.msrb.gmra.mxu2 %vm332_vm0, %v1119_v2  ;;  %3231 = vmatmul.msk.f32.vlgmr.msrb.gmra.mxu3 %vm332_vm0, %v1119_v2 }
 0xd34   :  { %1709 = vmatpush.msrb.mxu2 %v4451_v42  ;;  %1729 = vmatpush.msrb.mxu3 %v4453_v36 }
 0xd36   :  { %1710 = vmatpush.msrb.mxu2 %v4455_v30  ;;  %1730 = vmatpush.msrb.mxu3 %v4459_v41 }
 0xd38   :  { %1711 = vmatpush.msrb.mxu2 %v4461_v47  ;;  %1731 = vmatpush.msrb.mxu3 %v4463_v3 }
 0xd3a   :  { %1712 = vmatpush.msrb.mxu2 %v4477_v31  ;;  %1732 = vmatpush.msrb.mxu3 %v4479_v23 }
 0xd3b   :  { %3224 = vmatmul.msk.f32.gmra.mxu2 %vm332_vm0, %v1120_v22  ;;  %3232 = vmatmul.msk.f32.gmra.mxu3 %vm332_vm0, %v1120_v22 }
 0xd3c   :  { %1713 = vmatpush.msrb.mxu2 %v4483_v26  ;;  %1733 = vmatpush.msrb.mxu3 %v4485_v32 }
 0xd3e   :  { %1714 = vmatpush.msrb.mxu2 %v4489_v43  ;;  %1734 = vmatpush.msrb.mxu3 %v4491_v50 }
 0xd40   :  { %1715 = vmatpush.msrb.mxu2 %v4497_v58  ;;  %1735 = vmatpush.msrb.mxu3 %v4499_v55 }
 0xd42   :  { %1716 = vmatpush.msrb.mxu2 %v4505_v60  ;;  %1736 = vmatpush.msrb.mxu3 %v4507_v11 }
 0xd43   :  { %3225 = vmatmul.msk.f32.gmra.mxu2 %vm332_vm0, %v1121_v48  ;;  %3233 = vmatmul.msk.f32.gmra.mxu3 %vm332_vm0, %v1121_v48 }
 0xd4b   :  { %3226 = vmatmul.msk.f32.gmra.mxu2 %vm332_vm0, %v1122_v5  ;;  %3234 = vmatmul.msk.f32.gmra.mxu3 %vm332_vm0, %v1122_v5 }
 0xd53   :  { %3227 = vmatmul.msk.f32.gmra.mxu2 %vm332_vm0, %v1123_v38  ;;  %3235 = vmatmul.msk.f32.gmra.mxu3 %vm332_vm0, %v1123_v38 }
 0xd5b   :  { %3228 = vmatmul.msk.f32.gmra.mxu2 %vm332_vm0, %v1124_v40  ;;  %3236 = vmatmul.msk.f32.gmra.mxu3 %vm332_vm0, %v1124_v40 }
 0xd63   :  { %3229 = vmatmul.msk.f32.gmra.mxu2 %vm332_vm0, %v1125_v46  ;;  %3237 = vmatmul.msk.f32.gmra.mxu3 %vm332_vm0, %v1125_v46 }
 0xd6b   :  { %3230 = vmatmul.msk.f32.gmra.mxu2 %vm332_vm0, %v1126_v49  ;;  %3238 = vmatmul.msk.f32.gmra.mxu3 %vm332_vm0, %v1126_v49 }
 0xdb6   :  { %v1190_v16 = vpop.f32.mrf.mxu2  ;;  %v1231_v53 = vpop.f32.mrf.mxu3 }
 0xdbe   :  { %v1193_v54 = vpop.f32.mrf.mxu2  ;;  %v1234_v35 = vpop.f32.mrf.mxu3 }
 0xdbf   :  { %v4594_v39 = vadd.f32 %v1193_v54, %v1145_v29  ;;  %v4596_v51 = vadd.f32 %v1234_v35, %v1146_v34  ;;  %v4666_v54 = vadd.f32 %v1190_v16, %v1145_v29  ;;  %v4668_v35 = vadd.f32 %v1231_v53, %v1146_v34 }
 0xdc6   :  { %v1196_v57 = vpop.f32.mrf.mxu2  ;;  %v1237_v27 = vpop.f32.mrf.mxu3 }
 0xdc7   :  { %v4598_v33 = vadd.f32 %v1196_v57, %v1145_v29  ;;  %v4600_v4 = vadd.f32 %v1237_v27, %v1146_v34 }
 0xdce   :  { %v1199_v6 = vpop.f32.mrf.mxu2  ;;  %v1240_v7 = vpop.f32.mrf.mxu3 }
 0xdcf   :  { %v4602_v8 = vadd.f32 %v1199_v6, %v1145_v29  ;;  %v4604_v9 = vadd.f32 %v1240_v7, %v1146_v34  ;;  %v1322_v6 = vpop.f32.mrf.mxu0  ;;  %v1342_v7 = vpop.f32.mrf.mxu1 }
 0xdd6   :  { %v1202_v10 = vpop.f32.mrf.mxu2  ;;  %v1243_v12 = vpop.f32.mrf.mxu3 }
 0xdd7   :  { %v4606_v13 = vadd.f32 %v1202_v10, %v1145_v29  ;;  %v4608_v14 = vadd.f32 %v1243_v12, %v1146_v34 }
 0xdd9   :  { %v1267_v15 = vsel %vm4149_vm9, %v4602_v8, %v4606_v13  ;;  %v1268_v37 = vsel %vm4163_vm10, %v4604_v9, %v4608_v14  ;;  %v1271_v56 = vsel %vm4149_vm9, %v4606_v13, %v4602_v8  ;;  %v1272_v59 = vsel %vm4163_vm10, %v4608_v14, %v4604_v9 }
 0xdde   :  { %v1205_v17 = vpop.f32.mrf.mxu2  ;;  %v1246_v61 = vpop.f32.mrf.mxu3 }
 0xddf   :  { %v4626_v62 = vadd.f32 %v1205_v17, %v1145_v29  ;;  %v4628_v2 = vadd.f32 %v1246_v61, %v1146_v34 }
 0xde1   :  { %v1263_v19 = vsel %vm4149_vm9, %v4598_v33, %v4626_v62  ;;  %v1264_v21 = vsel %vm4163_vm10, %v4600_v4, %v4628_v2  ;;  %v1275_v22 = vsel %vm4149_vm9, %v4626_v62, %v4598_v33  ;;  %v1276_v24 = vsel %vm4163_vm10, %v4628_v2, %v4600_v4 }
 0xde6   :  { %v1208_v25 = vpop.f32.mrf.mxu2  ;;  %v1249_v48 = vpop.f32.mrf.mxu3 }
 0xde7   :  { %v4646_v0 = vadd.f32 %v1208_v25, %v1145_v29  ;;  %v4648_v1 = vadd.f32 %v1249_v48, %v1146_v34 }
 0xde9   :  { %v1259_v5 = vsel %vm4149_vm9, %v4594_v39, %v4646_v0  ;;  %v1260_v38 = vsel %vm4163_vm10, %v4596_v51, %v4648_v1 }
 0xdee   :  { %v1211_v49 = vpop.f32.mrf.mxu2  ;;  %v1252_v28 = vpop.f32.mrf.mxu3 }
 0xdef   :  { %v4670_v57 = vadd.f32 %v1211_v49, %v1145_v29  ;;  %v4672_v27 = vadd.f32 %v1252_v28, %v1146_v34 }
 0xdf1   :  { %v1255_v10 = vsel %vm4149_vm9, %v4666_v54, %v4670_v57  ;;  %v1256_v12 = vsel %vm4163_vm10, %v4668_v35, %v4672_v27 }
 0xdf2   :  { %v1345_v29 = vadd.f32 %v1322_v6, %v1255_v10  ;;  %v1346_v34 = vadd.f32 %v1342_v7, %v1256_v12 }
 0xdf4   :  { %v1347_v17 = vmul.f32 0.5, %v1345_v29  ;;  %v1348_v61 = vmul.f32 %v1346_v34, %v4230_v44 }
 0xdf6   :  { %3374 = vtanh.f32 %v1347_v17 }
 0xdf7   :  { %3376 = vtanh.f32 %v1348_v61 }
 0xdfc   :  { %v3375_v25 = vpop.eup %3374 }
 0xdfd   :  { %v3377_v48 = vpop.eup %3376  ;;  %v1351_v49 = vmul.f32 0.5, %v3375_v25 }
 0xdfe   :  { %v1352_v28 = vmul.f32 %v3377_v48, %v4230_v44 }
 0xdff   :  { %v1353_v20 = vadd.f32 0.5, %v1351_v49 }
 0xe00   :  { %v1354_v16 = vadd.f32 %v1352_v28, %v4242_v63 }
 0xe01   :  { %v1355_v40 = vmul.f32 0.0, %v1353_v20 }
 0xe02   :  { %v1356_v46 = vmul.f32 %v1354_v16, %v1353_v20 }
 0xe04   :  { %1358 = vrot.lane.b32.xlu1 %v1356_v46, %s5215_s26 }
 0xe76   :  { %v1359_v53 = vpop.permute.xlu1 %1358 }
 0xe77   :  { %v1361_v6 = vadd.f32 %v1359_v53, %v1355_v40 }
 0xe79   :  { %3378 = vtanh.f32 %v1361_v6 }
 0xe7f   :  { %v3379_v7 = vpop.eup %3378 }
 0xe80   :  { %v1363_v10 = vmul.f32 %v3379_v7, %v1354_v16 }
 0xe82   :  { %1367 = vrot.lane.b32.xlu2 %v1363_v10, %s5215_s26 }
 0xedc   :  { %v1368_v12 = vpop.permute.xlu2 %1367 }
 0xedd   :  { %3239 = vmatmul.msk.f32.vlgmr.msra.gmra.mxu0 %vm332_vm0, %v1368_v12  ;;  %3240 = vmatmul.msk.f32.vlgmr.msrb.gmra.mxu1 %vm332_vm0, %v1368_v12 }
 0xede   :  { %1511 = vmatpush.msra.mxu0 %v4451_v42  ;;  %1531 = vmatpush.msrb.mxu1 %v4453_v36 }
 0xee0   :  { %1512 = vmatpush.msra.mxu0 %v4455_v30  ;;  %1532 = vmatpush.msrb.mxu1 %v4459_v41 }
 0xee2   :  { %1513 = vmatpush.msra.mxu0 %v4461_v47  ;;  %1533 = vmatpush.msrb.mxu1 %v4463_v3 }
 0xee4   :  { %1514 = vmatpush.msra.mxu0 %v4477_v31  ;;  %1534 = vmatpush.msrb.mxu1 %v4479_v23 }
 0xee6   :  { %1515 = vmatpush.msra.mxu0 %v4483_v26  ;;  %1535 = vmatpush.msrb.mxu1 %v4485_v32 }
 0xee8   :  { %1516 = vmatpush.msra.mxu0 %v4489_v43  ;;  %1536 = vmatpush.msrb.mxu1 %v4491_v50 }
 0xeea   :  { %1517 = vmatpush.msra.mxu0 %v4497_v58  ;;  %1537 = vmatpush.msrb.mxu1 %v4499_v55 }
 0xeec   :  { %1518 = vmatpush.msra.mxu0 %v4505_v60  ;;  %1538 = vmatpush.msrb.mxu1 %v4507_v11 }
 0xf5a   :  { %v1388_v20 = vpop.f32.mrf.mxu0  ;;  %v1408_v40 = vpop.f32.mrf.mxu1 }
 0xf5b   :  { %v1411_v46 = vadd.f32 %v1388_v20, %v1259_v5  ;;  %v1412_v16 = vadd.f32 %v1408_v40, %v1260_v38 }
 0xf5d   :  { %v1413_v53 = vmul.f32 0.5, %v1411_v46  ;;  %v1414_v29 = vmul.f32 %v1412_v16, %v4230_v44 }
 0xf5f   :  { %3380 = vtanh.f32 %v1413_v53 }
 0xf60   :  { %3382 = vtanh.f32 %v1414_v29 }
 0xf65   :  { %v3381_v34 = vpop.eup %3380 }
 0xf66   :  { %v3383_v17 = vpop.eup %3382  ;;  %v1417_v61 = vmul.f32 0.5, %v3381_v34 }
 0xf67   :  { %v1418_v25 = vmul.f32 %v3383_v17, %v4230_v44 }
 0xf68   :  { %v1419_v48 = vadd.f32 0.5, %v1417_v61 }
 0xf69   :  { %v1420_v49 = vadd.f32 %v1418_v25, %v4242_v63 }
 0xf6a   :  { %v1421_v7 = vmul.f32 %v1419_v48, %v1361_v6 }
 0xf6b   :  { %v1422_v28 = vmul.f32 %v1420_v49, %v1419_v48 }
 0xf6d   :  { %1424 = vrot.lane.b32.xlu0 %v1422_v28, %s5215_s26 }
 0xfdf   :  { %v1425_v10 = vpop.permute.xlu0 %1424 }
 0xfe0   :  { %v1427_v5 = vadd.f32 %v1425_v10, %v1421_v7 }
 0xfe2   :  { %3384 = vtanh.f32 %v1427_v5 }
 0xfe8   :  { %v3385_v38 = vpop.eup %3384 }
 0xfe9   :  { %v1429_v12 = vmul.f32 %v3385_v38, %v1420_v49 }
 0xfeb   :  { %1433 = vrot.lane.b32.xlu1 %v1429_v12, %s5215_s26 }
0x105d   :  { %v1434_v20 = vpop.permute.xlu1 %1433 }
0x105e   :  { %3241 = vmatmul.msk.f32.vlgmr.msrb.gmra.mxu0 %vm332_vm0, %v1434_v20  ;;  %3242 = vmatmul.msk.f32.vlgmr.msra.gmra.mxu1 %vm332_vm0, %v1434_v20 }
0x105f   :  { %1643 = vmatpush.msrb.mxu0 %v4451_v42  ;;  %1663 = vmatpush.msra.mxu1 %v4453_v36 }
0x1061   :  { %1644 = vmatpush.msrb.mxu0 %v4455_v30  ;;  %1664 = vmatpush.msra.mxu1 %v4459_v41 }
0x1063   :  { %1645 = vmatpush.msrb.mxu0 %v4461_v47  ;;  %1665 = vmatpush.msra.mxu1 %v4463_v3 }
0x1065   :  { %1646 = vmatpush.msrb.mxu0 %v4477_v31  ;;  %1666 = vmatpush.msra.mxu1 %v4479_v23 }
0x1067   :  { %1647 = vmatpush.msrb.mxu0 %v4483_v26  ;;  %1667 = vmatpush.msra.mxu1 %v4485_v32 }
0x1069   :  { %1648 = vmatpush.msrb.mxu0 %v4489_v43  ;;  %1668 = vmatpush.msra.mxu1 %v4491_v50 }
0x106b   :  { %1649 = vmatpush.msrb.mxu0 %v4497_v58  ;;  %1669 = vmatpush.msra.mxu1 %v4499_v55 }
0x106d   :  { %1650 = vmatpush.msrb.mxu0 %v4505_v60  ;;  %1670 = vmatpush.msra.mxu1 %v4507_v11 }
0x10db   :  { %v1454_v6 = vpop.f32.mrf.mxu0  ;;  %v1474_v40 = vpop.f32.mrf.mxu1 }
0x10dc   :  { %v1477_v46 = vadd.f32 %v1454_v6, %v1263_v19  ;;  %v1478_v16 = vadd.f32 %v1474_v40, %v1264_v21 }
0x10de   :  { %v1479_v53 = vmul.f32 0.5, %v1477_v46  ;;  %v1480_v29 = vmul.f32 %v1478_v16, %v4230_v44 }
0x10e0   :  { %3386 = vtanh.f32 %v1479_v53 }
0x10e1   :  { %3388 = vtanh.f32 %v1480_v29 }
0x10e6   :  { %v3387_v34 = vpop.eup %3386 }
0x10e7   :  { %v3389_v17 = vpop.eup %3388  ;;  %v1483_v61 = vmul.f32 0.5, %v3387_v34 }
0x10e8   :  { %v1484_v25 = vmul.f32 %v3389_v17, %v4230_v44 }
0x10e9   :  { %v1485_v48 = vadd.f32 0.5, %v1483_v61 }
0x10ea   :  { %v1486_v49 = vadd.f32 %v1484_v25, %v4242_v63 }
0x10eb   :  { %v1487_v28 = vmul.f32 %v1485_v48, %v1427_v5 }
0x10ec   :  { %v1488_v19 = vmul.f32 %v1486_v49, %v1485_v48 }
0x10ee   :  { %1490 = vrot.lane.b32.xlu2 %v1488_v19, %s5215_s26 }
0x1148   :  { %v1491_v7 = vpop.permute.xlu2 %1490 }
0x1149   :  { %v1493_v10 = vadd.f32 %v1491_v7, %v1487_v28 }
0x114b   :  { %3390 = vtanh.f32 %v1493_v10 }
0x1151   :  { %v3391_v21 = vpop.eup %3390 }
0x1152   :  { %v1495_v38 = vmul.f32 %v3391_v21, %v1486_v49 }
0x1154   :  { %1499 = vrot.lane.b32.xlu0 %v1495_v38, %s5215_s26 }
0x11c6   :  { %v1500_v12 = vpop.permute.xlu0 %1499 }
0x11c7   :  { %3243 = vmatmul.msk.f32.vlgmr.msra.gmra.mxu0 %vm332_vm0, %v1500_v12  ;;  %3244 = vmatmul.msk.f32.vlgmr.msrb.gmra.mxu1 %vm332_vm0, %v1500_v12 }
0x11c8   :  { %1775 = vmatpush.msra.mxu0 %v4451_v42  ;;  %1795 = vmatpush.msrb.mxu1 %v4453_v36 }
0x11ca   :  { %1776 = vmatpush.msra.mxu0 %v4455_v30  ;;  %1796 = vmatpush.msrb.mxu1 %v4459_v41 }
0x11cc   :  { %1777 = vmatpush.msra.mxu0 %v4461_v47  ;;  %1797 = vmatpush.msrb.mxu1 %v4463_v3 }
0x11ce   :  { %1778 = vmatpush.msra.mxu0 %v4477_v31  ;;  %1798 = vmatpush.msrb.mxu1 %v4479_v23 }
0x11d0   :  { %1779 = vmatpush.msra.mxu0 %v4483_v26  ;;  %1799 = vmatpush.msrb.mxu1 %v4485_v32 }
0x11d2   :  { %1780 = vmatpush.msra.mxu0 %v4489_v43  ;;  %1800 = vmatpush.msrb.mxu1 %v4491_v50 }
0x11d4   :  { %1781 = vmatpush.msra.mxu0 %v4497_v58  ;;  %1801 = vmatpush.msrb.mxu1 %v4499_v55 }
0x11d6   :  { %1782 = vmatpush.msra.mxu0 %v4505_v60  ;;  %1802 = vmatpush.msrb.mxu1 %v4507_v11 }
0x1244   :  { %v1520_v42 = vpop.f32.mrf.mxu0  ;;  %v1540_v36 = vpop.f32.mrf.mxu1 }
0x1245   :  { %v1543_v30 = vadd.f32 %v1520_v42, %v1267_v15  ;;  %v1544_v41 = vadd.f32 %v1540_v36, %v1268_v37 }
0x1247   :  { %v1545_v47 = vmul.f32 0.5, %v1543_v30  ;;  %v1546_v3 = vmul.f32 %v1544_v41, %v4230_v44 }
0x1249   :  { %3392 = vtanh.f32 %v1545_v47 }
0x124a   :  { %3394 = vtanh.f32 %v1546_v3 }
0x124f   :  { %v3393_v31 = vpop.eup %3392 }
0x1250   :  { %v3395_v23 = vpop.eup %3394  ;;  %v1549_v26 = vmul.f32 0.5, %v3393_v31 }
0x1251   :  { %v1550_v32 = vmul.f32 %v3395_v23, %v4230_v44 }
0x1252   :  { %v1551_v43 = vadd.f32 0.5, %v1549_v26  ;;  %v5216_v26 = vsel %vm4149_vm9, %v4646_v0, %v4594_v39 }
0x1253   :  { %v1552_v50 = vadd.f32 %v1550_v32, %v4242_v63 }
0x1254   :  { %v1553_v55 = vmul.f32 %v1551_v43, %v1493_v10 }
0x1255   :  { %v1554_v58 = vmul.f32 %v1552_v50, %v1551_v43  ;;  %v5217_v43 = vsel %vm4163_vm10, %v4648_v1, %v4596_v51 }
0x1257   :  { %1556 = vrot.lane.b32.xlu1 %v1554_v58, %s5215_s26 }
0x12c9   :  { %v1557_v60 = vpop.permute.xlu1 %1556 }
0x12ca   :  { %v1559_v11 = vadd.f32 %v1557_v60, %v1553_v55 }
0x12cc   :  { %3396 = vtanh.f32 %v1559_v11 }
0x12d2   :  { %v3397_v15 = vpop.eup %3396 }
0x12d3   :  { %v1561_v37 = vmul.f32 %v3397_v15, %v1552_v50 }
0x12d5   :  { %1565 = vrot.lane.b32.xlu2 %v1561_v37, %s5215_s26 }
0x132f   :  { %v1566_v5 = vpop.permute.xlu2 %1565 }
0x1330   :  { %3245 = vmatmul.msk.f32.vlgmr.msra.gmra.mxu2 %vm332_vm0, %v1566_v5  ;;  %3246 = vmatmul.msk.f32.vlgmr.msra.gmra.mxu3 %vm332_vm0, %v1566_v5 }
0x13b3   :  { %v1586_v20 = vpop.f32.mrf.mxu2  ;;  %v1606_v6 = vpop.f32.mrf.mxu3 }
0x13b4   :  { %v1609_v40 = vadd.f32 %v1586_v20, %v1271_v56  ;;  %v1610_v46 = vadd.f32 %v1606_v6, %v1272_v59 }
0x13b6   :  { %v1611_v16 = vmul.f32 0.5, %v1609_v40  ;;  %v1612_v53 = vmul.f32 %v1610_v46, %v4230_v44 }
0x13b8   :  { %3398 = vtanh.f32 %v1611_v16 }
0x13b9   :  { %3400 = vtanh.f32 %v1612_v53 }
0x13be   :  { %v3399_v29 = vpop.eup %3398 }
0x13bf   :  { %v3401_v34 = vpop.eup %3400  ;;  %v1615_v17 = vmul.f32 0.5, %v3399_v29  ;;  %v5218_v29 = vsel %vm4149_vm9, %v4670_v57, %v4666_v54  ;;  %v1883_v57 = vld [vmem:[#allocation15 + $0x1c8] sm:$0xff] }
0x13c0   :  { %v1616_v61 = vmul.f32 %v3401_v34, %v4230_v44  ;;  %1941 = vmatpush.msra.mxu3 %v1883_v57  ;;  %v1840_v57 = vld [vmem:[#allocation15 + $0x70] sm:$0xff] }
0x13c1   :  { %v1617_v25 = vadd.f32 0.5, %v1615_v17  ;;  %v5219_v17 = vsel %vm4163_vm10, %v4672_v27, %v4668_v35  ;;  %v1882_v35 = vld [vmem:[#allocation15 + $0x1c0] sm:$0xff]  ;;  %v1884_v27 = vld [vmem:[#allocation15 + $0x1d0] sm:$0xff] }
0x13c2   :  { %v1618_v8 = vadd.f32 %v1616_v61, %v4242_v63  ;;  %1921 = vmatpush.msra.mxu2 %v1882_v35  ;;  %v1839_v35 = vld [vmem:[#allocation15 + $0x68] sm:$0xff] }
0x13c3   :  { %v1619_v56 = vmul.f32 %v1617_v25, %v1559_v11 }
0x13c4   :  { %v1620_v13 = vmul.f32 %v1618_v8, %v1617_v25 }
0x13c6   :  { %1622 = vrot.lane.b32.xlu0 %v1620_v13, %s5215_s26 }
0x1438   :  { %v1623_v48 = vpop.permute.xlu0 %1622 }
0x1439   :  { %v1625_v9 = vadd.f32 %v1623_v48, %v1619_v56 }
0x143b   :  { %3402 = vtanh.f32 %v1625_v9 }
0x1441   :  { %v3403_v14 = vpop.eup %3402 }
0x1442   :  { %v1627_v59 = vmul.f32 %v3403_v14, %v1618_v8  ;;  %v1885_v14 = vld [vmem:[#allocation15 + $0x1d8] sm:$0xff] }
0x1444   :  { %1631 = vrot.lane.b32.xlu1 %v1627_v59, %s5215_s26  ;;  %v1874_v59 = vld [vmem:[#allocation15 + $0x180] sm:$0xff] }
0x1445   :  { %1922 = vmatpush.msra.mxu2 %v1874_v59  ;;  %v1832_v59 = vld [vmem:[#allocation15 + $0x30] sm:$0xff] }
0x14b6   :  { %v1632_v49 = vpop.permute.xlu1 %1631 }
0x14b7   :  { %3247 = vmatmul.msk.f32.vlgmr.msrb.gmra.mxu0 %vm332_vm0, %v1632_v49  ;;  %3248 = vmatmul.msk.f32.vlgmr.msra.gmra.mxu1 %vm332_vm0, %v1632_v49  ;;  %v1875_v49 = vld [vmem:[#allocation15 + $0x188] sm:$0xff] }
0x14b8   :  { %1961 = vmatpush.msrb.mxu0 %v1884_v27  ;;  %1981 = vmatpush.msra.mxu1 %v1885_v14  ;;  %v1830_v27 = vld [vmem:[#allocation15 + $0x20] sm:$0xff]  ;;  %v1831_v14 = vld [vmem:[#allocation15 + $0x28] sm:$0xff] }
0x14b9   :  { %1942 = vmatpush.msra.mxu3 %v1875_v49  ;;  %v1833_v49 = vld [vmem:[#allocation15 + $0x38] sm:$0xff] }
0x1534   :  { %v1652_v19 = vpop.f32.mrf.mxu0  ;;  %v1672_v28 = vpop.f32.mrf.mxu1 }
0x1535   :  { %v1675_v7 = vadd.f32 %v1652_v19, %v1275_v22  ;;  %v1676_v10 = vadd.f32 %v1672_v28, %v1276_v24  ;;  %v1877_v19 = vld [vmem:[#allocation15 + $0x198] sm:$0xff]  ;;  %v1866_v28 = vld [vmem:[#allocation15 + $0x140] sm:$0xff] }
0x1536   :  { %1982 = vmatpush.msra.mxu1 %v1877_v19  ;;  %1923 = vmatpush.msra.mxu2 %v1866_v28  ;;  %v2096_v19 = vld [vmem:[#allocation17 + $0x78] sm:$0xff]  ;;  %v2095_v28 = vld [vmem:[#allocation17 + $0x70] sm:$0xff] }
0x1537   :  { %v1677_v21 = vmul.f32 0.5, %v1675_v7  ;;  %v1678_v38 = vmul.f32 %v1676_v10, %v4230_v44  ;;  %v1868_v7 = vld [vmem:[#allocation15 + $0x150] sm:$0xff]  ;;  %v1869_v10 = vld [vmem:[#allocation15 + $0x158] sm:$0xff] }
0x1538   :  { %1983 = vmatpush.msra.mxu1 %v1869_v10  ;;  %v2092_v10 = vld [vmem:[#allocation17 + $0x58] sm:$0xff] }
0x1539   :  { %3404 = vtanh.f32 %v1677_v21  ;;  %v1858_v21 = vld [vmem:[#allocation15 + $0x100] sm:$0xff] }
0x153a   :  { %3406 = vtanh.f32 %v1678_v38  ;;  %v1859_v38 = vld [vmem:[#allocation15 + $0x108] sm:$0xff]  ;;  %1924 = vmatpush.msra.mxu2 %v1858_v21  ;;  %v2091_v21 = vld [vmem:[#allocation17 + $0x50] sm:$0xff] }
0x153f   :  { %v3405_v12 = vpop.eup %3404 }
0x1540   :  { %v3407_v42 = vpop.eup %3406  ;;  %v1681_v36 = vmul.f32 0.5, %v3405_v12  ;;  %v1860_v12 = vld [vmem:[#allocation15 + $0x110] sm:$0xff] }
0x1541   :  { %v1682_v30 = vmul.f32 %v3407_v42, %v4230_v44  ;;  %v1861_v42 = vld [vmem:[#allocation15 + $0x118] sm:$0xff] }
0x1542   :  { %v1683_v41 = vadd.f32 0.5, %v1681_v36  ;;  %v1850_v36 = vld [vmem:[#allocation15 + $0xc0] sm:$0xff]  ;;  %1984 = vmatpush.msra.mxu1 %v1861_v42  ;;  %v2088_v42 = vld [vmem:[#allocation17 + $0x38] sm:$0xff] }
0x1543   :  { %v1684_v33 = vadd.f32 %v1682_v30, %v4242_v63  ;;  %v1851_v30 = vld [vmem:[#allocation15 + $0xc8] sm:$0xff]  ;;  %1925 = vmatpush.msra.mxu2 %v1850_v36  ;;  %v2087_v36 = vld [vmem:[#allocation17 + $0x30] sm:$0xff] }
0x1544   :  { %v1685_v22 = vmul.f32 %v1683_v41, %v1625_v9 }
0x1545   :  { %v1686_v62 = vmul.f32 %v1684_v33, %v1683_v41  ;;  %v1852_v41 = vld [vmem:[#allocation15 + $0xd0] sm:$0xff] }
0x1547   :  { %1688 = vrot.lane.b32.xlu2 %v1686_v62, %s5215_s26  ;;  %v1842_v62 = vld [vmem:[#allocation15 + $0x80] sm:$0xff] }
0x1548   :  { %1926 = vmatpush.msra.mxu2 %v1842_v62  ;;  %v4872_v62 = vld [vmem:[#allocation18 + $0x18] sm:$0xff] }
0x15a1   :  { %v1689_v47 = vpop.permute.xlu2 %1688 }
0x15a2   :  { %v1691_v4 = vadd.f32 %v1689_v47, %v1685_v22  ;;  %v1843_v22 = vld [vmem:[#allocation15 + $0x88] sm:$0xff]  ;;  %v1844_v47 = vld [vmem:[#allocation15 + $0x90] sm:$0xff] }
0x15a4   :  { %3408 = vtanh.f32 %v1691_v4 }
0x15aa   :  { %v3409_v2 = vpop.eup %3408 }
0x15ab   :  { %v1693_v24 = vmul.f32 %v3409_v2, %v1684_v33  ;;  %v1853_v33 = vld [vmem:[#allocation15 + $0xd8] sm:$0xff]  ;;  %v1834_v2 = vld [vmem:[#allocation15 + $0x40] sm:$0xff] }
0x15ac   :  { %1985 = vmatpush.msra.mxu1 %v1853_v33  ;;  %1927 = vmatpush.msra.mxu2 %v1834_v2  ;;  %v2084_v33 = vld [vmem:[#allocation17 + $0x18] sm:$0xff]  ;;  %v4880_v2 = vld [vmem:[#allocation18 + $0x8] sm:$0xff] }
0x15ad   :  { %1697 = vrot.lane.b32.xlu0 %v1693_v24, %s5215_s26  ;;  %v1835_v24 = vld [vmem:[#allocation15 + $0x48] sm:$0xff] }
0x161f   :  { %v1698_v3 = vpop.permute.xlu0 %1697 }
0x1620   :  { %3249 = vmatmul.msk.f32.vlgmr.msrb.gmra.mxu2 %vm332_vm0, %v1698_v3  ;;  %3250 = vmatmul.msk.f32.vlgmr.msrb.gmra.mxu3 %vm332_vm0, %v1698_v3  ;;  %v1836_v3 = vld [vmem:[#allocation15 + $0x50] sm:$0xff] }
0x16a3   :  { %v1718_v31 = vpop.f32.mrf.mxu2  ;;  %v1738_v23 = vpop.f32.mrf.mxu3 }
0x16a4   :  { %v1741_v32 = vadd.f32 %v1718_v31, %v5216_v26  ;;  %v1742_v50 = vadd.f32 %v1738_v23, %v5217_v43  ;;  %v1837_v31 = vld [vmem:[#allocation15 + $0x58] sm:$0xff]  ;;  %v1826_v23 = vld [vmem:[#allocation15] sm:$0xff]  ;;  %v1827_v26 = vld [vmem:[#allocation15 + $0x8] sm:$0xff] }
0x16a5   :  { %v1829_v43 = vld [vmem:[#allocation15 + $0x18] sm:$0xff]  ;;  %1928 = vmatpush.msra.mxu2 %v1826_v23  ;;  %v1890_v23 = vld [vmem:[%s5183_s9] sm:$0xff] }
0x16a6   :  { %v1743_v58 = vmul.f32 0.5, %v1741_v32  ;;  %v1744_v55 = vmul.f32 %v1742_v50, %v4230_v44  ;;  %v1828_v32 = vld [vmem:[#allocation15 + $0x10] sm:$0xff]  ;;  %v1886_v50 = vld [vmem:[#allocation15 + $0x1e0] sm:$0xff] }
0x16a7   :  { %2001 = vmatpush.msrb.mxu2 %v1886_v50 }
0x16a8   :  { %3410 = vtanh.f32 %v1743_v58  ;;  %v1887_v58 = vld [vmem:[#allocation15 + $0x1e8] sm:$0xff] }
0x16a9   :  { %3412 = vtanh.f32 %v1744_v55  ;;  %v1888_v55 = vld [vmem:[#allocation15 + $0x1f0] sm:$0xff] }
0x16ae   :  { %v3411_v60 = vpop.eup %3410 }
0x16af   :  { %v3413_v11 = vpop.eup %3412  ;;  %v1747_v15 = vmul.f32 0.5, %v3411_v60  ;;  %v1889_v60 = vld [vmem:[#allocation15 + $0x1f8] sm:$0xff] }
0x16b0   :  { %v1748_v37 = vmul.f32 %v3413_v11, %v4230_v44  ;;  %v1878_v11 = vld [vmem:[#allocation15 + $0x1a0] sm:$0xff] }
0x16b1   :  { %v1749_v5 = vadd.f32 0.5, %v1747_v15  ;;  %v1879_v15 = vld [vmem:[#allocation15 + $0x1a8] sm:$0xff]  ;;  %2002 = vmatpush.msrb.mxu2 %v1878_v11  ;;  %v1894_v11 = vperm.slane %v1890_v23, 2 }
0x16b2   :  { %v1750_v39 = vadd.f32 %v1748_v37, %v4242_v63  ;;  %v1880_v37 = vld [vmem:[#allocation15 + $0x1b0] sm:$0xff] }
0x16b3   :  { %v1751_v20 = vmul.f32 %v1749_v5, %v1691_v4  ;;  %v1845_v4 = vld [vmem:[#allocation15 + $0x98] sm:$0xff] }
0x16b4   :  { %v1752_v0 = vmul.f32 %v1750_v39, %v1749_v5  ;;  %1986 = vmatpush.msra.mxu1 %v1845_v4  ;;  %v1881_v5 = vld [vmem:[#allocation15 + $0x1b8] sm:$0xff]  ;;  %v2082_v4 = vld [vmem:[#allocation17 + $0x8] sm:$0xff] }
0x16b6   :  { %1754 = vrot.lane.b32.xlu1 %v1752_v0, %s5215_s26  ;;  %1987 = vmatpush.msra.mxu1 %v1837_v31  ;;  %v1871_v0 = vld [vmem:[#allocation15 + $0x168] sm:$0xff]  ;;  %v5220_v31 = vmov 0.0  }
0x16b8   :  { %1988 = vmatpush.msra.mxu1 %v1829_v43 }
0x1728   :  { %v1755_v6 = vpop.permute.xlu1 %1754 }
0x1729   :  { %v4834_v51 = vadd.f32 %v1755_v6, %v1751_v20  ;;  %v1872_v6 = vld [vmem:[#allocation15 + $0x170] sm:$0xff] }
0x172b   :  { %3414 = vtanh.f32 %v4834_v51 }
0x1731   :  { %v3415_v1 = vpop.eup %3414 }
0x1732   :  { %v1759_v40 = vmul.f32 %v3415_v1, %v1750_v39  ;;  %v1870_v39 = vld [vmem:[#allocation15 + $0x160] sm:$0xff]  ;;  %v1873_v1 = vld [vmem:[#allocation15 + $0x178] sm:$0xff] }
0x1733   :  { %2003 = vmatpush.msrb.mxu2 %v1870_v39 }
0x1734   :  { %1763 = vrot.lane.b32.xlu2 %v1759_v40, %s5215_s26 }
0x178e   :  { %v1764_v46 = vpop.permute.xlu2 %1763 }
0x178f   :  { %3251 = vmatmul.msk.f32.vlgmr.msra.gmra.mxu0 %vm332_vm0, %v1764_v46  ;;  %3252 = vmatmul.msk.f32.vlgmr.msrb.gmra.mxu1 %vm332_vm0, %v1764_v46  ;;  %v1862_v46 = vld [vmem:[#allocation15 + $0x120] sm:$0xff] }
0x1790   :  { %2061 = vmatpush.msrb.mxu1 %v1889_v60  ;;  %2004 = vmatpush.msrb.mxu2 %v1862_v46 }
0x1792   :  { %2062 = vmatpush.msrb.mxu1 %v1881_v5 }
0x1794   :  { %2063 = vmatpush.msrb.mxu1 %v1873_v1 }
0x180c   :  { %v1784_v16 = vpop.f32.mrf.mxu0  ;;  %v1804_v53 = vpop.f32.mrf.mxu1 }
0x180d   :  { %v1807_v34 = vadd.f32 %v1784_v16, %v5218_v29  ;;  %v1808_v61 = vadd.f32 %v1804_v53, %v5219_v17  ;;  %v1863_v16 = vld [vmem:[#allocation15 + $0x128] sm:$0xff]  ;;  %v1864_v29 = vld [vmem:[#allocation15 + $0x130] sm:$0xff] }
0x180f   :  { %v1809_v25 = vmul.f32 0.5, %v1807_v34  ;;  %v1810_v8 = vmul.f32 %v1808_v61, %v4230_v44  ;;  %v1865_v34 = vld [vmem:[#allocation15 + $0x138] sm:$0xff]  ;;  %v1854_v61 = vld [vmem:[#allocation15 + $0xe0] sm:$0xff] }
0x1810   :  { %2064 = vmatpush.msrb.mxu1 %v1865_v34  ;;  %2005 = vmatpush.msrb.mxu2 %v1854_v61 }
0x1811   :  { %3416 = vtanh.f32 %v1809_v25  ;;  %v1855_v25 = vld [vmem:[#allocation15 + $0xe8] sm:$0xff] }
0x1812   :  { %3418 = vtanh.f32 %v1810_v8  ;;  %v1856_v8 = vld [vmem:[#allocation15 + $0xf0] sm:$0xff] }
0x1817   :  { %v3417_v13 = vpop.eup %3416 }
0x1818   :  { %v3419_v56 = vpop.eup %3418  ;;  %v1813_v48 = vmul.f32 0.5, %v3417_v13  ;;  %v1857_v13 = vld [vmem:[#allocation15 + $0xf8] sm:$0xff] }
0x1819   :  { %v1814_v45 = vmul.f32 %v3419_v56, %v4230_v44  ;;  %v1876_v44 = vld [vmem:[#allocation15 + $0x190] sm:$0xff]  ;;  %v1846_v56 = vld [vmem:[#allocation15 + $0xa0] sm:$0xff]  ;;  %2065 = vmatpush.msrb.mxu1 %v1857_v13 }
0x181a   :  { %v4852_v9 = vadd.f32 0.5, %v1813_v48  ;;  %1962 = vmatpush.msrb.mxu0 %v1876_v44  ;;  %v1847_v48 = vld [vmem:[#allocation15 + $0xa8] sm:$0xff]  ;;  %2006 = vmatpush.msrb.mxu2 %v1846_v56  ;;  %v1899_v56 = vperm.slane %v1890_v23, 7 }
0x181b   :  { %v4855_v54 = vadd.f32 %v1814_v45, %v4242_v63  ;;  %v1867_v63 = vld [vmem:[#allocation15 + $0x148] sm:$0xff]  ;;  %v1848_v45 = vld [vmem:[#allocation15 + $0xb0] sm:$0xff] }
0x181c   :  { %1943 = vmatpush.msra.mxu3 %v1867_v63  ;;  %1963 = vmatpush.msrb.mxu0 %v1868_v7  ;;  %v1817_v20 = vmul.f32 %v4852_v9, %v4834_v51  ;;  %v2094_v63 = vld [vmem:[#allocation17 + $0x68] sm:$0xff]  ;;  %v2093_v7 = vld [vmem:[#allocation17 + $0x60] sm:$0xff] }
0x181d   :  { %v1818_v52 = vmul.f32 %v4855_v54, %v4852_v9  ;;  %v1849_v9 = vld [vmem:[#allocation15 + $0xb8] sm:$0xff] }
0x181e   :  { %1944 = vmatpush.msra.mxu3 %v1859_v38  ;;  %1964 = vmatpush.msrb.mxu0 %v1860_v12  ;;  %v2090_v38 = vld [vmem:[#allocation17 + $0x48] sm:$0xff]  ;;  %v2089_v12 = vld [vmem:[#allocation17 + $0x40] sm:$0xff] }
0x181f   :  { %1820 = vrot.lane.b32.xlu0 %v1818_v52, %s5215_s26  ;;  %v1838_v52 = vld [vmem:[#allocation15 + $0x60] sm:$0xff]  ;;  %2066 = vmatpush.msrb.mxu1 %v1849_v9 }
0x1820   :  { %1945 = vmatpush.msra.mxu3 %v1851_v30  ;;  %1965 = vmatpush.msrb.mxu0 %v1852_v41  ;;  %v2086_v30 = vld [vmem:[#allocation17 + $0x28] sm:$0xff]  ;;  %v2085_v41 = vld [vmem:[#allocation17 + $0x20] sm:$0xff] }
0x1821   :  { %2007 = vmatpush.msrb.mxu2 %v1838_v52  ;;  %v4917_v52 = vld [vmem:[%s5186_s12] ss:$0 sm:$0xff]  ;;  %s3820_s12 = smov 32  }
0x1822   :  { %1946 = vmatpush.msra.mxu3 %v1843_v22  ;;  %1966 = vmatpush.msrb.mxu0 %v1844_v47  ;;  %v2083_v22 = vld [vmem:[#allocation17 + $0x10] sm:$0xff] }
0x1823   :  { %2008 = vmatpush.msrb.mxu2 %v1830_v27  ;;  %v4877_v47 = vld [vmem:[#allocation18 + $0x10] sm:$0xff]  ;;  %v5221_v27 = vmov 0.5  }
0x1824   :  { %1947 = vmatpush.msra.mxu3 %v1835_v24  ;;  %1967 = vmatpush.msrb.mxu0 %v1836_v3  ;;  %v2081_v24 = vld [vmem:[#allocation17] sm:$0xff]  ;;  %v4925_v18 = vsel %vm267_vm15, 0.0, %v5221_v27 }
0x1825   :  { %v4885_v3 = vld [vmem:[#allocation18] sm:$0xff] }
0x1826   :  { %1948 = vmatpush.msra.mxu3 %v1827_v26  ;;  %1968 = vmatpush.msrb.mxu0 %v1828_v32  ;;  %v1892_v26 = vperm.slane %v1890_v23, 0 }
0x1828   :  { %2021 = vmatpush.msrb.mxu3 %v1887_v58  ;;  %2041 = vmatpush.msra.mxu0 %v1888_v55  ;;  %v1893_v58 = vperm.slane %v1890_v23, 1 }
0x182a   :  { %2022 = vmatpush.msrb.mxu3 %v1879_v15  ;;  %2042 = vmatpush.msra.mxu0 %v1880_v37 }
0x182c   :  { %2023 = vmatpush.msrb.mxu3 %v1871_v0  ;;  %2043 = vmatpush.msra.mxu0 %v1872_v6  ;;  %v1895_v0 = vperm.slane %v1890_v23, 3 }
0x182e   :  { %2024 = vmatpush.msrb.mxu3 %v1863_v16  ;;  %2044 = vmatpush.msra.mxu0 %v1864_v29  ;;  %v1897_v29 = vperm.slane %v1890_v23, 5 }
0x1830   :  { %2025 = vmatpush.msrb.mxu3 %v1855_v25  ;;  %2045 = vmatpush.msra.mxu0 %v1856_v8 }
0x1832   :  { %2026 = vmatpush.msrb.mxu3 %v1847_v48  ;;  %2046 = vmatpush.msra.mxu0 %v1848_v45 }
0x1834   :  { %2027 = vmatpush.msrb.mxu3 %v1839_v35  ;;  %2047 = vmatpush.msra.mxu0 %v1840_v57 }
0x1836   :  { %2028 = vmatpush.msrb.mxu3 %v1831_v14  ;;  %2048 = vmatpush.msra.mxu0 %v1832_v59  ;;  %v4921_v14 = vsel %vm267_vm15, 1.0, %v5221_v27 }
0x1891   :  { %v1821_v40 = vpop.permute.xlu0 %1820 }
0x1892   :  { %v1823_v53 = vadd.f32 %v1821_v40, %v1817_v20  ;;  %v1896_v40 = vperm.slane %v1890_v23, 4 }
0x1894   :  { %3420 = vtanh.f32 %v1823_v53 }
0x189a   :  { %v3421_v51 = vpop.eup %3420 }
0x189b   :  { %v1825_v17 = vmul.f32 %v3421_v51, %v4855_v54  ;;  %v1841_v54 = vld [vmem:[#allocation15 + $0x78] sm:$0xff] }
0x189c   :  { %2067 = vmatpush.msrb.mxu1 %v1841_v54 }
0x189d   :  { %1909 = vrot.lane.b32.xlu1 %v1825_v17, %s5215_s26  ;;  %v1898_v17 = vperm.slane %v1890_v23, 6 }
0x189e   :  { %2068 = vmatpush.msrb.mxu1 %v1833_v49 }
0x190f   :  { %v1910_v44 = vpop.permute.xlu1 %1909 }
0x1910   :  { %3253 = vmatmul.msk.f32.vlgmr.msra.gmra.mxu2 %vm332_vm0, %v1910_v44  ;;  %3254 = vmatmul.msk.f32.vlgmr.msra.gmra.mxu3 %vm332_vm0, %v1910_v44 }
0x1911   :  { %3255 = vmatmul.msk.f32.vlgmr.msrb.gmra.mxu0 %vm332_vm0, %v1910_v44  ;;  %3256 = vmatmul.msk.f32.vlgmr.msra.gmra.mxu1 %vm332_vm0, %v1910_v44 }
0x1912   :  { %2101 = vmatpush.msra.mxu2 %v2096_v19  ;;  %2170 = vmatpush.msra.mxu3 %v4872_v62 }
0x1913   :  { %2270 = vmatpush.msrb.mxu0 %v4872_v62  ;;  %2320 = vmatpush.msra.mxu1 %v4872_v62 }
0x1914   :  { %2102 = vmatpush.msra.mxu2 %v2095_v28  ;;  %2171 = vmatpush.msra.mxu3 %v4877_v47 }
0x1915   :  { %2271 = vmatpush.msrb.mxu0 %v4877_v47  ;;  %2321 = vmatpush.msra.mxu1 %v4877_v47 }
0x1916   :  { %2103 = vmatpush.msra.mxu2 %v2094_v63  ;;  %2172 = vmatpush.msra.mxu3 %v4880_v2 }
0x1917   :  { %2272 = vmatpush.msrb.mxu0 %v4880_v2  ;;  %2322 = vmatpush.msra.mxu1 %v4880_v2 }
0x1918   :  { %3257 = vmatmul.msk.f32.vlgmr.msrb.gmra.mxu2 %vm332_vm0, %v1910_v44  ;;  %3258 = vmatmul.msk.f32.vlgmr.msrb.gmra.mxu3 %vm332_vm0, %v1910_v44 }
0x1919   :  { %3259 = vmatmul.msk.f32.vlgmr.msra.gmra.mxu0 %vm332_vm0, %v1910_v44  ;;  %3260 = vmatmul.msk.f32.vlgmr.msrb.gmra.mxu1 %vm332_vm0, %v1910_v44  ;;  %vm2155_vm0 = vcmask 261120  }
0x191a   :  { %2104 = vmatpush.msra.mxu2 %v2093_v7  ;;  %2173 = vmatpush.msra.mxu3 %v4885_v3 }
0x191b   :  { %2273 = vmatpush.msrb.mxu0 %v4885_v3  ;;  %2323 = vmatpush.msra.mxu1 %v4885_v3 }
0x191c   :  { %2105 = vmatpush.msra.mxu2 %v2092_v10  ;;  %2220 = vmatpush.msrb.mxu3 %v4872_v62 }
0x191d   :  { %2420 = vmatpush.msra.mxu0 %v4872_v62  ;;  %2470 = vmatpush.msrb.mxu1 %v4872_v62 }
0x191e   :  { %2106 = vmatpush.msra.mxu2 %v2091_v21  ;;  %2221 = vmatpush.msrb.mxu3 %v4877_v47 }
0x191f   :  { %2421 = vmatpush.msra.mxu0 %v4877_v47  ;;  %2471 = vmatpush.msrb.mxu1 %v4877_v47 }
0x1920   :  { %2107 = vmatpush.msra.mxu2 %v2090_v38  ;;  %2174 = vmatmul.f32.vlgmr.msra.gmra.mxu3 %v5220_v31 }
0x1921   :  { %2222 = vmatpush.msrb.mxu3 %v4880_v2  ;;  %2422 = vmatpush.msra.mxu0 %v4880_v2 }
0x1922   :  { %2108 = vmatpush.msra.mxu2 %v2089_v12  ;;  %2472 = vmatpush.msrb.mxu1 %v4880_v2 }
0x1923   :  { %2223 = vmatpush.msrb.mxu3 %v4885_v3  ;;  %2423 = vmatpush.msra.mxu0 %v4885_v3 }
0x1924   :  { %2109 = vmatpush.msra.mxu2 %v2088_v42  ;;  %2473 = vmatpush.msrb.mxu1 %v4885_v3 }
0x1925   :  { %2370 = vmatpush.msra.mxu3 %v4872_v62 }
0x1926   :  { %2110 = vmatpush.msra.mxu2 %v2087_v36 }
0x1927   :  { %2371 = vmatpush.msra.mxu3 %v4877_v47 }
0x1928   :  { %2111 = vmatpush.msra.mxu2 %v2086_v30 }
0x1929   :  { %2372 = vmatpush.msra.mxu3 %v4880_v2 }
0x192a   :  { %2112 = vmatpush.msra.mxu2 %v2085_v41 }
0x192b   :  { %2373 = vmatpush.msra.mxu3 %v4885_v3 }
0x192c   :  { %2113 = vmatpush.msra.mxu2 %v2084_v33 }
0x192e   :  { %2114 = vmatpush.msra.mxu2 %v2083_v22 }
0x1930   :  { %2115 = vmatpush.msra.mxu2 %v2082_v4 }
0x1932   :  { %2116 = vmatpush.msra.mxu2 %v2081_v24 }
0x198e   :  { %v1970_v37 = vpop.f32.mrf.mxu0  ;;  %v1990_v20 = vpop.f32.mrf.mxu1 }
0x198f   :  { %v1971_v5 = vadd.f32 %v1970_v37, %v1894_v11  ;;  %v1991_v6 = vadd.f32 %v1990_v20, %v1895_v0 }
0x1991   :  { %v2075_v39 = vmax.f32 %v1971_v5, 0.0  ;;  %v2076_v1 = vmax.f32 %v1991_v6, 0.0 }
0x1993   :  { %v1930_v32 = vpop.f32.mrf.mxu2  ;;  %v1950_v55 = vpop.f32.mrf.mxu3 }
0x1994   :  { %v1931_v43 = vadd.f32 %v1930_v32, %v1892_v26  ;;  %v1951_v60 = vadd.f32 %v1950_v55, %v1893_v58 }
0x1996   :  { %v2073_v50 = vmax.f32 %v1931_v43, 0.0  ;;  %v2074_v15 = vmax.f32 %v1951_v60, 0.0  ;;  %v2050_v25 = vpop.f32.mrf.mxu0  ;;  %v2070_v48 = vpop.f32.mrf.mxu1 }
0x1997   :  { %v2051_v8 = vadd.f32 %v2050_v25, %v1898_v17  ;;  %v2071_v45 = vadd.f32 %v2070_v48, %v1899_v56 }
0x1998   :  { %2117 = vmatmul.f32.vlgmr.msra.gmra.mxu2 %v2073_v50 }
0x1999   :  { %v2079_v13 = vmax.f32 %v2051_v8, 0.0  ;;  %v2080_v9 = vmax.f32 %v2071_v45, 0.0 }
0x199b   :  { %v2010_v46 = vpop.f32.mrf.mxu2  ;;  %v2030_v34 = vpop.f32.mrf.mxu3 }
0x199c   :  { %v2011_v16 = vadd.f32 %v2010_v46, %v1896_v40  ;;  %v2031_v51 = vadd.f32 %v2030_v34, %v1897_v29 }
0x199e   :  { %v2077_v53 = vmax.f32 %v2011_v16, 0.0  ;;  %v2078_v61 = vmax.f32 %v2031_v51, 0.0 }
0x19a0   :  { %2120 = vmatmul.f32.gmra.mxu2 %v2074_v15 }
0x19a3   :  { %v2175_v57 = vpop.f32.mrf.mxu3 }
0x19a8   :  { %2123 = vmatmul.f32.gmra.mxu2 %v2075_v39 }
0x19b0   :  { %2126 = vmatmul.f32.gmra.mxu2 %v2076_v1 }
0x19b8   :  { %2129 = vmatmul.f32.gmra.mxu2 %v2077_v53 }
0x19c0   :  { %2132 = vmatmul.f32.gmra.mxu2 %v2078_v61 }
0x19c8   :  { %2135 = vmatmul.f32.gmra.mxu2 %v2079_v13 }
0x19d0   :  { %2138 = vmatmul.f32.gmra.mxu2 %v2080_v9 }
0x1a1b   :  { %v2118_v35 = vpop.f32.mrf.mxu2 }
0x1a1c   :  { %v2119_v54 = vadd.f32 %v4917_v52, %v2118_v35 }
0x1a1e   :  { %v2178_v59 = vadd.f32 %v2175_v57, %v2119_v54 }
0x1a20   :  { %v2179_v49 = vmul.f32 %v2178_v59, %v4921_v14 }
0x1a22   :  { %3422 = vtanh.f32 %v2179_v49 }
0x1a23   :  { %v2121_v41 = vpop.f32.mrf.mxu2 }
0x1a24   :  { %v2122_v33 = vadd.f32 %v4917_v52, %v2121_v41 }
0x1a28   :  { %v3423_v44 = vpop.eup %3422 }
0x1a29   :  { %v2181_v19 = vmul.f32 %v3423_v44, %v4921_v14 }
0x1a2b   :  { %v2182_v28 = vadd.f32 %v2181_v19, %v4925_v18  ;;  %v2124_v11 = vpop.f32.mrf.mxu2 }
0x1a2c   :  { %v2125_v15 = vadd.f32 %v4917_v52, %v2124_v11 }
0x1a2d   :  { %2185 = vrot.lane.b32.xlu2 %v2182_v28, %s5215_s26  ;;  %v2183_v10 = vmul.f32 0.0, %v2182_v28 }
0x1a33   :  { %v2127_v61 = vpop.f32.mrf.mxu2 }
0x1a34   :  { %v2128_v25 = vadd.f32 %v4917_v52, %v2127_v61  ;;  %v4994_v61 = vld [vmem:[#allocation21 + $0x10] sm:$0xff] }
0x1a87   :  { %v2186_v63 = vpop.permute.xlu2 %2185 }
0x1a88   :  { %v2188_v7 = vmul.f32 %v2186_v63, %v2182_v28  ;;  %v2130_v63 = vpop.f32.mrf.mxu2 }
0x1a8a   :  { %2190 = vrot.lane.b32.xlu0 %v2188_v7, %s3820_s12  ;;  %v2131_v7 = vadd.f32 %v4917_v52, %v2130_v63 }
0x1a90   :  { %v2133_v11 = vpop.f32.mrf.mxu2 }
0x1afc   :  { %v2191_v21 = vpop.permute.xlu0 %2190 }
0x1afd   :  { %v2193_v38 = vadd.f32 %v2191_v21, %v2183_v10 }
0x1aff   :  { %3424 = vtanh.f32 %v2193_v38 }
0x1b05   :  { %v3425_v12 = vpop.eup %3424 }
0x1b06   :  { %2196 = vrot.lane.b32.xlu1 %v3425_v12, %s5215_s26 }
0x1b78   :  { %v2197_v42 = vpop.permute.xlu1 %2196 }
0x1b79   :  { %v2199_v36 = vmul.f32 %v2197_v42, %v2182_v28 }
0x1b7b   :  { %2201 = vrot.lane.b32.xlu2 %v2199_v36, %s3820_s12 }
0x1bd5   :  { %v2202_v30 = vpop.permute.xlu2 %2201 }
0x1bd6   :  { %2204 = vst.msk [vmem:[#allocation5] sm:$0xff] %vm2155_vm0, %v2202_v30  ;;  %3261 = vmatmul.msk.f32.vlgmr.msrb.gmra.mxu3 %vm2155_vm0, %v2202_v30 }
0x1bd7   :  { %2520 = vmatpush.msrb.mxu3 %v4872_v62 }
0x1bd9   :  { %2521 = vmatpush.msrb.mxu3 %v4877_v47 }
0x1bdb   :  { %2522 = vmatpush.msrb.mxu3 %v4880_v2 }
0x1bdd   :  { %2523 = vmatpush.msrb.mxu3 %v4885_v3 }
0x1c59   :  { %v2225_v22 = vpop.f32.mrf.mxu3 }
0x1c5a   :  { %v2228_v4 = vadd.f32 %v2225_v22, %v2122_v33 }
0x1c5c   :  { %v2229_v24 = vmul.f32 %v2228_v4, %v4921_v14 }
0x1c5e   :  { %3426 = vtanh.f32 %v2229_v24 }
0x1c64   :  { %v3427_v23 = vpop.eup %3426 }
0x1c65   :  { %v2231_v26 = vmul.f32 %v3427_v23, %v4921_v14 }
0x1c67   :  { %v2232_v32 = vadd.f32 %v2231_v26, %v4925_v18 }
0x1c69   :  { %2235 = vrot.lane.b32.xlu0 %v2232_v32, %s5215_s26  ;;  %v2233_v2 = vmul.f32 %v2232_v32, %v2193_v38 }
0x1cdb   :  { %v2236_v62 = vpop.permute.xlu0 %2235 }
0x1cdc   :  { %v2238_v47 = vmul.f32 %v2236_v62, %v2232_v32  ;;  %v2565_v62 = vld [vmem:[#allocation20 + $0x10] sm:$0xff] }
0x1cde   :  { %2240 = vrot.lane.b32.xlu1 %v2238_v47, %s3820_s12  ;;  %v2564_v47 = vld [vmem:[#allocation20 + $0x8] sm:$0xff] }
0x1d50   :  { %v2241_v3 = vpop.permute.xlu1 %2240 }
0x1d51   :  { %v2243_v43 = vadd.f32 %v2241_v3, %v2233_v2  ;;  %v2563_v2 = vld [vmem:[#allocation20] sm:$0xff] }
0x1d53   :  { %3428 = vtanh.f32 %v2243_v43 }
0x1d59   :  { %v3429_v50 = vpop.eup %3428 }
0x1d5a   :  { %2246 = vrot.lane.b32.xlu2 %v3429_v50, %s5215_s26 }
0x1db4   :  { %v2247_v58 = vpop.permute.xlu2 %2246 }
0x1db5   :  { %v2249_v55 = vmul.f32 %v2247_v58, %v2232_v32  ;;  %v2566_v32 = vld [vmem:[#allocation20 + $0x18] sm:$0xff] }
0x1db7   :  { %2251 = vrot.lane.b32.xlu0 %v2249_v55, %s3820_s12 }
0x1e29   :  { %v2252_v60 = vpop.permute.xlu0 %2251 }
0x1e2a   :  { %2254 = vst.msk [vmem:[#allocation5 + $0x8] sm:$0xff] %vm2155_vm0, %v2252_v60  ;;  %3262 = vmatmul.msk.f32.vlgmr.msrb.gmra.mxu0 %vm2155_vm0, %v2252_v60 }
0x1e2b   :  { %2607 = vmatpush.msrb.mxu0 %v2566_v32 }
0x1e2d   :  { %2608 = vmatpush.msrb.mxu0 %v2565_v62 }
0x1e2f   :  { %2609 = vmatpush.msrb.mxu0 %v2564_v47 }
0x1e31   :  { %2610 = vmatpush.msrb.mxu0 %v2563_v2  ;;  %v2556_v50 = vld [vmem:[#allocation5 + $0x8] sm:$0xff] }
0x1ea7   :  { %v2275_v37 = vpop.f32.mrf.mxu0 }
0x1ea8   :  { %v2278_v5 = vadd.f32 %v2275_v37, %v2125_v15  ;;  %v2134_v15 = vadd.f32 %v4917_v52, %v2133_v11 }
0x1eaa   :  { %v2279_v39 = vmul.f32 %v2278_v5, %v4921_v14 }
0x1eac   :  { %3430 = vtanh.f32 %v2279_v39 }
0x1eb2   :  { %v3431_v0 = vpop.eup %3430 }
0x1eb3   :  { %v2281_v20 = vmul.f32 %v3431_v0, %v4921_v14 }
0x1eb5   :  { %v2282_v6 = vadd.f32 %v2281_v20, %v4925_v18 }
0x1eb7   :  { %2285 = vrot.lane.b32.xlu1 %v2282_v6, %s5215_s26  ;;  %v2283_v46 = vmul.f32 %v2282_v6, %v2243_v43  ;;  %v2555_v43 = vld [vmem:[#allocation5] sm:$0xff] }
0x1f29   :  { %v2286_v1 = vpop.permute.xlu1 %2285 }
0x1f2a   :  { %v2288_v40 = vmul.f32 %v2286_v1, %v2282_v6 }
0x1f2c   :  { %2290 = vrot.lane.b32.xlu2 %v2288_v40, %s3820_s12 }
0x1f86   :  { %v2291_v16 = vpop.permute.xlu2 %2290 }
0x1f87   :  { %v2293_v53 = vadd.f32 %v2291_v16, %v2283_v46 }
0x1f89   :  { %3432 = vtanh.f32 %v2293_v53 }
0x1f8f   :  { %v3433_v29 = vpop.eup %3432 }
0x1f90   :  { %2296 = vrot.lane.b32.xlu0 %v3433_v29, %s5215_s26 }
0x2002   :  { %v2297_v34 = vpop.permute.xlu0 %2296 }
0x2003   :  { %v2299_v51 = vmul.f32 %v2297_v34, %v2282_v6 }
0x2005   :  { %2301 = vrot.lane.b32.xlu1 %v2299_v51, %s3820_s12 }
0x2077   :  { %v2302_v17 = vpop.permute.xlu1 %2301 }
0x2078   :  { %2304 = vst.msk [vmem:[#allocation5 + $0x10] sm:$0xff] %vm2155_vm0, %v2302_v17  ;;  %3263 = vmatmul.msk.f32.vlgmr.msra.gmra.mxu1 %vm2155_vm0, %v2302_v17  ;;  %v4992_v17 = vld [vmem:[#allocation21 + $0x18] sm:$0xff] }
0x2079   :  { %2661 = vmatpush.msra.mxu1 %v4992_v17 }
0x207b   :  { %2662 = vmatpush.msra.mxu1 %v4994_v61 }
0x207f   :  { %v2557_v58 = vld [vmem:[#allocation5 + $0x10] sm:$0xff] }
0x20f5   :  { %v2325_v8 = vpop.f32.mrf.mxu1 }
0x20f6   :  { %v2328_v13 = vadd.f32 %v2325_v8, %v2128_v25  ;;  %v4998_v25 = vld [vmem:[#allocation21 + $0x8] sm:$0xff]  ;;  %v5002_v8 = vld [vmem:[#allocation21] sm:$0xff] }
0x20f7   :  { %2663 = vmatpush.msra.mxu1 %v4998_v25 }
0x20f8   :  { %v2329_v56 = vmul.f32 %v2328_v13, %v4921_v14 }
0x20f9   :  { %2664 = vmatpush.msra.mxu1 %v5002_v8 }
0x20fa   :  { %3434 = vtanh.f32 %v2329_v56 }
0x2100   :  { %v3435_v48 = vpop.eup %3434 }
0x2101   :  { %v2331_v45 = vmul.f32 %v3435_v48, %v4921_v14  ;;  %v2136_v48 = vpop.f32.mrf.mxu2 }
0x2103   :  { %v2332_v9 = vadd.f32 %v2331_v45, %v4925_v18  ;;  %v2137_v45 = vadd.f32 %v4917_v52, %v2136_v48 }
0x2105   :  { %2335 = vrot.lane.b32.xlu2 %v2332_v9, %s5215_s26  ;;  %v2333_v54 = vmul.f32 %v2332_v9, %v2293_v53 }
0x215f   :  { %v2336_v35 = vpop.permute.xlu2 %2335 }
0x2160   :  { %v2338_v57 = vmul.f32 %v2336_v35, %v2332_v9 }
0x2162   :  { %2340 = vrot.lane.b32.xlu0 %v2338_v57, %s3820_s12  ;;  %v5024_v57 = vld [vmem:[%s5189_s15] ss:$0 sm:$0xff]  ;;  %s3821_s15 = smov 96  }
0x21d4   :  { %v2341_v27 = vpop.permute.xlu0 %2340 }
0x21d5   :  { %v2343_v59 = vadd.f32 %v2341_v27, %v2333_v54 }
0x21d7   :  { %3436 = vtanh.f32 %v2343_v59 }
0x21dd   :  { %v3437_v49 = vpop.eup %3436 }
0x21de   :  { %2346 = vrot.lane.b32.xlu1 %v3437_v49, %s5215_s26 }
0x2250   :  { %v2347_v44 = vpop.permute.xlu1 %2346 }
0x2251   :  { %v2349_v19 = vmul.f32 %v2347_v44, %v2332_v9 }
0x2253   :  { %2351 = vrot.lane.b32.xlu2 %v2349_v19, %s3820_s12 }
0x22ad   :  { %v2352_v28 = vpop.permute.xlu2 %2351 }
0x22ae   :  { %2354 = vst.msk [vmem:[#allocation5 + $0x18] sm:$0xff] %vm2155_vm0, %v2352_v28  ;;  %3264 = vmatmul.msk.f32.vlgmr.msra.gmra.mxu3 %vm2155_vm0, %v2352_v28 }
0x22af   :  { %2711 = vmatpush.msra.mxu3 %v4992_v17 }
0x22b1   :  { %2712 = vmatpush.msra.mxu3 %v4994_v61 }
0x22b3   :  { %2713 = vmatpush.msra.mxu3 %v4998_v25 }
0x22b5   :  { %v2558_v55 = vld [vmem:[#allocation5 + $0x18] sm:$0xff]  ;;  %2714 = vmatpush.msra.mxu3 %v5002_v8 }
0x2331   :  { %v2375_v10 = vpop.f32.mrf.mxu3 }
0x2332   :  { %v2378_v21 = vadd.f32 %v2375_v10, %v2131_v7 }
0x2334   :  { %v2379_v38 = vmul.f32 %v2378_v21, %v4921_v14 }
0x2336   :  { %3438 = vtanh.f32 %v2379_v38 }
0x233c   :  { %v3439_v12 = vpop.eup %3438 }
0x233d   :  { %v2381_v42 = vmul.f32 %v3439_v12, %v4921_v14 }
0x233f   :  { %v2382_v36 = vadd.f32 %v2381_v42, %v4925_v18 }
0x2341   :  { %2385 = vrot.lane.b32.xlu0 %v2382_v36, %s5215_s26  ;;  %v2383_v33 = vmul.f32 %v2382_v36, %v2343_v59 }
0x23b3   :  { %v2386_v30 = vpop.permute.xlu0 %2385 }
0x23b4   :  { %v2388_v41 = vmul.f32 %v2386_v30, %v2382_v36 }
0x23b6   :  { %2390 = vrot.lane.b32.xlu1 %v2388_v41, %s3820_s12 }
0x2428   :  { %v2391_v22 = vpop.permute.xlu1 %2390 }
0x2429   :  { %v2393_v4 = vadd.f32 %v2391_v22, %v2383_v33 }
0x242b   :  { %3440 = vtanh.f32 %v2393_v4 }
0x2431   :  { %v3441_v24 = vpop.eup %3440 }
0x2432   :  { %2396 = vrot.lane.b32.xlu2 %v3441_v24, %s5215_s26 }
0x248c   :  { %v2397_v23 = vpop.permute.xlu2 %2396 }
0x248d   :  { %v2399_v26 = vmul.f32 %v2397_v23, %v2382_v36 }
0x248f   :  { %2401 = vrot.lane.b32.xlu0 %v2399_v26, %s3820_s12 }
0x2501   :  { %v2402_v3 = vpop.permute.xlu0 %2401 }
0x2502   :  { %2404 = vst.msk [vmem:[#allocation5 + $0x20] sm:$0xff] %vm2155_vm0, %v2402_v3  ;;  %3265 = vmatmul.msk.f32.vlgmr.msra.gmra.mxu0 %vm2155_vm0, %v2402_v3 }
0x2509   :  { %v2559_v60 = vld [vmem:[#allocation5 + $0x20] sm:$0xff] }
0x250a   :  { %3268 = vmatmul.msk.f32.vlgmr.msrb.gmra.mxu0 %vm2155_vm0, %v2555_v43 }
0x2512   :  { %3269 = vmatmul.msk.f32.gmra.mxu0 %vm2155_vm0, %v2556_v50 }
0x251a   :  { %3270 = vmatmul.msk.f32.gmra.mxu0 %vm2155_vm0, %v2557_v58  ;;  %v2139_v58 = vpop.f32.mrf.mxu2 }
0x2522   :  { %3271 = vmatmul.msk.f32.gmra.mxu0 %vm2155_vm0, %v2558_v55  ;;  %v2140_v55 = vadd.f32 %v4917_v52, %v2139_v58 }
0x252a   :  { %3272 = vmatmul.msk.f32.gmra.mxu0 %vm2155_vm0, %v2559_v60 }
0x257f   :  { %v2425_v37 = vpop.f32.mrf.mxu0 }
0x2580   :  { %v2428_v5 = vadd.f32 %v2425_v37, %v2134_v15 }
0x2582   :  { %v2429_v39 = vmul.f32 %v2428_v5, %v4921_v14 }
0x2584   :  { %3442 = vtanh.f32 %v2429_v39 }
0x2587   :  { %v2612_v54 = vpop.f32.mrf.mxu0 }
0x2588   :  { %v2613_v27 = vadd.f32 %v5024_v57, %v2612_v54 }
0x258a   :  { %v3443_v0 = vpop.eup %3442 }
0x258b   :  { %v2431_v20 = vmul.f32 %v3443_v0, %v4921_v14 }
0x258d   :  { %v2432_v6 = vadd.f32 %v2431_v20, %v4925_v18 }
0x258f   :  { %2435 = vrot.lane.b32.xlu1 %v2432_v6, %s5215_s26  ;;  %v2433_v46 = vmul.f32 %v2432_v6, %v2393_v4  ;;  %v2615_v15 = vpop.f32.mrf.mxu0 }
0x2590   :  { %v2616_v37 = vadd.f32 %v5024_v57, %v2615_v15 }
0x2601   :  { %v2436_v1 = vpop.permute.xlu1 %2435 }
0x2602   :  { %v2438_v40 = vmul.f32 %v2436_v1, %v2432_v6 }
0x2604   :  { %2440 = vrot.lane.b32.xlu2 %v2438_v40, %s3820_s12 }
0x265e   :  { %v2441_v16 = vpop.permute.xlu2 %2440 }
0x265f   :  { %v2443_v53 = vadd.f32 %v2441_v16, %v2433_v46 }
0x2661   :  { %3444 = vtanh.f32 %v2443_v53 }
0x2667   :  { %v3445_v29 = vpop.eup %3444 }
0x2668   :  { %2446 = vrot.lane.b32.xlu0 %v3445_v29, %s5215_s26 }
0x26da   :  { %v2447_v34 = vpop.permute.xlu0 %2446 }
0x26db   :  { %v2449_v51 = vmul.f32 %v2447_v34, %v2432_v6 }
0x26dd   :  { %2451 = vrot.lane.b32.xlu1 %v2449_v51, %s3820_s12 }
0x274f   :  { %v2452_v13 = vpop.permute.xlu1 %2451 }
0x2750   :  { %2454 = vst.msk [vmem:[#allocation5 + $0x28] sm:$0xff] %vm2155_vm0, %v2452_v13  ;;  %3266 = vmatmul.msk.f32.vlgmr.msrb.gmra.mxu1 %vm2155_vm0, %v2452_v13 }
0x2751   :  { %2764 = vmatpush.msrb.mxu1 %v4992_v17 }
0x2753   :  { %2765 = vmatpush.msrb.mxu1 %v4994_v61 }
0x2755   :  { %2766 = vmatpush.msrb.mxu1 %v4998_v25 }
0x2757   :  { %v2560_v56 = vld [vmem:[#allocation5 + $0x28] sm:$0xff]  ;;  %2767 = vmatpush.msrb.mxu1 %v5002_v8 }
0x2758   :  { %3273 = vmatmul.msk.f32.gmra.mxu0 %vm2155_vm0, %v2560_v56  ;;  %2665 = vmatmul.f32.vlgmr.msra.gmra.mxu1 %v5220_v31  ;;  %v2618_v56 = vpop.f32.mrf.mxu0 }
0x2759   :  { %2867 = vmatpush.msra.mxu1 %v4992_v17  ;;  %v2619_v48 = vadd.f32 %v5024_v57, %v2618_v56 }
0x275b   :  { %2868 = vmatpush.msra.mxu1 %v4994_v61 }
0x275d   :  { %2869 = vmatpush.msra.mxu1 %v4998_v25 }
0x275f   :  { %2870 = vmatpush.msra.mxu1 %v5002_v8 }
0x27cd   :  { %v2475_v9 = vpop.f32.mrf.mxu1 }
0x27ce   :  { %v2478_v35 = vadd.f32 %v2475_v9, %v2137_v45 }
0x27d0   :  { %v2479_v31 = vmul.f32 %v2478_v35, %v4921_v14 }
0x27d2   :  { %3446 = vtanh.f32 %v2479_v31 }
0x27d5   :  { %v2666_v59 = vpop.f32.mrf.mxu1 }
0x27d6   :  { %v2669_v49 = vadd.f32 %v2666_v59, %v2613_v27 }
0x27d8   :  { %v3447_v44 = vpop.eup %3446  ;;  %v2670_v19 = vmul.f32 %v2669_v49, %v4921_v14 }
0x27d9   :  { %v2481_v28 = vmul.f32 %v3447_v44, %v4921_v14 }
0x27da   :  { %3448 = vtanh.f32 %v2670_v19 }
0x27db   :  { %v2482_v63 = vadd.f32 %v2481_v28, %v4925_v18 }
0x27dd   :  { %2485 = vrot.lane.b32.xlu2 %v2482_v63, %s5215_s26  ;;  %v2483_v30 = vmul.f32 %v2482_v63, %v2443_v53 }
0x27e0   :  { %v3449_v7 = vpop.eup %3448 }
0x27e1   :  { %v2672_v10 = vmul.f32 %v3449_v7, %v4921_v14 }
0x27e3   :  { %v2673_v21 = vadd.f32 %v2672_v10, %v4925_v18 }
0x27e5   :  { %2676 = vrot.lane.b32.xlu0 %v2673_v21, %s5215_s26  ;;  %v2674_v22 = vmul.f32 0.0, %v2673_v21 }
0x2837   :  { %v2486_v38 = vpop.permute.xlu2 %2485 }
0x2838   :  { %v2488_v12 = vmul.f32 %v2486_v38, %v2482_v63  ;;  %v2621_v38 = vpop.f32.mrf.mxu0 }
0x283a   :  { %2490 = vrot.lane.b32.xlu1 %v2488_v12, %s3820_s12  ;;  %v2622_v12 = vadd.f32 %v5024_v57, %v2621_v38 }
0x2857   :  { %v2677_v42 = vpop.permute.xlu0 %2676 }
0x2858   :  { %v2679_v36 = vmul.f32 %v2677_v42, %v2673_v21 }
0x285a   :  { %2681 = vrot.lane.b32.xlu2 %v2679_v36, %s3820_s12 }
0x28ac   :  { %v2491_v41 = vpop.permute.xlu1 %2490 }
0x28ad   :  { %v5037_v33 = vadd.f32 %v2491_v41, %v2483_v30 }
0x28af   :  { %3450 = vtanh.f32 %v5037_v33 }
0x28b4   :  { %v2682_v4 = vpop.permute.xlu2 %2681 }
0x28b5   :  { %v3451_v24 = vpop.eup %3450  ;;  %v2684_v23 = vadd.f32 %v2682_v4, %v2674_v22 }
0x28b6   :  { %2496 = vrot.lane.b32.xlu0 %v3451_v24, %s5215_s26 }
0x28b7   :  { %3452 = vtanh.f32 %v2684_v23 }
0x28bd   :  { %v3453_v26 = vpop.eup %3452 }
0x28be   :  { %2687 = vrot.lane.b32.xlu1 %v3453_v26, %s5215_s26 }
0x2928   :  { %v2497_v32 = vpop.permute.xlu0 %2496 }
0x2929   :  { %v2499_v62 = vmul.f32 %v2497_v32, %v2482_v63 }
0x292b   :  { %2501 = vrot.lane.b32.xlu2 %v2499_v62, %s3820_s12 }
0x2930   :  { %v2688_v47 = vpop.permute.xlu1 %2687 }
0x2931   :  { %v2690_v2 = vmul.f32 %v2688_v47, %v2673_v21  ;;  %v2624_v47 = vpop.f32.mrf.mxu0 }
0x2933   :  { %2692 = vrot.lane.b32.xlu0 %v2690_v2, %s3820_s12  ;;  %v2625_v2 = vadd.f32 %v5024_v57, %v2624_v47 }
0x2985   :  { %v2502_v3 = vpop.permute.xlu2 %2501 }
0x2986   :  { %2504 = vst.msk [vmem:[#allocation5 + $0x30] sm:$0xff] %vm2155_vm0, %v2502_v3  ;;  %3267 = vmatmul.msk.f32.vlgmr.msrb.gmra.mxu3 %vm2155_vm0, %v2502_v3 }
0x2987   :  { %2817 = vmatpush.msrb.mxu3 %v4992_v17 }
0x2989   :  { %2818 = vmatpush.msrb.mxu3 %v4994_v61 }
0x298b   :  { %2819 = vmatpush.msrb.mxu3 %v4998_v25 }
0x298d   :  { %v2561_v43 = vld [vmem:[#allocation5 + $0x30] sm:$0xff]  ;;  %2820 = vmatpush.msrb.mxu3 %v5002_v8 }
0x298e   :  { %3274 = vmatmul.msk.f32.gmra.mxu0 %vm2155_vm0, %v2561_v43 }
0x29a5   :  { %v2693_v50 = vpop.permute.xlu0 %2692 }
0x29a6   :  { %2695 = vst.msk [vmem:[#allocation6] sm:$0xff] %vm2155_vm0, %v2693_v50  ;;  %3276 = vmatmul.msk.f32.vlgmr.msra.gmra.mxu3 %vm2155_vm0, %v2693_v50 }
0x29a7   :  { %2917 = vmatpush.msra.mxu3 %v4992_v17 }
0x29a9   :  { %2918 = vmatpush.msra.mxu3 %v4994_v61 }
0x29ab   :  { %2919 = vmatpush.msra.mxu3 %v4998_v25 }
0x29ad   :  { %2920 = vmatpush.msra.mxu3 %v5002_v8 }
0x2a09   :  { %v2525_v60 = vpop.f32.mrf.mxu3 }
0x2a0a   :  { %v5058_v11 = vadd.f32 %v2525_v60, %v2140_v55 }
0x2a29   :  { %v2716_v5 = vpop.f32.mrf.mxu3 }
0x2a2a   :  { %v2719_v39 = vadd.f32 %v2716_v5, %v2616_v37 }
0x2a2c   :  { %v2720_v0 = vmul.f32 %v2719_v39, %v4921_v14 }
0x2a2e   :  { %3454 = vtanh.f32 %v2720_v0 }
0x2a34   :  { %v3455_v20 = vpop.eup %3454 }
0x2a35   :  { %v2722_v6 = vmul.f32 %v3455_v20, %v4921_v14 }
0x2a37   :  { %v2723_v1 = vadd.f32 %v2722_v6, %v4925_v18 }
0x2a39   :  { %2726 = vrot.lane.b32.xlu1 %v2723_v1, %s5215_s26  ;;  %v2724_v46 = vmul.f32 %v2723_v1, %v2684_v23 }
0x2aab   :  { %v2727_v40 = vpop.permute.xlu1 %2726 }
0x2aac   :  { %v2729_v52 = vmul.f32 %v2727_v40, %v2723_v1 }
0x2aae   :  { %2731 = vrot.lane.b32.xlu2 %v2729_v52, %s3820_s12  ;;  %v2627_v52 = vpop.f32.mrf.mxu0 }
0x2b08   :  { %v2732_v16 = vpop.permute.xlu2 %2731 }
0x2b09   :  { %v2734_v53 = vadd.f32 %v2732_v16, %v2724_v46  ;;  %v2628_v46 = vadd.f32 %v5024_v57, %v2627_v52 }
0x2b0b   :  { %3456 = vtanh.f32 %v2734_v53 }
0x2b11   :  { %v3457_v29 = vpop.eup %3456 }
0x2b12   :  { %2737 = vrot.lane.b32.xlu0 %v3457_v29, %s5215_s26 }
0x2b84   :  { %v2738_v34 = vpop.permute.xlu0 %2737 }
0x2b85   :  { %v5067_v51 = vmul.f32 %v2738_v34, %v2723_v1 }
0x2b87   :  { %2748 = vrot.lane.b32.xlu1 %v5067_v51, %s3820_s12 }
0x2bf9   :  { %v2749_v13 = vpop.permute.xlu1 %2748 }
0x2bfa   :  { %3277 = vmatmul.msk.f32.vlgmr.msrb.gmra.mxu1 %vm2155_vm0, %v2749_v13 }
0x2bfb   :  { %2969 = vmatpush.msrb.mxu1 %v4992_v17 }
0x2bfd   :  { %2970 = vmatpush.msrb.mxu1 %v4994_v61 }
0x2bff   :  { %2971 = vmatpush.msrb.mxu1 %v4998_v25 }
0x2c01   :  { %2972 = vmatpush.msrb.mxu1 %v5002_v8 }
0x2c77   :  { %v2769_v45 = vpop.f32.mrf.mxu1 }
0x2c78   :  { %v2772_v9 = vadd.f32 %v2769_v45, %v2619_v48  ;;  %v2529_v48 = vmul.f32 %v5058_v11, %v4921_v14 }
0x2c7a   :  { %v2773_v35 = vmul.f32 %v2772_v9, %v4921_v14 }
0x2c7c   :  { %3458 = vtanh.f32 %v2773_v35 }
0x2c82   :  { %v3459_v31 = vpop.eup %3458 }
0x2c83   :  { %v2775_v54 = vmul.f32 %v3459_v31, %v4921_v14 }
0x2c85   :  { %v2776_v27 = vadd.f32 %v2775_v54, %v4925_v18 }
0x2c87   :  { %2779 = vrot.lane.b32.xlu2 %v2776_v27, %s5215_s26  ;;  %v2777_v44 = vmul.f32 %v2776_v27, %v2734_v53 }
0x2ce1   :  { %v2780_v59 = vpop.permute.xlu2 %2779 }
0x2ce2   :  { %v2782_v49 = vmul.f32 %v2780_v59, %v2776_v27 }
0x2ce4   :  { %2784 = vrot.lane.b32.xlu0 %v2782_v49, %s3820_s12 }
0x2d56   :  { %v2785_v19 = vpop.permute.xlu0 %2784 }
0x2d57   :  { %v2787_v28 = vadd.f32 %v2785_v19, %v2777_v44 }
0x2d59   :  { %3460 = vtanh.f32 %v2787_v28 }
0x2d5f   :  { %v3461_v63 = vpop.eup %3460 }
0x2d60   :  { %2790 = vrot.lane.b32.xlu1 %v3461_v63, %s5215_s26 }
0x2dd2   :  { %v2791_v7 = vpop.permute.xlu1 %2790 }
0x2dd3   :  { %v5083_v10 = vmul.f32 %v2791_v7, %v2776_v27 }
0x2dd5   :  { %2801 = vrot.lane.b32.xlu2 %v5083_v10, %s3820_s12 }
0x2e2f   :  { %v2802_v21 = vpop.permute.xlu2 %2801 }
0x2e30   :  { %3278 = vmatmul.msk.f32.vlgmr.msrb.gmra.mxu3 %vm2155_vm0, %v2802_v21  ;;  %v2630_v21 = vpop.f32.mrf.mxu0 }
0x2e31   :  { %3021 = vmatpush.msrb.mxu3 %v4992_v17  ;;  %v2631_v38 = vadd.f32 %v5024_v57, %v2630_v21  ;;  %v3062_v21 = vld [vmem:[#allocation23 + $0x40] sm:$0xff] }
0x2e33   :  { %3022 = vmatpush.msrb.mxu3 %v4994_v61 }
0x2e35   :  { %3023 = vmatpush.msrb.mxu3 %v4998_v25 }
0x2e37   :  { %3024 = vmatpush.msrb.mxu3 %v5002_v8 }
0x2eb3   :  { %v2822_v42 = vpop.f32.mrf.mxu3 }
0x2eb4   :  { %v2825_v36 = vadd.f32 %v2822_v42, %v2622_v12 }
0x2eb6   :  { %v2826_v30 = vmul.f32 %v2825_v36, %v4921_v14 }
0x2eb8   :  { %3462 = vtanh.f32 %v2826_v30 }
0x2ebe   :  { %v3463_v41 = vpop.eup %3462 }
0x2ebf   :  { %v2828_v22 = vmul.f32 %v3463_v41, %v4921_v14 }
0x2ec1   :  { %v2829_v4 = vadd.f32 %v2828_v22, %v4925_v18 }
0x2ec3   :  { %2832 = vrot.lane.b32.xlu0 %v2829_v4, %s5215_s26  ;;  %v2830_v25 = vmul.f32 %v2829_v4, %v2787_v28 }
0x2f35   :  { %v2833_v17 = vpop.permute.xlu0 %2832 }
0x2f36   :  { %v2835_v61 = vmul.f32 %v2833_v17, %v2829_v4 }
0x2f38   :  { %2837 = vrot.lane.b32.xlu1 %v2835_v61, %s3820_s12 }
0x2faa   :  { %v2838_v8 = vpop.permute.xlu1 %2837 }
0x2fab   :  { %v2840_v24 = vadd.f32 %v2838_v8, %v2830_v25 }
0x2fad   :  { %3464 = vtanh.f32 %v2840_v24 }
0x2fb3   :  { %v3465_v23 = vpop.eup %3464 }
0x2fb4   :  { %2843 = vrot.lane.b32.xlu2 %v3465_v23, %s5215_s26 }
0x300e   :  { %v2844_v26 = vpop.permute.xlu2 %2843 }
0x300f   :  { %v5099_v32 = vmul.f32 %v2844_v26, %v2829_v4 }
0x3011   :  { %2851 = vrot.lane.b32.xlu0 %v5099_v32, %s3820_s12 }
0x3083   :  { %v2852_v62 = vpop.permute.xlu0 %2851 }
0x3084   :  { %3279 = vmatmul.msk.f32.vlgmr.msra.gmra.mxu1 %vm2155_vm0, %v2852_v62 }
0x3101   :  { %v2872_v3 = vpop.f32.mrf.mxu1 }
0x3102   :  { %v2875_v43 = vadd.f32 %v2872_v3, %v2625_v2 }
0x3104   :  { %v2876_v50 = vmul.f32 %v2875_v43, %v4921_v14 }
0x3106   :  { %3466 = vtanh.f32 %v2876_v50 }
0x310c   :  { %v3467_v58 = vpop.eup %3466 }
0x310d   :  { %v2878_v55 = vmul.f32 %v3467_v58, %v4921_v14 }
0x310f   :  { %v2879_v60 = vadd.f32 %v2878_v55, %v4925_v18 }
0x3111   :  { %2882 = vrot.lane.b32.xlu1 %v2879_v60, %s5215_s26  ;;  %v2880_v5 = vmul.f32 %v2879_v60, %v2840_v24 }
0x3183   :  { %v2883_v15 = vpop.permute.xlu1 %2882 }
0x3184   :  { %v2885_v37 = vmul.f32 %v2883_v15, %v2879_v60 }
0x3186   :  { %2887 = vrot.lane.b32.xlu2 %v2885_v37, %s3820_s12 }
0x31e0   :  { %v2888_v39 = vpop.permute.xlu2 %2887 }
0x31e1   :  { %v2890_v0 = vadd.f32 %v2888_v39, %v2880_v5 }
0x31e3   :  { %3468 = vtanh.f32 %v2890_v0 }
0x31e9   :  { %v3469_v20 = vpop.eup %3468 }
0x31ea   :  { %2893 = vrot.lane.b32.xlu0 %v3469_v20, %s5215_s26 }
0x325c   :  { %v2894_v6 = vpop.permute.xlu0 %2893 }
0x325d   :  { %v2896_v1 = vmul.f32 %v2894_v6, %v2879_v60 }
0x325f   :  { %2898 = vrot.lane.b32.xlu1 %v2896_v1, %s3820_s12 }
0x32d1   :  { %v2899_v40 = vpop.permute.xlu1 %2898 }
0x32d2   :  { %2901 = vst.msk [vmem:[#allocation6 + $0x8] sm:$0xff] %vm2155_vm0, %v2899_v40  ;;  %3280 = vmatmul.msk.f32.vlgmr.msra.gmra.mxu3 %vm2155_vm0, %v2899_v40 }
0x3355   :  { %v2922_v16 = vpop.f32.mrf.mxu3 }
0x3356   :  { %v2925_v53 = vadd.f32 %v2922_v16, %v2628_v46  ;;  %v3084_v46 = vld [vmem:[#allocation23 + $0xf0] sm:$0xff]  ;;  %v3083_v16 = vld [vmem:[#allocation23 + $0xe8] sm:$0xff] }
0x3358   :  { %v2926_v29 = vmul.f32 %v2925_v53, %v4921_v14  ;;  %v3068_v53 = vld [vmem:[#allocation23 + $0x70] sm:$0xff] }
0x335a   :  { %3470 = vtanh.f32 %v2926_v29  ;;  %v3067_v29 = vld [vmem:[#allocation23 + $0x68] sm:$0xff] }
0x335b   :  { %3472 = vtanh.f32 %v2529_v48  ;;  %v3065_v48 = vld [vmem:[#allocation23 + $0x58] sm:$0xff] }
0x3360   :  { %v3471_v34 = vpop.eup %3470 }
0x3361   :  { %v2928_v13 = vmul.f32 %v3471_v34, %v4921_v14  ;;  %v3473_v35 = vpop.eup %3472  ;;  %v3081_v34 = vld [vmem:[#allocation23 + $0xd8] sm:$0xff] }
0x3362   :  { %v2531_v31 = vmul.f32 %v3473_v35, %v4921_v14  ;;  %v3078_v35 = vld [vmem:[#allocation23 + $0xc0] sm:$0xff] }
0x3363   :  { %v2929_v56 = vadd.f32 %v2928_v13, %v4925_v18  ;;  %v3066_v13 = vld [vmem:[#allocation23 + $0x60] sm:$0xff] }
0x3364   :  { %v2532_v54 = vadd.f32 %v2531_v31, %v4925_v18 }
0x3365   :  { %2932 = vrot.lane.b32.xlu2 %v2929_v56, %s5215_s26  ;;  %v2930_v27 = vmul.f32 %v2929_v56, %v2890_v0 }
0x3366   :  { %v2533_v22 = vmul.f32 %v2532_v54, %v5037_v33 }
0x33bf   :  { %v2933_v45 = vpop.permute.xlu2 %2932 }
0x33c0   :  { %v2935_v9 = vmul.f32 %v2933_v45, %v2929_v56  ;;  %v3079_v45 = vld [vmem:[#allocation23 + $0xc8] sm:$0xff] }
0x33c2   :  { %2937 = vrot.lane.b32.xlu0 %v2935_v9, %s3820_s12  ;;  %v3064_v9 = vld [vmem:[#allocation23 + $0x50] sm:$0xff] }
0x33ca   :  { %2535 = vrot.lane.b32.xlu0 %v2532_v54, %s5215_s26 }
0x3434   :  { %v2938_v59 = vpop.permute.xlu0 %2937 }
0x3435   :  { %v2940_v49 = vadd.f32 %v2938_v59, %v2930_v27  ;;  %v3077_v59 = vld [vmem:[#allocation23 + $0xb8] sm:$0xff] }
0x3437   :  { %3474 = vtanh.f32 %v2940_v49 }
0x343c   :  { %v2536_v28 = vpop.permute.xlu0 %2535 }
0x343d   :  { %v3475_v44 = vpop.eup %3474  ;;  %v2538_v63 = vmul.f32 %v2536_v28, %v2532_v54 }
0x343e   :  { %2943 = vrot.lane.b32.xlu1 %v3475_v44, %s5215_s26  ;;  %v3076_v44 = vld [vmem:[#allocation23 + $0xb0] sm:$0xff] }
0x34b0   :  { %v2944_v11 = vpop.permute.xlu1 %2943 }
0x34b1   :  { %v2946_v19 = vmul.f32 %v2944_v11, %v2929_v56  ;;  %v3080_v56 = vld [vmem:[#allocation23 + $0xd0] sm:$0xff]  ;;  %v3075_v11 = vld [vmem:[#allocation23 + $0xa8] sm:$0xff] }
0x34b3   :  { %2953 = vrot.lane.b32.xlu2 %v2946_v19, %s3820_s12 }
0x34bb   :  { %2540 = vrot.lane.b32.xlu2 %v2538_v63, %s3820_s12  ;;  %v3073_v63 = vld [vmem:[#allocation23 + $0x98] sm:$0xff] }
0x350d   :  { %v2954_v7 = vpop.permute.xlu2 %2953 }
0x350e   :  { %3281 = vmatmul.msk.f32.vlgmr.msrb.gmra.mxu1 %vm2155_vm0, %v2954_v7 }
0x3515   :  { %v2541_v30 = vpop.permute.xlu2 %2540 }
0x3516   :  { %v2543_v17 = vadd.f32 %v2541_v30, %v2533_v22  ;;  %v3059_v30 = vld [vmem:[#allocation23 + $0x28] sm:$0xff]  ;;  %v3070_v22 = vld [vmem:[#allocation23 + $0x80] sm:$0xff] }
0x358b   :  { %v2974_v12 = vpop.f32.mrf.mxu1 }
0x358c   :  { %v2977_v42 = vadd.f32 %v2974_v12, %v2631_v38  ;;  %v3072_v38 = vld [vmem:[#allocation23 + $0x90] sm:$0xff]  ;;  %v3061_v12 = vld [vmem:[#allocation23 + $0x38] sm:$0xff] }
0x358e   :  { %v2978_v36 = vmul.f32 %v2977_v42, %v4921_v14  ;;  %v3060_v42 = vld [vmem:[#allocation23 + $0x30] sm:$0xff] }
0x3590   :  { %3476 = vtanh.f32 %v2978_v36  ;;  %v3071_v36 = vld [vmem:[#allocation23 + $0x88] sm:$0xff] }
0x3591   :  { %3478 = vtanh.f32 %v2543_v17  ;;  %v3056_v17 = vld [vmem:[#allocation23 + $0x10] sm:$0xff] }
0x3596   :  { %v3477_v41 = vpop.eup %3476 }
0x3597   :  { %v2980_v4 = vmul.f32 %v3477_v41, %v4921_v14  ;;  %v3479_v25 = vpop.eup %3478  ;;  %v3058_v41 = vld [vmem:[#allocation23 + $0x20] sm:$0xff] }
0x3599   :  { %v2981_v61 = vadd.f32 %v2980_v4, %v4925_v18  ;;  %v3057_v4 = vld [vmem:[#allocation23 + $0x18] sm:$0xff] }
0x359b   :  { %2984 = vrot.lane.b32.xlu1 %v2981_v61, %s5215_s26  ;;  %v2982_v33 = vmul.f32 %v2981_v61, %v2940_v49 }
0x35a3   :  { %2546 = vrot.lane.b32.xlu1 %v3479_v25, %s5215_s26  ;;  %v3146_v25 = vld [vmem:[#allocation24 + $0x78] sm:$0xff] }
0x35a4   :  { %3151 = vmatpush.msra.mxu3 %v3146_v25 }
0x360d   :  { %v2985_v8 = vpop.permute.xlu1 %2984 }
0x360e   :  { %v2987_v24 = vmul.f32 %v2985_v8, %v2981_v61  ;;  %v3145_v8 = vld [vmem:[#allocation24 + $0x70] sm:$0xff] }
0x360f   :  { %3152 = vmatpush.msra.mxu3 %v3145_v8 }
0x3610   :  { %2989 = vrot.lane.b32.xlu0 %v2987_v24, %s3820_s12  ;;  %v3144_v24 = vld [vmem:[#allocation24 + $0x68] sm:$0xff] }
0x3611   :  { %3153 = vmatpush.msra.mxu3 %v3144_v24 }
0x3615   :  { %v2547_v23 = vpop.permute.xlu1 %2546 }
0x3616   :  { %v2549_v26 = vmul.f32 %v2547_v23, %v2532_v54  ;;  %v3063_v54 = vld [vmem:[#allocation23 + $0x48] sm:$0xff]  ;;  %v3143_v23 = vld [vmem:[#allocation24 + $0x60] sm:$0xff] }
0x3617   :  { %3154 = vmatpush.msra.mxu3 %v3143_v23 }
0x3618   :  { %2551 = vrot.lane.b32.xlu0 %v2549_v26, %s3820_s12  ;;  %v3142_v26 = vld [vmem:[#allocation24 + $0x58] sm:$0xff] }
0x3619   :  { %3155 = vmatpush.msra.mxu3 %v3142_v26 }
0x3682   :  { %v2990_v62 = vpop.permute.xlu0 %2989 }
0x3683   :  { %v2992_v47 = vadd.f32 %v2990_v62, %v2982_v33  ;;  %v3141_v33 = vld [vmem:[#allocation24 + $0x50] sm:$0xff]  ;;  %v3140_v62 = vld [vmem:[#allocation24 + $0x48] sm:$0xff] }
0x3684   :  { %3156 = vmatpush.msra.mxu3 %v3141_v33 }
0x3685   :  { %3480 = vtanh.f32 %v2992_v47 }
0x3686   :  { %3157 = vmatpush.msra.mxu3 %v3140_v62 }
0x368a   :  { %v2552_v2 = vpop.permute.xlu0 %2551 }
0x368b   :  { %v3481_v3 = vpop.eup %3480  ;;  %2554 = vst.msk [vmem:[#allocation5 + $0x38] sm:$0xff] %vm2155_vm0, %v2552_v2 }
0x368c   :  { %2995 = vrot.lane.b32.xlu2 %v3481_v3, %s5215_s26  ;;  %v3138_v3 = vld [vmem:[#allocation24 + $0x38] sm:$0xff] }
0x3692   :  { %v2562_v43 = vld [vmem:[#allocation5 + $0x38] sm:$0xff] }
0x3693   :  { %3275 = vmatmul.msk.f32.gmra.mxu0 %vm2155_vm0, %v2562_v43 }
0x36e6   :  { %v2996_v50 = vpop.permute.xlu2 %2995 }
0x36e7   :  { %v2998_v58 = vmul.f32 %v2996_v50, %v2981_v61  ;;  %v3054_v61 = vld [vmem:[#allocation23] sm:$0xff]  ;;  %v3137_v50 = vld [vmem:[#allocation24 + $0x30] sm:$0xff] }
0x36e9   :  { %3005 = vrot.lane.b32.xlu1 %v2998_v58, %s3820_s12 }
0x36f1   :  { %2948 = vrot.lane.b32.xlu1 %v2946_v19, %s5215_s26  ;;  %v3074_v19 = vld [vmem:[#allocation23 + $0xa0] sm:$0xff] }
0x36f9   :  { %2742 = vrot.lane.b32.xlu1 %v5067_v51, %s5215_s26 }
0x3710   :  { %v2633_v37 = vpop.f32.mrf.mxu0 }
0x3711   :  { %v2634_v5 = vadd.f32 %v5024_v57, %v2633_v37  ;;  %v3085_v57 = vld [vmem:[#allocation23 + $0xf8] sm:$0xff] }
0x3712   :  { %3110 = vmatpush.msrb.mxu2 %v3085_v57  ;;  %v3325_v57 = vld [vmem:[%s5193_s19] ss:$0 sm:$0xff] }
0x3714   :  { %3111 = vmatpush.msrb.mxu2 %v3084_v46 }
0x3716   :  { %3112 = vmatpush.msrb.mxu2 %v3083_v16 }
0x375b   :  { %v3006_v55 = vpop.permute.xlu1 %3005 }
0x375c   :  { %3282 = vmatmul.msk.f32.vlgmr.msrb.gmra.mxu3 %vm2155_vm0, %v3006_v55  ;;  %v3135_v55 = vld [vmem:[#allocation24 + $0x20] sm:$0xff] }
0x3763   :  { %v2949_v60 = vpop.permute.xlu1 %2948 }
0x3764   :  { %2951 = vst.msk [vmem:[#allocation6 + $0x8] sm:$0xff] %vm2745_vm1, %v2949_v60 }
0x376b   :  { %v2743_v15 = vpop.permute.xlu1 %2742 }
0x376c   :  { %2746 = vst.msk [vmem:[#allocation6] sm:$0xff] %vm2745_vm1, %v2743_v15 }
0x37df   :  { %v3026_v39 = vpop.f32.mrf.mxu3 }
0x37e0   :  { %v3029_v0 = vadd.f32 %v3026_v39, %v2634_v5  ;;  %v3134_v5 = vld [vmem:[#allocation24 + $0x18] sm:$0xff]  ;;  %v3133_v39 = vld [vmem:[#allocation24 + $0x10] sm:$0xff] }
0x37e2   :  { %v3030_v20 = vmul.f32 %v3029_v0, %v4921_v14  ;;  %v3132_v0 = vld [vmem:[#allocation24 + $0x8] sm:$0xff] }
0x37e4   :  { %3482 = vtanh.f32 %v3030_v20  ;;  %v3131_v20 = vld [vmem:[#allocation24] sm:$0xff] }
0x37ea   :  { %v3483_v6 = vpop.eup %3482 }
0x37eb   :  { %v3032_v1 = vmul.f32 %v3483_v6, %v4921_v14  ;;  %v3069_v14 = vld [vmem:[#allocation23 + $0x78] sm:$0xff]  ;;  %v3324_v6 = vld [vmem:[%s5191_s17] ss:$0 sm:$0xff] }
0x37ec   :  { %3090 = vmatpush.msra.mxu1 %v3069_v14 }
0x37ed   :  { %v5150_v51 = vadd.f32 %v3032_v1, %v4925_v18  ;;  %v3082_v18 = vld [vmem:[#allocation23 + $0xe0] sm:$0xff] }
0x37ee   :  { %3091 = vmatpush.msra.mxu1 %v3068_v53  ;;  %3113 = vmatpush.msrb.mxu2 %v3082_v18 }
0x37ef   :  { %3036 = vrot.lane.b32.xlu2 %v5150_v51, %s5215_s26  ;;  %v3034_v31 = vmul.f32 %v5150_v51, %v2992_v47  ;;  %v3139_v47 = vld [vmem:[#allocation24 + $0x40] sm:$0xff] }
0x37f0   :  { %3092 = vmatpush.msra.mxu1 %v3067_v29  ;;  %3114 = vmatpush.msrb.mxu2 %v3081_v34 }
0x37f1   :  { %3158 = vmatpush.msra.mxu3 %v3139_v47 }
0x37f2   :  { %3093 = vmatpush.msra.mxu1 %v3066_v13  ;;  %3115 = vmatpush.msrb.mxu2 %v3080_v56 }
0x37f3   :  { %3159 = vmatpush.msra.mxu3 %v3138_v3 }
0x37f4   :  { %3094 = vmatpush.msra.mxu1 %v3065_v48  ;;  %3116 = vmatpush.msrb.mxu2 %v3079_v45 }
0x37f5   :  { %3160 = vmatpush.msra.mxu3 %v3137_v50 }
0x37f6   :  { %3095 = vmatpush.msra.mxu1 %v3064_v9  ;;  %3117 = vmatpush.msrb.mxu2 %v3078_v35 }
0x37f8   :  { %3096 = vmatpush.msra.mxu1 %v3063_v54  ;;  %3118 = vmatpush.msrb.mxu2 %v3077_v59 }
0x37fa   :  { %3119 = vmatpush.msrb.mxu2 %v3076_v44  ;;  %3097 = vmatpush.msra.mxu1 %v3062_v21 }
0x37fc   :  { %3120 = vmatpush.msrb.mxu2 %v3075_v11  ;;  %3098 = vmatpush.msra.mxu1 %v3061_v12 }
0x37fe   :  { %3121 = vmatpush.msrb.mxu2 %v3074_v19  ;;  %3099 = vmatpush.msra.mxu1 %v3060_v42 }
0x3800   :  { %3122 = vmatpush.msrb.mxu2 %v3073_v63  ;;  %3100 = vmatpush.msra.mxu1 %v3059_v30 }
0x3802   :  { %3123 = vmatpush.msrb.mxu2 %v3072_v38  ;;  %3101 = vmatpush.msra.mxu1 %v3058_v41 }
0x3804   :  { %3124 = vmatpush.msrb.mxu2 %v3071_v36  ;;  %3102 = vmatpush.msra.mxu1 %v3057_v4 }
0x3806   :  { %3125 = vmatpush.msrb.mxu2 %v3070_v22  ;;  %3103 = vmatpush.msra.mxu1 %v3056_v17 }
0x3849   :  { %v3037_v40 = vpop.permute.xlu2 %3036 }
0x384a   :  { %v3039_v52 = vmul.f32 %v3037_v40, %v5150_v51 }
0x384c   :  { %3041 = vrot.lane.b32.xlu0 %v3039_v52, %s3820_s12 }
0x3854   :  { %3000 = vrot.lane.b32.xlu0 %v2998_v58, %s3821_s15  ;;  %v3136_v58 = vld [vmem:[#allocation24 + $0x28] sm:$0xff] }
0x3855   :  { %3161 = vmatpush.msra.mxu3 %v3136_v58 }
0x3857   :  { %3162 = vmatpush.msra.mxu3 %v3135_v55 }
0x3859   :  { %3163 = vmatpush.msra.mxu3 %v3134_v5 }
0x385b   :  { %3164 = vmatpush.msra.mxu3 %v3133_v39 }
0x385d   :  { %3165 = vmatpush.msra.mxu3 %v3132_v0 }
0x385f   :  { %3166 = vmatpush.msra.mxu3 %v3131_v20 }
0x38be   :  { %v3042_v27 = vpop.permute.xlu0 %3041 }
0x38bf   :  { %v3044_v49 = vadd.f32 %v3042_v27, %v3034_v31 }
0x38c1   :  { %3484 = vtanh.f32 %v3044_v49 }
0x38c6   :  { %v3001_v28 = vpop.permute.xlu0 %3000 }
0x38c7   :  { %v3485_v7 = vpop.eup %3484  ;;  %3003 = vst.msk [vmem:[#allocation6 + $0x8] sm:$0xff] %vm2798_vm2, %v3001_v28 }
0x38c8   :  { %3047 = vrot.lane.b32.xlu2 %v3485_v7, %s5215_s26 }
0x38d0   :  { %2795 = vrot.lane.b32.xlu2 %v5083_v10, %s3821_s15  ;;  %v3055_v10 = vld [vmem:[#allocation23 + $0x8] sm:$0xff] }
0x38d1   :  { %3104 = vmatpush.msra.mxu1 %v3055_v10 }
0x38d3   :  { %3105 = vmatpush.msra.mxu1 %v3054_v61 }
0x3922   :  { %v3048_v2 = vpop.permute.xlu2 %3047 }
0x3923   :  { %v3050_v43 = vmul.f32 %v3048_v2, %v5150_v51 }
0x3925   :  { %3051 = vst.msk [vmem:[#allocation6 + $0x8] sm:$0xff] %vm2847_vm3, %v3050_v43 }
0x392a   :  { %v2796_v60 = vpop.permute.xlu2 %2795 }
0x392b   :  { %2799 = vst.msk [vmem:[#allocation6] sm:$0xff] %vm2798_vm2, %v2796_v60 }
0x392c   :  { %2848 = vst.msk [vmem:[#allocation6] sm:$0xff] %vm2847_vm3, %v5099_v32  ;;  %v3053_v15 = vld [vmem:[#allocation6 + $0x8] sm:$0xff] }
0x392d   :  { %3126 = vmatmul.f32.vlgmr.msrb.gmra.mxu2 %v3053_v15 }
0x3933   :  { %v3052_v37 = vld [vmem:[#allocation6] sm:$0xff] }
0x3934   :  { %3106 = vmatmul.f32.vlgmr.msra.gmra.mxu1 %v3052_v37 }
0x39b0   :  { %v3127_v40 = vpop.f32.mrf.mxu2 }
0x39b1   :  { %v3107_v1 = vpop.f32.mrf.mxu1 }
0x39b2   :  { %v3108_v51 = vadd.f32 %v3324_v6, %v3107_v1 }
0x39b4   :  { %v3128_v32 = vadd.f32 %v3127_v40, %v3108_v51 }
0x39b6   :  { %v3130_v52 = vmax.f32 %v3128_v32, 0.0 }
0x39b8   :  { %3167 = vmatmul.f32.vlgmr.msra.gmra.mxu3 %v3130_v52 }
0x3a3b   :  { %v3168_v46 = vpop.f32.mrf.mxu3 }
0x3a3c   :  { %v3169_v16 = vadd.f32 %v3325_v57, %v3168_v46 }
0x3a3e   :  { %3171 = vmax.xlane.f32.xlu0 %v3169_v16 }
0x3ab1   :  { %v3172_v14 = vpop.xlane.xlu0 %3171 }
0x3ab2   :  { %v3173_v53 = vsub.f32 %v3169_v16, %v3172_v14 }
0x3ab4   :  { %v3174_v18 = vmul.f32 1.442695, %v3173_v53 }
0x3ab6   :  { %3486 = vpow2.f32 %v3174_v18 }
0x3abc   :  { %v3487_v29 = vpop.eup %3486 }
0x3abd   :  { %3176 = vadd.xlane.f32.xlu1 %v3487_v29 }
0x3b30   :  { %v3177_v34 = vpop.xlane.xlu1 %3176 }
0x3b31   :  { %3488 = vlog2.f32 %v3177_v34 }
0x3b37   :  { %v3489_v13 = vpop.eup %3488 }
0x3b38   :  { %v3179_v56 = vmul.f32 0.6931472, %v3489_v13 }
0x3b3a   :  { %v3180_v48 = vsub.f32 %v3173_v53, %v3179_v56 }
0x3b3c   :  { %3181 = vst [vmem:[%s5194_s20] sm:$0xff] %v3180_v48 }
0x3b3d   :  { %3186 = vsyncpa [#allocation8], 1 }
0x3b3e   :  { %3187 = vsyncpa [#allocation10], 1 }
0x3b3f   :  { %3188 = vsyncpa [#allocation13], 1 }
0x3b40   :  { %3189 = vsyncpa [#allocation16], 1 }
0x3b41   :  { %3190 = vsyncpa [#allocation19], 1 }
0x3b42   :  { %3191 = vsyncpa [#allocation22], 1 }
0x3b43   :  { %3192 = vsyncpa [#allocation25], 1 }

</bundles_post_ra>
